<compile_context>
chip_gen: v5e
topology: v5e:2x2
jax: 0.10.0
libtpu: 0.0.40
codegen_flags: <defaults>
</compile_context>

<pallas_src>
import functools
import math

import jax
import jax.numpy as jnp
import numpy as np
from jax.experimental import pallas as pl
from jax.experimental.pallas import tpu as pltpu


# ----------------------------------------------------------------------------
# Small helpers
# ----------------------------------------------------------------------------
def _round_up(x, m):
    return (x + m - 1) // m * m


def _vmem_limit_bytes(est_bytes):
    """>= default 32 MiB, <= 75% of physical VMEM (48 MiB fallback)."""
    cap = 64 * 1024 * 1024
    try:
        cap = int(pltpu.get_tpu_info().vmem_capacity_bytes)
    except Exception:
        pass
    return int(min(max(2 * est_bytes, 32 * 1024 * 1024), (3 * cap) // 4))


def unfold_nchw(x, ks, stride, pad):
    """PyTorch-compatible F.unfold — used ONLY by the pure-JAX reference."""
    N, C, H, W = x.shape
    xp = jnp.pad(x, ((0, 0), (0, 0), (pad, pad), (pad, pad)))
    Ho = (H + 2 * pad - ks) // stride + 1
    Wo = (W + 2 * pad - ks) // stride + 1
    cols = []
    for kh in range(ks):
        for kw in range(ks):
            cols.append(xp[:, :,
                           kh:kh + (Ho - 1) * stride + 1:stride,
                           kw:kw + (Wo - 1) * stride + 1:stride])
    cols = jnp.stack(cols, axis=2)                    # (N, C, ks*ks, Ho, Wo)
    return cols.reshape(N, C * ks * ks, Ho * Wo), Ho, Wo


# ----------------------------------------------------------------------------
# Fused DCFD kernel
# ----------------------------------------------------------------------------
def _shift_lanes(x, d):
    """y[..., q] = x[..., q + d].  Wrap-around only ever lands on halo /
    tail-padding lanes that are never consumed by valid output positions.
    (pltpu.roll(x, -d, axis=-1) is the XLU alternative.)"""
    if d == 0:
        return x
    return jnp.concatenate([x[..., d:], x[..., :d]], axis=-1)


def _make_dcfd_kernel(*, M, ks, Wp):
    # 3x3 bases_net taps (pad=1) and ks*ks unfold taps (pad=ks//2), as flat
    # lane offsets on the halo-padded, row-major flattened image.
    off3 = [dh * Wp + dw for dh in (-1, 0, 1) for dw in (-1, 0, 1)]
    offL = [(kh - ks // 2) * Wp + (kw - ks // 2)
            for kh in range(ks) for kw in range(ks)]

    def kernel(xg_ref, mask_ref, w1_ref, s1_ref, w2_ref, s2_ref,
               dict_ref, coef_ref, bias_ref, o_ref):
        xg = xg_ref[0]                                  # (C, T) bf16
        mask = mask_ref[...]                            # (1, T) f32, 1 inside image

        # ---- bases_net conv1 (+ folded BN + tanh), implicit im2col ---------
        z1 = None
        for tap, d in enumerate(off3):
            t = jnp.dot(w1_ref[tap], _shift_lanes(xg, d),
                        preferred_element_type=jnp.float32)
            z1 = t if z1 is None else z1 + t
        # mask zeroes the halo ring so conv2 sees PyTorch's zero padding
        f1 = (jnp.tanh(z1 + s1_ref[...]) * mask).astype(jnp.bfloat16)

        # ---- bases_net conv2 (+ folded BN + tanh), implicit im2col ---------
        z2 = None
        for tap, d in enumerate(off3):
            t = jnp.dot(w2_ref[tap], _shift_lanes(f1, d),
                        preferred_element_type=jnp.float32)
            z2 = t if z2 is None else z2 + t
        feat = jnp.tanh(z2 + s2_ref[...]).astype(jnp.bfloat16)   # (M*K, T)

        # ---- dictionary projection: einsum('bmkhw,kl->bmlhw'), (l,m)-major -
        proj = jnp.dot(dict_ref[...], feat,
                       preferred_element_type=jnp.float32)       # (L*M, T)

        # ---- per-pixel contraction over the ks*ks taps ----------------------
        # s[c, m, t] = sum_l x_tap_l[c, t] * proj[l*M + m, t]
        acc = None
        for l, d in enumerate(offL):
            xul = _shift_lanes(xg, d).astype(jnp.float32)        # (C, T)
            pr = proj[l * M:(l + 1) * M, :]                      # (M, T)
            term = xul[:, None, :] * pr[None, :, :]              # (C, M, T)
            acc = term if acc is None else acc + term
        s = acc.reshape(acc.shape[0] * M, acc.shape[-1]).astype(jnp.bfloat16)

        # ---- 1x1 coef conv + bias ------------------------------------------
        o_ref[0] = jnp.dot(coef_ref[...], s,
                           preferred_element_type=jnp.float32) + bias_ref[...]

    return kernel


# ----------------------------------------------------------------------------
# Parameter init (deterministic, mirrors the module __init__ shapes)
# ----------------------------------------------------------------------------
def init_conv_dcfd(key, in_channels, out_channels, kernel_size,
                   stride=1, padding=0, num_bases=6):
    len_list = kernel_size // 2
    tem_size = num_bases * len_list
    bases_size = num_bases * tem_size
    inter = max(64, bases_size // 2)
    ks = [jax.random.fold_in(key, i) for i in range(8)]
    p = {}
    # TODO(synk): calculate_FB_bases (Fourier-Bessel dictionary) is external;
    # a deterministic random buffer of the right shape stands in for it.
    p["bases"] = jax.random.normal(
        ks[0], (tem_size, kernel_size * kernel_size), jnp.float32)
    p["w1"] = jax.random.normal(ks[1], (inter, in_channels, 3, 3), jnp.float32) \
        * (1.0 / math.sqrt(in_channels * 9))
    p["b1"] = jnp.zeros((inter,), jnp.float32)
    p["w2"] = jax.random.normal(ks[2], (bases_size, inter, 3, 3), jnp.float32) \
        * (1.0 / math.sqrt(inter * 9))
    p["b2"] = jnp.zeros((bases_size,), jnp.float32)
    for name, c in (("bn1", inter), ("bn2", bases_size)):
        p[name] = dict(gamma=jnp.ones((c,), jnp.float32),
                       beta=jnp.zeros((c,), jnp.float32),
                       mean=jnp.zeros((c,), jnp.float32),
                       var=jnp.ones((c,), jnp.float32),
                       eps=1e-5)
    p["coef"] = jax.random.normal(
        ks[3], (out_channels, in_channels * num_bases), jnp.float32) \
        * math.sqrt(2.0 / out_channels)
    p["bias"] = jnp.zeros((out_channels,), jnp.float32)
    return p


# ----------------------------------------------------------------------------
# One-time constant prep (BN folding, tap-major weights, dictionary, bf16)
# ----------------------------------------------------------------------------
def prepare_conv_dcfd(params, *, in_channels, kernel_size, num_bases):
    C, ks, M = in_channels, kernel_size, num_bases
    L = ks * ks
    w1 = params["w1"]                       # (inter, C, 3, 3)
    w2 = params["w2"]                       # (M*K, inter, 3, 3)
    inter, MK = w1.shape[0], w2.shape[0]
    K = MK // M
    O = params["coef"].shape[0]

    def fold(w, b, bn):
        scale = bn["gamma"] / jnp.sqrt(bn["var"] + bn["eps"])
        w_tap = jnp.transpose(w, (2, 3, 0, 1)).reshape(9, w.shape[0], w.shape[1])
        w_tap = w_tap * scale[None, :, None]
        shift = ((b - bn["mean"]) * scale + bn["beta"])[:, None]
        return w_tap.astype(jnp.bfloat16), shift.astype(jnp.float32)

    w1t, s1 = fold(w1, params["b1"], params["bn1"])
    w2t, s2 = fold(w2, params["b2"], params["bn2"])

    # dict_lm[l*M + m, n*K + k] = bases[k, l] * delta(m, n)   -> rows (l, m)
    basesT = params["bases"].T                                   # (L, K)
    dict_lm = jnp.einsum("lk,mn->lmnk", basesT,
                         jnp.eye(M, dtype=basesT.dtype)).reshape(L * M, M * K)

    consts = dict(
        w1=w1t, s1=s1, w2=w2t, s2=s2,
        dict_lm=dict_lm.astype(jnp.bfloat16),
        coef=params["coef"].astype(jnp.bfloat16),
        bias=params["bias"][:, None].astype(jnp.float32))
    dims = dict(C=C, inter=inter, M=M, K=K, L=L, ks=ks, O=O)
    return consts, dims


# ----------------------------------------------------------------------------
# Forward (Pallas path)
# ----------------------------------------------------------------------------
def conv_dcfd_forward(consts, x, *, C, inter, M, K, L, ks, O, stride, padding):
    # TODO(synk): only stride=1 / 'same' padding has an implicit-GEMM path;
    # stride > 1 would need strided lane gathers or a host-im2col fallback.
    assert stride == 1 and padding == ks // 2, "Pallas path: stride=1, pad=ks//2"
    N, Cx, H, W = x.shape
    assert Cx == C

    r = max(1, ks // 2)                       # halo ring (covers conv pad=1 too)
    Hp, Wp = H + 2 * r, W + 2 * r
    HWp = Hp * Wp
    T = _round_up(HWp, 128)                   # lane-dense flattened length

    xg = jnp.pad(x, ((0, 0), (0, 0), (r, r), (r, r))).reshape(N, C, HWp)
    xg = jnp.pad(xg, ((0, 0), (0, 0), (0, T - HWp))).astype(jnp.bfloat16)

    q = jnp.arange(T)
    row, col = q // Wp, q % Wp
    mask = ((q < HWp) & (row >= r) & (row < r + H) &
            (col >= r) & (col < r + W)).astype(jnp.float32)[None, :]

    MK, LM, CM = M * K, L * M, C * M
    est = T * (4 * C + 2 * 9 * C // 9 + 8 * inter + 6 * MK + 4 * LM
               + 10 * CM + 4 * O + 2 * (2 * C + 4 * O + 4)) + (2 << 20)
    vmem_limit = _vmem_limit_bytes(est)

    kernel = _make_dcfd_kernel(M=M, ks=ks, Wp=Wp)
    out = pl.pallas_call(
        kernel,
        out_shape=jax.ShapeDtypeStruct((N, O, T), jnp.float32),
        grid_spec=pltpu.PrefetchScalarGridSpec(
            num_scalar_prefetch=0,
            grid=(N,),                                   # one padded image / step
            in_specs=[
                pl.BlockSpec((1, C, T), lambda n: (n, 0, 0)),      # xg
                pl.BlockSpec((1, T), lambda n: (0, 0)),            # mask
                pl.BlockSpec((9, inter, C), lambda n: (0, 0, 0)),  # w1 (tap-major)
                pl.BlockSpec((inter, 1), lambda n: (0, 0)),        # s1
                pl.BlockSpec((9, MK, inter), lambda n: (0, 0, 0)), # w2 (tap-major)
                pl.BlockSpec((MK, 1), lambda n: (0, 0)),           # s2
                pl.BlockSpec((LM, MK), lambda n: (0, 0)),          # dict
                pl.BlockSpec((O, CM), lambda n: (0, 0)),           # coef
                pl.BlockSpec((O, 1), lambda n: (0, 0)),            # bias
            ],
            out_specs=pl.BlockSpec((1, O, T), lambda n: (n, 0, 0)),
        ),
        compiler_params=pltpu.CompilerParams(
            dimension_semantics=("parallel",),
            vmem_limit_bytes=vmem_limit,
        ),
    )(xg, mask, consts["w1"], consts["s1"], consts["w2"], consts["s2"],
      consts["dict_lm"], consts["coef"], consts["bias"])

    out = out[:, :, :HWp].reshape(N, O, Hp, Wp)[:, :, r:r + H, r:r + W]
    return out


# ----------------------------------------------------------------------------
# Pure-JAX fp32 reference (eval-mode BN, dropout p=0 as in the module forward)
# ----------------------------------------------------------------------------
def conv_dcfd_reference(params, x, *, kernel_size, stride, padding, num_bases):
    N, C, H, W = x.shape
    ks, M = kernel_size, num_bases
    Hs, Ws = H // stride, W // stride
    tem = params["bases"].shape[0]

    def conv_bn_tanh_ref(patches, w, b, bn):
        y = jnp.einsum("op,npl->nol", w, patches) + b[None, :, None]
        scale = bn["gamma"] / jnp.sqrt(bn["var"] + bn["eps"])
        y = (y - bn["mean"][None, :, None]) * scale[None, :, None] \
            + bn["beta"][None, :, None]
        return jnp.tanh(y)

    p1, _, _ = unfold_nchw(x, 3, stride, 1)
    f1 = conv_bn_tanh_ref(p1, params["w1"].reshape(params["w1"].shape[0], -1),
                          params["b1"], params["bn1"])
    inter = f1.shape[1]
    p2, _, _ = unfold_nchw(f1.reshape(N, inter, Hs, Ws), 3, 1, 1)
    feat = conv_bn_tanh_ref(p2, params["w2"].reshape(params["w2"].shape[0], -1),
                            params["b2"], params["bn2"])
    feat = feat.reshape(N, M, tem, Hs, Ws)
    proj = jnp.einsum("bmkhw,kl->bmlhw", feat, params["bases"])
    xu, _, _ = unfold_nchw(x, ks, stride, padding)
    xv = xu.reshape(N, C, ks * ks, Hs, Ws)
    bo = jnp.einsum("bmlhw,bclhw->bcmhw", proj, xv).reshape(N, C * M, Hs, Ws)
    return jnp.einsum("oc,nchw->nohw", params["coef"], bo) \
        + params["bias"][None, :, None, None]


# ----------------------------------------------------------------------------
if __name__ == "__main__":
    key = jax.random.PRNGKey(0)
    # config: (N, C, H, W, O); exercises both a 128-multiple-free padded
    # spatial size (18*18=324) and an odd one with N=1 (17*17=289).
    configs = [(2, 4, 16, 16, 8), (1, 3, 15, 15, 5)]
    ks, stride, pad, M = 3, 1, 1, 6

    for idx, (N, C, H, W, O) in enumerate(configs):
        params = init_conv_dcfd(jax.random.fold_in(key, 10 + idx), C, O, ks,
                                stride=stride, padding=pad, num_bases=M)
        x = jax.random.normal(jax.random.fold_in(key, 20 + idx),
                              (N, C, H, W), jnp.float32)

        ref = conv_dcfd_reference(params, x, kernel_size=ks, stride=stride,
                                  padding=pad, num_bases=M)
        ref = np.asarray(jax.block_until_ready(ref))
        scale = float(np.std(ref)) + 1e-6

        consts, dims = prepare_conv_dcfd(params, in_channels=C,
                                         kernel_size=ks, num_bases=M)
        fwd = jax.jit(functools.partial(conv_dcfd_forward,
                                        stride=stride, padding=pad, **dims))
        out = np.asarray(jax.block_until_ready(fwd(consts, x)))

        assert out.shape == ref.shape, (out.shape, ref.shape)
        err = np.abs(out - ref)
        # bf16 MXU operands + fp32 accumulation: ~1% rms error expected;
        # structural bugs give errors on the order of the output scale.
        assert float(np.max(err)) / scale < 1e-1, float(np.max(err)) / scale
        assert float(np.mean(err)) / scale < 2.5e-2, float(np.mean(err)) / scale

    print("KERNEL_OK")
</pallas_src>

<mosaic_0001>
module attributes {stable_mosaic.version = 11 : i64} {
  func.func @kernel(%arg0: i32, %arg1: memref<1x4x384xbf16, #tpu.memory_space<vmem>>, %arg2: memref<1x384xf32, #tpu.memory_space<vmem>>, %arg3: memref<9x64x4xbf16, #tpu.memory_space<vmem>>, %arg4: memref<64x1xf32, #tpu.memory_space<vmem>>, %arg5: memref<9x36x64xbf16, #tpu.memory_space<vmem>>, %arg6: memref<36x1xf32, #tpu.memory_space<vmem>>, %arg7: memref<54x36xbf16, #tpu.memory_space<vmem>>, %arg8: memref<8x24xbf16, #tpu.memory_space<vmem>>, %arg9: memref<8x1xf32, #tpu.memory_space<vmem>>, %arg10: memref<1x8x384xf32, #tpu.memory_space<vmem>>) attributes {dimension_semantics = [#tpu.dimension_semantics<parallel>], iteration_bounds = array<i64: 2>, scalar_prefetch = 0 : i64, scratch_operands = 0 : i64, tpu.core_type = #tpu.core_type<tc>, window_params = [{transform_indices = @transform_0, window_bounds = array<i64: 1, 4, 384>}, {pipeline_mode = #tpu.pipeline_mode<synchronous>, transform_indices = @transform_1, window_bounds = array<i64: 1, 384>}, {pipeline_mode = #tpu.pipeline_mode<synchronous>, transform_indices = @transform_2, window_bounds = array<i64: 9, 64, 4>}, {pipeline_mode = #tpu.pipeline_mode<synchronous>, transform_indices = @transform_3, window_bounds = array<i64: 64, 1>}, {pipeline_mode = #tpu.pipeline_mode<synchronous>, transform_indices = @transform_4, window_bounds = array<i64: 9, 36, 64>}, {pipeline_mode = #tpu.pipeline_mode<synchronous>, transform_indices = @transform_5, window_bounds = array<i64: 36, 1>}, {pipeline_mode = #tpu.pipeline_mode<synchronous>, transform_indices = @transform_6, window_bounds = array<i64: 54, 36>}, {pipeline_mode = #tpu.pipeline_mode<synchronous>, transform_indices = @transform_7, window_bounds = array<i64: 8, 24>}, {pipeline_mode = #tpu.pipeline_mode<synchronous>, transform_indices = @transform_8, window_bounds = array<i64: 8, 1>}, {transform_indices = @transform_9, window_bounds = array<i64: 1, 8, 384>}]} {
    %c0 = arith.constant 0 : index
    %c0_0 = arith.constant 0 : index
    %c0_1 = arith.constant 0 : index
    %0 = vector.load %arg1[%c0, %c0_0, %c0_1] : memref<1x4x384xbf16, #tpu.memory_space<vmem>>, vector<1x4x384xbf16>
    %1 = vector.shape_cast %0 : vector<1x4x384xbf16> to vector<4x384xbf16>
    %c0_2 = arith.constant 0 : index
    %c0_3 = arith.constant 0 : index
    %2 = vector.load %arg2[%c0_2, %c0_3] : memref<1x384xf32, #tpu.memory_space<vmem>>, vector<1x384xf32>
    %c0_4 = arith.constant 0 : index
    %c0_5 = arith.constant 0 : index
    %c0_6 = arith.constant 0 : index
    %3 = vector.load %arg3[%c0_4, %c0_5, %c0_6] : memref<9x64x4xbf16, #tpu.memory_space<vmem>>, vector<1x64x4xbf16>
    %4 = vector.shape_cast %3 : vector<1x64x4xbf16> to vector<64x4xbf16>
    %5 = vector.extract_strided_slice %1 {offsets = [0, 365], sizes = [4, 19], strides = [1, 1]} : vector<4x384xbf16> to vector<4x19xbf16>
    %6 = vector.extract_strided_slice %1 {offsets = [0, 0], sizes = [4, 365], strides = [1, 1]} : vector<4x384xbf16> to vector<4x365xbf16>
    %7 = tpu.concatenate %5, %6 in 1 : vector<4x19xbf16>, vector<4x365xbf16> -> vector<4x384xbf16>
    %cst = arith.constant dense<0.000000e+00> : vector<64x384xf32>
    %8 = tpu.matmul %4, %7, %cst {dimension_numbers = #tpu.dot_dimension_numbers<[1], [0], [0], [1], [0, 0, 1, 1], [], []>} : vector<64x4xbf16>, vector<4x384xbf16>, vector<64x384xf32> -> vector<64x384xf32>
    %c1 = arith.constant 1 : index
    %c0_7 = arith.constant 0 : index
    %c0_8 = arith.constant 0 : index
    %9 = vector.load %arg3[%c1, %c0_7, %c0_8] : memref<9x64x4xbf16, #tpu.memory_space<vmem>>, vector<1x64x4xbf16>
    %10 = vector.shape_cast %9 : vector<1x64x4xbf16> to vector<64x4xbf16>
    %11 = vector.extract_strided_slice %1 {offsets = [0, 366], sizes = [4, 18], strides = [1, 1]} : vector<4x384xbf16> to vector<4x18xbf16>
    %12 = vector.extract_strided_slice %1 {offsets = [0, 0], sizes = [4, 366], strides = [1, 1]} : vector<4x384xbf16> to vector<4x366xbf16>
    %13 = tpu.concatenate %11, %12 in 1 : vector<4x18xbf16>, vector<4x366xbf16> -> vector<4x384xbf16>
    %cst_9 = arith.constant dense<0.000000e+00> : vector<64x384xf32>
    %14 = tpu.matmul %10, %13, %cst_9 {dimension_numbers = #tpu.dot_dimension_numbers<[1], [0], [0], [1], [0, 0, 1, 1], [], []>} : vector<64x4xbf16>, vector<4x384xbf16>, vector<64x384xf32> -> vector<64x384xf32>
    %15 = arith.addf %8, %14 : vector<64x384xf32>
    %c2 = arith.constant 2 : index
    %c0_10 = arith.constant 0 : index
    %c0_11 = arith.constant 0 : index
    %16 = vector.load %arg3[%c2, %c0_10, %c0_11] : memref<9x64x4xbf16, #tpu.memory_space<vmem>>, vector<1x64x4xbf16>
    %17 = vector.shape_cast %16 : vector<1x64x4xbf16> to vector<64x4xbf16>
    %18 = vector.extract_strided_slice %1 {offsets = [0, 367], sizes = [4, 17], strides = [1, 1]} : vector<4x384xbf16> to vector<4x17xbf16>
    %19 = vector.extract_strided_slice %1 {offsets = [0, 0], sizes = [4, 367], strides = [1, 1]} : vector<4x384xbf16> to vector<4x367xbf16>
    %20 = tpu.concatenate %18, %19 in 1 : vector<4x17xbf16>, vector<4x367xbf16> -> vector<4x384xbf16>
    %cst_12 = arith.constant dense<0.000000e+00> : vector<64x384xf32>
    %21 = tpu.matmul %17, %20, %cst_12 {dimension_numbers = #tpu.dot_dimension_numbers<[1], [0], [0], [1], [0, 0, 1, 1], [], []>} : vector<64x4xbf16>, vector<4x384xbf16>, vector<64x384xf32> -> vector<64x384xf32>
    %22 = arith.addf %15, %21 : vector<64x384xf32>
    %c3 = arith.constant 3 : index
    %c0_13 = arith.constant 0 : index
    %c0_14 = arith.constant 0 : index
    %23 = vector.load %arg3[%c3, %c0_13, %c0_14] : memref<9x64x4xbf16, #tpu.memory_space<vmem>>, vector<1x64x4xbf16>
    %24 = vector.shape_cast %23 : vector<1x64x4xbf16> to vector<64x4xbf16>
    %25 = vector.extract_strided_slice %1 {offsets = [0, 383], sizes = [4, 1], strides = [1, 1]} : vector<4x384xbf16> to vector<4x1xbf16>
    %26 = vector.extract_strided_slice %1 {offsets = [0, 0], sizes = [4, 383], strides = [1, 1]} : vector<4x384xbf16> to vector<4x383xbf16>
    %27 = tpu.concatenate %25, %26 in 1 : vector<4x1xbf16>, vector<4x383xbf16> -> vector<4x384xbf16>
    %cst_15 = arith.constant dense<0.000000e+00> : vector<64x384xf32>
    %28 = tpu.matmul %24, %27, %cst_15 {dimension_numbers = #tpu.dot_dimension_numbers<[1], [0], [0], [1], [0, 0, 1, 1], [], []>} : vector<64x4xbf16>, vector<4x384xbf16>, vector<64x384xf32> -> vector<64x384xf32>
    %29 = arith.addf %22, %28 : vector<64x384xf32>
    %c4 = arith.constant 4 : index
    %c0_16 = arith.constant 0 : index
    %c0_17 = arith.constant 0 : index
    %30 = vector.load %arg3[%c4, %c0_16, %c0_17] : memref<9x64x4xbf16, #tpu.memory_space<vmem>>, vector<1x64x4xbf16>
    %31 = vector.shape_cast %30 : vector<1x64x4xbf16> to vector<64x4xbf16>
    %cst_18 = arith.constant dense<0.000000e+00> : vector<64x384xf32>
    %32 = tpu.matmul %31, %1, %cst_18 {dimension_numbers = #tpu.dot_dimension_numbers<[1], [0], [0], [1], [0, 0, 1, 1], [], []>} : vector<64x4xbf16>, vector<4x384xbf16>, vector<64x384xf32> -> vector<64x384xf32>
    %33 = arith.addf %29, %32 : vector<64x384xf32>
    %c5 = arith.constant 5 : index
    %c0_19 = arith.constant 0 : index
    %c0_20 = arith.constant 0 : index
    %34 = vector.load %arg3[%c5, %c0_19, %c0_20] : memref<9x64x4xbf16, #tpu.memory_space<vmem>>, vector<1x64x4xbf16>
    %35 = vector.shape_cast %34 : vector<1x64x4xbf16> to vector<64x4xbf16>
    %36 = vector.extract_strided_slice %1 {offsets = [0, 1], sizes = [4, 383], strides = [1, 1]} : vector<4x384xbf16> to vector<4x383xbf16>
    %37 = vector.extract_strided_slice %1 {offsets = [0, 0], sizes = [4, 1], strides = [1, 1]} : vector<4x384xbf16> to vector<4x1xbf16>
    %38 = tpu.concatenate %36, %37 in 1 : vector<4x383xbf16>, vector<4x1xbf16> -> vector<4x384xbf16>
    %cst_21 = arith.constant dense<0.000000e+00> : vector<64x384xf32>
    %39 = tpu.matmul %35, %38, %cst_21 {dimension_numbers = #tpu.dot_dimension_numbers<[1], [0], [0], [1], [0, 0, 1, 1], [], []>} : vector<64x4xbf16>, vector<4x384xbf16>, vector<64x384xf32> -> vector<64x384xf32>
    %40 = arith.addf %33, %39 : vector<64x384xf32>
    %c6 = arith.constant 6 : index
    %c0_22 = arith.constant 0 : index
    %c0_23 = arith.constant 0 : index
    %41 = vector.load %arg3[%c6, %c0_22, %c0_23] : memref<9x64x4xbf16, #tpu.memory_space<vmem>>, vector<1x64x4xbf16>
    %42 = vector.shape_cast %41 : vector<1x64x4xbf16> to vector<64x4xbf16>
    %43 = vector.extract_strided_slice %1 {offsets = [0, 17], sizes = [4, 367], strides = [1, 1]} : vector<4x384xbf16> to vector<4x367xbf16>
    %44 = vector.extract_strided_slice %1 {offsets = [0, 0], sizes = [4, 17], strides = [1, 1]} : vector<4x384xbf16> to vector<4x17xbf16>
    %45 = tpu.concatenate %43, %44 in 1 : vector<4x367xbf16>, vector<4x17xbf16> -> vector<4x384xbf16>
    %cst_24 = arith.constant dense<0.000000e+00> : vector<64x384xf32>
    %46 = tpu.matmul %42, %45, %cst_24 {dimension_numbers = #tpu.dot_dimension_numbers<[1], [0], [0], [1], [0, 0, 1, 1], [], []>} : vector<64x4xbf16>, vector<4x384xbf16>, vector<64x384xf32> -> vector<64x384xf32>
    %47 = arith.addf %40, %46 : vector<64x384xf32>
    %c7 = arith.constant 7 : index
    %c0_25 = arith.constant 0 : index
    %c0_26 = arith.constant 0 : index
    %48 = vector.load %arg3[%c7, %c0_25, %c0_26] : memref<9x64x4xbf16, #tpu.memory_space<vmem>>, vector<1x64x4xbf16>
    %49 = vector.shape_cast %48 : vector<1x64x4xbf16> to vector<64x4xbf16>
    %50 = vector.extract_strided_slice %1 {offsets = [0, 18], sizes = [4, 366], strides = [1, 1]} : vector<4x384xbf16> to vector<4x366xbf16>
    %51 = vector.extract_strided_slice %1 {offsets = [0, 0], sizes = [4, 18], strides = [1, 1]} : vector<4x384xbf16> to vector<4x18xbf16>
    %52 = tpu.concatenate %50, %51 in 1 : vector<4x366xbf16>, vector<4x18xbf16> -> vector<4x384xbf16>
    %cst_27 = arith.constant dense<0.000000e+00> : vector<64x384xf32>
    %53 = tpu.matmul %49, %52, %cst_27 {dimension_numbers = #tpu.dot_dimension_numbers<[1], [0], [0], [1], [0, 0, 1, 1], [], []>} : vector<64x4xbf16>, vector<4x384xbf16>, vector<64x384xf32> -> vector<64x384xf32>
    %54 = arith.addf %47, %53 : vector<64x384xf32>
    %c8 = arith.constant 8 : index
    %c0_28 = arith.constant 0 : index
    %c0_29 = arith.constant 0 : index
    %55 = vector.load %arg3[%c8, %c0_28, %c0_29] : memref<9x64x4xbf16, #tpu.memory_space<vmem>>, vector<1x64x4xbf16>
    %56 = vector.shape_cast %55 : vector<1x64x4xbf16> to vector<64x4xbf16>
    %57 = vector.extract_strided_slice %1 {offsets = [0, 19], sizes = [4, 365], strides = [1, 1]} : vector<4x384xbf16> to vector<4x365xbf16>
    %58 = vector.extract_strided_slice %1 {offsets = [0, 0], sizes = [4, 19], strides = [1, 1]} : vector<4x384xbf16> to vector<4x19xbf16>
    %59 = tpu.concatenate %57, %58 in 1 : vector<4x365xbf16>, vector<4x19xbf16> -> vector<4x384xbf16>
    %cst_30 = arith.constant dense<0.000000e+00> : vector<64x384xf32>
    %60 = tpu.matmul %56, %59, %cst_30 {dimension_numbers = #tpu.dot_dimension_numbers<[1], [0], [0], [1], [0, 0, 1, 1], [], []>} : vector<64x4xbf16>, vector<4x384xbf16>, vector<64x384xf32> -> vector<64x384xf32>
    %61 = arith.addf %54, %60 : vector<64x384xf32>
    %c0_31 = arith.constant 0 : index
    %c0_32 = arith.constant 0 : index
    %62 = vector.load %arg4[%c0_31, %c0_32] : memref<64x1xf32, #tpu.memory_space<vmem>>, vector<64x1xf32>
    %63 = vector.broadcast %62 : vector<64x1xf32> to vector<64x384xf32>
    %64 = arith.addf %61, %63 : vector<64x384xf32>
    %65 = math.tanh %64 : vector<64x384xf32>
    %66 = vector.broadcast %2 : vector<1x384xf32> to vector<64x384xf32>
    %67 = arith.mulf %65, %66 : vector<64x384xf32>
    %68 = arith.truncf %67 : vector<64x384xf32> to vector<64x384xbf16>
    %c0_33 = arith.constant 0 : index
    %c0_34 = arith.constant 0 : index
    %c0_35 = arith.constant 0 : index
    %69 = vector.load %arg5[%c0_33, %c0_34, %c0_35] : memref<9x36x64xbf16, #tpu.memory_space<vmem>>, vector<1x36x64xbf16>
    %70 = vector.shape_cast %69 : vector<1x36x64xbf16> to vector<36x64xbf16>
    %71 = vector.extract_strided_slice %68 {offsets = [0, 365], sizes = [64, 19], strides = [1, 1]} : vector<64x384xbf16> to vector<64x19xbf16>
    %72 = vector.extract_strided_slice %68 {offsets = [0, 0], sizes = [64, 365], strides = [1, 1]} : vector<64x384xbf16> to vector<64x365xbf16>
    %73 = tpu.concatenate %71, %72 in 1 : vector<64x19xbf16>, vector<64x365xbf16> -> vector<64x384xbf16>
    %cst_36 = arith.constant dense<0.000000e+00> : vector<36x384xf32>
    %74 = tpu.matmul %70, %73, %cst_36 {dimension_numbers = #tpu.dot_dimension_numbers<[1], [0], [0], [1], [0, 0, 1, 1], [], []>} : vector<36x64xbf16>, vector<64x384xbf16>, vector<36x384xf32> -> vector<36x384xf32>
    %c1_37 = arith.constant 1 : index
    %c0_38 = arith.constant 0 : index
    %c0_39 = arith.constant 0 : index
    %75 = vector.load %arg5[%c1_37, %c0_38, %c0_39] : memref<9x36x64xbf16, #tpu.memory_space<vmem>>, vector<1x36x64xbf16>
    %76 = vector.shape_cast %75 : vector<1x36x64xbf16> to vector<36x64xbf16>
    %77 = vector.extract_strided_slice %68 {offsets = [0, 366], sizes = [64, 18], strides = [1, 1]} : vector<64x384xbf16> to vector<64x18xbf16>
    %78 = vector.extract_strided_slice %68 {offsets = [0, 0], sizes = [64, 366], strides = [1, 1]} : vector<64x384xbf16> to vector<64x366xbf16>
    %79 = tpu.concatenate %77, %78 in 1 : vector<64x18xbf16>, vector<64x366xbf16> -> vector<64x384xbf16>
    %cst_40 = arith.constant dense<0.000000e+00> : vector<36x384xf32>
    %80 = tpu.matmul %76, %79, %cst_40 {dimension_numbers = #tpu.dot_dimension_numbers<[1], [0], [0], [1], [0, 0, 1, 1], [], []>} : vector<36x64xbf16>, vector<64x384xbf16>, vector<36x384xf32> -> vector<36x384xf32>
    %81 = arith.addf %74, %80 : vector<36x384xf32>
    %c2_41 = arith.constant 2 : index
    %c0_42 = arith.constant 0 : index
    %c0_43 = arith.constant 0 : index
    %82 = vector.load %arg5[%c2_41, %c0_42, %c0_43] : memref<9x36x64xbf16, #tpu.memory_space<vmem>>, vector<1x36x64xbf16>
    %83 = vector.shape_cast %82 : vector<1x36x64xbf16> to vector<36x64xbf16>
    %84 = vector.extract_strided_slice %68 {offsets = [0, 367], sizes = [64, 17], strides = [1, 1]} : vector<64x384xbf16> to vector<64x17xbf16>
    %85 = vector.extract_strided_slice %68 {offsets = [0, 0], sizes = [64, 367], strides = [1, 1]} : vector<64x384xbf16> to vector<64x367xbf16>
    %86 = tpu.concatenate %84, %85 in 1 : vector<64x17xbf16>, vector<64x367xbf16> -> vector<64x384xbf16>
    %cst_44 = arith.constant dense<0.000000e+00> : vector<36x384xf32>
    %87 = tpu.matmul %83, %86, %cst_44 {dimension_numbers = #tpu.dot_dimension_numbers<[1], [0], [0], [1], [0, 0, 1, 1], [], []>} : vector<36x64xbf16>, vector<64x384xbf16>, vector<36x384xf32> -> vector<36x384xf32>
    %88 = arith.addf %81, %87 : vector<36x384xf32>
    %c3_45 = arith.constant 3 : index
    %c0_46 = arith.constant 0 : index
    %c0_47 = arith.constant 0 : index
    %89 = vector.load %arg5[%c3_45, %c0_46, %c0_47] : memref<9x36x64xbf16, #tpu.memory_space<vmem>>, vector<1x36x64xbf16>
    %90 = vector.shape_cast %89 : vector<1x36x64xbf16> to vector<36x64xbf16>
    %91 = vector.extract_strided_slice %68 {offsets = [0, 383], sizes = [64, 1], strides = [1, 1]} : vector<64x384xbf16> to vector<64x1xbf16>
    %92 = vector.extract_strided_slice %68 {offsets = [0, 0], sizes = [64, 383], strides = [1, 1]} : vector<64x384xbf16> to vector<64x383xbf16>
    %93 = tpu.concatenate %91, %92 in 1 : vector<64x1xbf16>, vector<64x383xbf16> -> vector<64x384xbf16>
    %cst_48 = arith.constant dense<0.000000e+00> : vector<36x384xf32>
    %94 = tpu.matmul %90, %93, %cst_48 {dimension_numbers = #tpu.dot_dimension_numbers<[1], [0], [0], [1], [0, 0, 1, 1], [], []>} : vector<36x64xbf16>, vector<64x384xbf16>, vector<36x384xf32> -> vector<36x384xf32>
    %95 = arith.addf %88, %94 : vector<36x384xf32>
    %c4_49 = arith.constant 4 : index
    %c0_50 = arith.constant 0 : index
    %c0_51 = arith.constant 0 : index
    %96 = vector.load %arg5[%c4_49, %c0_50, %c0_51] : memref<9x36x64xbf16, #tpu.memory_space<vmem>>, vector<1x36x64xbf16>
    %97 = vector.shape_cast %96 : vector<1x36x64xbf16> to vector<36x64xbf16>
    %cst_52 = arith.constant dense<0.000000e+00> : vector<36x384xf32>
    %98 = tpu.matmul %97, %68, %cst_52 {dimension_numbers = #tpu.dot_dimension_numbers<[1], [0], [0], [1], [0, 0, 1, 1], [], []>} : vector<36x64xbf16>, vector<64x384xbf16>, vector<36x384xf32> -> vector<36x384xf32>
    %99 = arith.addf %95, %98 : vector<36x384xf32>
    %c5_53 = arith.constant 5 : index
    %c0_54 = arith.constant 0 : index
    %c0_55 = arith.constant 0 : index
    %100 = vector.load %arg5[%c5_53, %c0_54, %c0_55] : memref<9x36x64xbf16, #tpu.memory_space<vmem>>, vector<1x36x64xbf16>
    %101 = vector.shape_cast %100 : vector<1x36x64xbf16> to vector<36x64xbf16>
    %102 = vector.extract_strided_slice %68 {offsets = [0, 1], sizes = [64, 383], strides = [1, 1]} : vector<64x384xbf16> to vector<64x383xbf16>
    %103 = vector.extract_strided_slice %68 {offsets = [0, 0], sizes = [64, 1], strides = [1, 1]} : vector<64x384xbf16> to vector<64x1xbf16>
    %104 = tpu.concatenate %102, %103 in 1 : vector<64x383xbf16>, vector<64x1xbf16> -> vector<64x384xbf16>
    %cst_56 = arith.constant dense<0.000000e+00> : vector<36x384xf32>
    %105 = tpu.matmul %101, %104, %cst_56 {dimension_numbers = #tpu.dot_dimension_numbers<[1], [0], [0], [1], [0, 0, 1, 1], [], []>} : vector<36x64xbf16>, vector<64x384xbf16>, vector<36x384xf32> -> vector<36x384xf32>
    %106 = arith.addf %99, %105 : vector<36x384xf32>
    %c6_57 = arith.constant 6 : index
    %c0_58 = arith.constant 0 : index
    %c0_59 = arith.constant 0 : index
    %107 = vector.load %arg5[%c6_57, %c0_58, %c0_59] : memref<9x36x64xbf16, #tpu.memory_space<vmem>>, vector<1x36x64xbf16>
    %108 = vector.shape_cast %107 : vector<1x36x64xbf16> to vector<36x64xbf16>
    %109 = vector.extract_strided_slice %68 {offsets = [0, 17], sizes = [64, 367], strides = [1, 1]} : vector<64x384xbf16> to vector<64x367xbf16>
    %110 = vector.extract_strided_slice %68 {offsets = [0, 0], sizes = [64, 17], strides = [1, 1]} : vector<64x384xbf16> to vector<64x17xbf16>
    %111 = tpu.concatenate %109, %110 in 1 : vector<64x367xbf16>, vector<64x17xbf16> -> vector<64x384xbf16>
    %cst_60 = arith.constant dense<0.000000e+00> : vector<36x384xf32>
    %112 = tpu.matmul %108, %111, %cst_60 {dimension_numbers = #tpu.dot_dimension_numbers<[1], [0], [0], [1], [0, 0, 1, 1], [], []>} : vector<36x64xbf16>, vector<64x384xbf16>, vector<36x384xf32> -> vector<36x384xf32>
    %113 = arith.addf %106, %112 : vector<36x384xf32>
    %c7_61 = arith.constant 7 : index
    %c0_62 = arith.constant 0 : index
    %c0_63 = arith.constant 0 : index
    %114 = vector.load %arg5[%c7_61, %c0_62, %c0_63] : memref<9x36x64xbf16, #tpu.memory_space<vmem>>, vector<1x36x64xbf16>
    %115 = vector.shape_cast %114 : vector<1x36x64xbf16> to vector<36x64xbf16>
    %116 = vector.extract_strided_slice %68 {offsets = [0, 18], sizes = [64, 366], strides = [1, 1]} : vector<64x384xbf16> to vector<64x366xbf16>
    %117 = vector.extract_strided_slice %68 {offsets = [0, 0], sizes = [64, 18], strides = [1, 1]} : vector<64x384xbf16> to vector<64x18xbf16>
    %118 = tpu.concatenate %116, %117 in 1 : vector<64x366xbf16>, vector<64x18xbf16> -> vector<64x384xbf16>
    %cst_64 = arith.constant dense<0.000000e+00> : vector<36x384xf32>
    %119 = tpu.matmul %115, %118, %cst_64 {dimension_numbers = #tpu.dot_dimension_numbers<[1], [0], [0], [1], [0, 0, 1, 1], [], []>} : vector<36x64xbf16>, vector<64x384xbf16>, vector<36x384xf32> -> vector<36x384xf32>
    %120 = arith.addf %113, %119 : vector<36x384xf32>
    %c8_65 = arith.constant 8 : index
    %c0_66 = arith.constant 0 : index
    %c0_67 = arith.constant 0 : index
    %121 = vector.load %arg5[%c8_65, %c0_66, %c0_67] : memref<9x36x64xbf16, #tpu.memory_space<vmem>>, vector<1x36x64xbf16>
    %122 = vector.shape_cast %121 : vector<1x36x64xbf16> to vector<36x64xbf16>
    %123 = vector.extract_strided_slice %68 {offsets = [0, 19], sizes = [64, 365], strides = [1, 1]} : vector<64x384xbf16> to vector<64x365xbf16>
    %124 = vector.extract_strided_slice %68 {offsets = [0, 0], sizes = [64, 19], strides = [1, 1]} : vector<64x384xbf16> to vector<64x19xbf16>
    %125 = tpu.concatenate %123, %124 in 1 : vector<64x365xbf16>, vector<64x19xbf16> -> vector<64x384xbf16>
    %cst_68 = arith.constant dense<0.000000e+00> : vector<36x384xf32>
    %126 = tpu.matmul %122, %125, %cst_68 {dimension_numbers = #tpu.dot_dimension_numbers<[1], [0], [0], [1], [0, 0, 1, 1], [], []>} : vector<36x64xbf16>, vector<64x384xbf16>, vector<36x384xf32> -> vector<36x384xf32>
    %127 = arith.addf %120, %126 : vector<36x384xf32>
    %c0_69 = arith.constant 0 : index
    %c0_70 = arith.constant 0 : index
    %128 = vector.load %arg6[%c0_69, %c0_70] : memref<36x1xf32, #tpu.memory_space<vmem>>, vector<36x1xf32>
    %129 = vector.broadcast %128 : vector<36x1xf32> to vector<36x384xf32>
    %130 = arith.addf %127, %129 : vector<36x384xf32>
    %131 = math.tanh %130 : vector<36x384xf32>
    %132 = arith.truncf %131 : vector<36x384xf32> to vector<36x384xbf16>
    %c0_71 = arith.constant 0 : index
    %c0_72 = arith.constant 0 : index
    %133 = vector.load %arg7[%c0_71, %c0_72] : memref<54x36xbf16, #tpu.memory_space<vmem>>, vector<54x36xbf16>
    %cst_73 = arith.constant dense<0.000000e+00> : vector<54x384xf32>
    %134 = tpu.matmul %133, %132, %cst_73 {dimension_numbers = #tpu.dot_dimension_numbers<[1], [0], [0], [1], [0, 0, 1, 1], [], []>} : vector<54x36xbf16>, vector<36x384xbf16>, vector<54x384xf32> -> vector<54x384xf32>
    %135 = vector.extract_strided_slice %1 {offsets = [0, 365], sizes = [4, 19], strides = [1, 1]} : vector<4x384xbf16> to vector<4x19xbf16>
    %136 = vector.extract_strided_slice %1 {offsets = [0, 0], sizes = [4, 365], strides = [1, 1]} : vector<4x384xbf16> to vector<4x365xbf16>
    %137 = tpu.concatenate %135, %136 in 1 : vector<4x19xbf16>, vector<4x365xbf16> -> vector<4x384xbf16>
    %138 = arith.extf %137 : vector<4x384xbf16> to vector<4x384xf32>
    %139 = vector.extract_strided_slice %134 {offsets = [0, 0], sizes = [6, 384], strides = [1, 1]} : vector<54x384xf32> to vector<6x384xf32>
    %140 = vector.shape_cast %138 : vector<4x384xf32> to vector<4x1x384xf32>
    %141 = vector.shape_cast %139 : vector<6x384xf32> to vector<1x6x384xf32>
    %142 = vector.broadcast %140 : vector<4x1x384xf32> to vector<4x6x384xf32>
    %143 = vector.broadcast %141 : vector<1x6x384xf32> to vector<4x6x384xf32>
    %144 = arith.mulf %142, %143 : vector<4x6x384xf32>
    %145 = vector.extract_strided_slice %1 {offsets = [0, 366], sizes = [4, 18], strides = [1, 1]} : vector<4x384xbf16> to vector<4x18xbf16>
    %146 = vector.extract_strided_slice %1 {offsets = [0, 0], sizes = [4, 366], strides = [1, 1]} : vector<4x384xbf16> to vector<4x366xbf16>
    %147 = tpu.concatenate %145, %146 in 1 : vector<4x18xbf16>, vector<4x366xbf16> -> vector<4x384xbf16>
    %148 = arith.extf %147 : vector<4x384xbf16> to vector<4x384xf32>
    %149 = vector.extract_strided_slice %134 {offsets = [6, 0], sizes = [6, 384], strides = [1, 1]} : vector<54x384xf32> to vector<6x384xf32>
    %150 = vector.shape_cast %148 : vector<4x384xf32> to vector<4x1x384xf32>
    %151 = vector.shape_cast %149 : vector<6x384xf32> to vector<1x6x384xf32>
    %152 = vector.broadcast %150 : vector<4x1x384xf32> to vector<4x6x384xf32>
    %153 = vector.broadcast %151 : vector<1x6x384xf32> to vector<4x6x384xf32>
    %154 = arith.mulf %152, %153 : vector<4x6x384xf32>
    %155 = arith.addf %144, %154 : vector<4x6x384xf32>
    %156 = vector.extract_strided_slice %1 {offsets = [0, 367], sizes = [4, 17], strides = [1, 1]} : vector<4x384xbf16> to vector<4x17xbf16>
    %157 = vector.extract_strided_slice %1 {offsets = [0, 0], sizes = [4, 367], strides = [1, 1]} : vector<4x384xbf16> to vector<4x367xbf16>
    %158 = tpu.concatenate %156, %157 in 1 : vector<4x17xbf16>, vector<4x367xbf16> -> vector<4x384xbf16>
    %159 = arith.extf %158 : vector<4x384xbf16> to vector<4x384xf32>
    %160 = vector.extract_strided_slice %134 {offsets = [12, 0], sizes = [6, 384], strides = [1, 1]} : vector<54x384xf32> to vector<6x384xf32>
    %161 = vector.shape_cast %159 : vector<4x384xf32> to vector<4x1x384xf32>
    %162 = vector.shape_cast %160 : vector<6x384xf32> to vector<1x6x384xf32>
    %163 = vector.broadcast %161 : vector<4x1x384xf32> to vector<4x6x384xf32>
    %164 = vector.broadcast %162 : vector<1x6x384xf32> to vector<4x6x384xf32>
    %165 = arith.mulf %163, %164 : vector<4x6x384xf32>
    %166 = arith.addf %155, %165 : vector<4x6x384xf32>
    %167 = vector.extract_strided_slice %1 {offsets = [0, 383], sizes = [4, 1], strides = [1, 1]} : vector<4x384xbf16> to vector<4x1xbf16>
    %168 = vector.extract_strided_slice %1 {offsets = [0, 0], sizes = [4, 383], strides = [1, 1]} : vector<4x384xbf16> to vector<4x383xbf16>
    %169 = tpu.concatenate %167, %168 in 1 : vector<4x1xbf16>, vector<4x383xbf16> -> vector<4x384xbf16>
    %170 = arith.extf %169 : vector<4x384xbf16> to vector<4x384xf32>
    %171 = vector.extract_strided_slice %134 {offsets = [18, 0], sizes = [6, 384], strides = [1, 1]} : vector<54x384xf32> to vector<6x384xf32>
    %172 = vector.shape_cast %170 : vector<4x384xf32> to vector<4x1x384xf32>
    %173 = vector.shape_cast %171 : vector<6x384xf32> to vector<1x6x384xf32>
    %174 = vector.broadcast %172 : vector<4x1x384xf32> to vector<4x6x384xf32>
    %175 = vector.broadcast %173 : vector<1x6x384xf32> to vector<4x6x384xf32>
    %176 = arith.mulf %174, %175 : vector<4x6x384xf32>
    %177 = arith.addf %166, %176 : vector<4x6x384xf32>
    %178 = arith.extf %1 : vector<4x384xbf16> to vector<4x384xf32>
    %179 = vector.extract_strided_slice %134 {offsets = [24, 0], sizes = [6, 384], strides = [1, 1]} : vector<54x384xf32> to vector<6x384xf32>
    %180 = vector.shape_cast %178 : vector<4x384xf32> to vector<4x1x384xf32>
    %181 = vector.shape_cast %179 : vector<6x384xf32> to vector<1x6x384xf32>
    %182 = vector.broadcast %180 : vector<4x1x384xf32> to vector<4x6x384xf32>
    %183 = vector.broadcast %181 : vector<1x6x384xf32> to vector<4x6x384xf32>
    %184 = arith.mulf %182, %183 : vector<4x6x384xf32>
    %185 = arith.addf %177, %184 : vector<4x6x384xf32>
    %186 = vector.extract_strided_slice %1 {offsets = [0, 1], sizes = [4, 383], strides = [1, 1]} : vector<4x384xbf16> to vector<4x383xbf16>
    %187 = vector.extract_strided_slice %1 {offsets = [0, 0], sizes = [4, 1], strides = [1, 1]} : vector<4x384xbf16> to vector<4x1xbf16>
    %188 = tpu.concatenate %186, %187 in 1 : vector<4x383xbf16>, vector<4x1xbf16> -> vector<4x384xbf16>
    %189 = arith.extf %188 : vector<4x384xbf16> to vector<4x384xf32>
    %190 = vector.extract_strided_slice %134 {offsets = [30, 0], sizes = [6, 384], strides = [1, 1]} : vector<54x384xf32> to vector<6x384xf32>
    %191 = vector.shape_cast %189 : vector<4x384xf32> to vector<4x1x384xf32>
    %192 = vector.shape_cast %190 : vector<6x384xf32> to vector<1x6x384xf32>
    %193 = vector.broadcast %191 : vector<4x1x384xf32> to vector<4x6x384xf32>
    %194 = vector.broadcast %192 : vector<1x6x384xf32> to vector<4x6x384xf32>
    %195 = arith.mulf %193, %194 : vector<4x6x384xf32>
    %196 = arith.addf %185, %195 : vector<4x6x384xf32>
    %197 = vector.extract_strided_slice %1 {offsets = [0, 17], sizes = [4, 367], strides = [1, 1]} : vector<4x384xbf16> to vector<4x367xbf16>
    %198 = vector.extract_strided_slice %1 {offsets = [0, 0], sizes = [4, 17], strides = [1, 1]} : vector<4x384xbf16> to vector<4x17xbf16>
    %199 = tpu.concatenate %197, %198 in 1 : vector<4x367xbf16>, vector<4x17xbf16> -> vector<4x384xbf16>
    %200 = arith.extf %199 : vector<4x384xbf16> to vector<4x384xf32>
    %201 = vector.extract_strided_slice %134 {offsets = [36, 0], sizes = [6, 384], strides = [1, 1]} : vector<54x384xf32> to vector<6x384xf32>
    %202 = vector.shape_cast %200 : vector<4x384xf32> to vector<4x1x384xf32>
    %203 = vector.shape_cast %201 : vector<6x384xf32> to vector<1x6x384xf32>
    %204 = vector.broadcast %202 : vector<4x1x384xf32> to vector<4x6x384xf32>
    %205 = vector.broadcast %203 : vector<1x6x384xf32> to vector<4x6x384xf32>
    %206 = arith.mulf %204, %205 : vector<4x6x384xf32>
    %207 = arith.addf %196, %206 : vector<4x6x384xf32>
    %208 = vector.extract_strided_slice %1 {offsets = [0, 18], sizes = [4, 366], strides = [1, 1]} : vector<4x384xbf16> to vector<4x366xbf16>
    %209 = vector.extract_strided_slice %1 {offsets = [0, 0], sizes = [4, 18], strides = [1, 1]} : vector<4x384xbf16> to vector<4x18xbf16>
    %210 = tpu.concatenate %208, %209 in 1 : vector<4x366xbf16>, vector<4x18xbf16> -> vector<4x384xbf16>
    %211 = arith.extf %210 : vector<4x384xbf16> to vector<4x384xf32>
    %212 = vector.extract_strided_slice %134 {offsets = [42, 0], sizes = [6, 384], strides = [1, 1]} : vector<54x384xf32> to vector<6x384xf32>
    %213 = vector.shape_cast %211 : vector<4x384xf32> to vector<4x1x384xf32>
    %214 = vector.shape_cast %212 : vector<6x384xf32> to vector<1x6x384xf32>
    %215 = vector.broadcast %213 : vector<4x1x384xf32> to vector<4x6x384xf32>
    %216 = vector.broadcast %214 : vector<1x6x384xf32> to vector<4x6x384xf32>
    %217 = arith.mulf %215, %216 : vector<4x6x384xf32>
    %218 = arith.addf %207, %217 : vector<4x6x384xf32>
    %219 = vector.extract_strided_slice %1 {offsets = [0, 19], sizes = [4, 365], strides = [1, 1]} : vector<4x384xbf16> to vector<4x365xbf16>
    %220 = vector.extract_strided_slice %1 {offsets = [0, 0], sizes = [4, 19], strides = [1, 1]} : vector<4x384xbf16> to vector<4x19xbf16>
    %221 = tpu.concatenate %219, %220 in 1 : vector<4x365xbf16>, vector<4x19xbf16> -> vector<4x384xbf16>
    %222 = arith.extf %221 : vector<4x384xbf16> to vector<4x384xf32>
    %223 = vector.extract_strided_slice %134 {offsets = [48, 0], sizes = [6, 384], strides = [1, 1]} : vector<54x384xf32> to vector<6x384xf32>
    %224 = vector.shape_cast %222 : vector<4x384xf32> to vector<4x1x384xf32>
    %225 = vector.shape_cast %223 : vector<6x384xf32> to vector<1x6x384xf32>
    %226 = vector.broadcast %224 : vector<4x1x384xf32> to vector<4x6x384xf32>
    %227 = vector.broadcast %225 : vector<1x6x384xf32> to vector<4x6x384xf32>
    %228 = arith.mulf %226, %227 : vector<4x6x384xf32>
    %229 = arith.addf %218, %228 : vector<4x6x384xf32>
    %230 = vector.shape_cast %229 : vector<4x6x384xf32> to vector<24x384xf32>
    %231 = arith.truncf %230 : vector<24x384xf32> to vector<24x384xbf16>
    %c0_74 = arith.constant 0 : index
    %c0_75 = arith.constant 0 : index
    %232 = vector.load %arg8[%c0_74, %c0_75] : memref<8x24xbf16, #tpu.memory_space<vmem>>, vector<8x24xbf16>
    %cst_76 = arith.constant dense<0.000000e+00> : vector<8x384xf32>
    %233 = tpu.matmul %232, %231, %cst_76 {dimension_numbers = #tpu.dot_dimension_numbers<[1], [0], [0], [1], [0, 0, 1, 1], [], []>} : vector<8x24xbf16>, vector<24x384xbf16>, vector<8x384xf32> -> vector<8x384xf32>
    %c0_77 = arith.constant 0 : index
    %c0_78 = arith.constant 0 : index
    %234 = vector.load %arg9[%c0_77, %c0_78] : memref<8x1xf32, #tpu.memory_space<vmem>>, vector<8x1xf32>
    %235 = vector.broadcast %234 : vector<8x1xf32> to vector<8x384xf32>
    %236 = arith.addf %233, %235 : vector<8x384xf32>
    %c0_79 = arith.constant 0 : index
    %c0_80 = arith.constant 0 : index
    %c0_81 = arith.constant 0 : index
    %237 = vector.load %arg10[%c0_79, %c0_80, %c0_81] : memref<1x8x384xf32, #tpu.memory_space<vmem>>, vector<1x8x384xf32>
    %238 = vector.shape_cast %237 : vector<1x8x384xf32> to vector<8x384xf32>
    %239 = vector.shape_cast %236 : vector<8x384xf32> to vector<1x8x384xf32>
    tpu.vector_store %arg10[%c0_79, %c0_80, %c0_81], %239 {strides = array<i32>} : memref<1x8x384xf32, #tpu.memory_space<vmem>>, vector<1x8x384xf32>,
    return
  }
  func.func @transform_0(%arg0: i32) -> (i32, i32, i32) {
    %c0_i32 = arith.constant 0 : i32
    %c0_i32_0 = arith.constant 0 : i32
    %c0_i32_1 = arith.constant 0 : i32
    return %arg0, %c0_i32, %c0_i32_0 : i32, i32, i32
  }
  func.func @transform_1(%arg0: i32) -> (i32, i32) {
    %c0_i32 = arith.constant 0 : i32
    %c0_i32_0 = arith.constant 0 : i32
    %c0_i32_1 = arith.constant 0 : i32
    return %c0_i32, %c0_i32_0 : i32, i32
  }
  func.func @transform_2(%arg0: i32) -> (i32, i32, i32) {
    %c0_i32 = arith.constant 0 : i32
    %c0_i32_0 = arith.constant 0 : i32
    %c0_i32_1 = arith.constant 0 : i32
    %c0_i32_2 = arith.constant 0 : i32
    return %c0_i32, %c0_i32_0, %c0_i32_1 : i32, i32, i32
  }
  func.func @transform_3(%arg0: i32) -> (i32, i32) {
    %c0_i32 = arith.constant 0 : i32
    %c0_i32_0 = arith.constant 0 : i32
    %c0_i32_1 = arith.constant 0 : i32
    return %c0_i32, %c0_i32_0 : i32, i32
  }
  func.func @transform_4(%arg0: i32) -> (i32, i32, i32) {
    %c0_i32 = arith.constant 0 : i32
    %c0_i32_0 = arith.constant 0 : i32
    %c0_i32_1 = arith.constant 0 : i32
    %c0_i32_2 = arith.constant 0 : i32
    return %c0_i32, %c0_i32_0, %c0_i32_1 : i32, i32, i32
  }
  func.func @transform_5(%arg0: i32) -> (i32, i32) {
    %c0_i32 = arith.constant 0 : i32
    %c0_i32_0 = arith.constant 0 : i32
    %c0_i32_1 = arith.constant 0 : i32
    return %c0_i32, %c0_i32_0 : i32, i32
  }
  func.func @transform_6(%arg0: i32) -> (i32, i32) {
    %c0_i32 = arith.constant 0 : i32
    %c0_i32_0 = arith.constant 0 : i32
    %c0_i32_1 = arith.constant 0 : i32
    return %c0_i32, %c0_i32_0 : i32, i32
  }
  func.func @transform_7(%arg0: i32) -> (i32, i32) {
    %c0_i32 = arith.constant 0 : i32
    %c0_i32_0 = arith.constant 0 : i32
    %c0_i32_1 = arith.constant 0 : i32
    return %c0_i32, %c0_i32_0 : i32, i32
  }
  func.func @transform_8(%arg0: i32) -> (i32, i32) {
    %c0_i32 = arith.constant 0 : i32
    %c0_i32_0 = arith.constant 0 : i32
    %c0_i32_1 = arith.constant 0 : i32
    return %c0_i32, %c0_i32_0 : i32, i32
  }
  func.func @transform_9(%arg0: i32) -> (i32, i32, i32) {
    %c0_i32 = arith.constant 0 : i32
    %c0_i32_0 = arith.constant 0 : i32
    %c0_i32_1 = arith.constant 0 : i32
    return %arg0, %c0_i32, %c0_i32_0 : i32, i32, i32
  }
}

</mosaic_0001>

<bundles_post_ra>
// kernel: conv_dcfd_forward.1
= control target key start
LH: loop header
LB: loop body
LE: loop exit
PB: predicated region body
PF: predicated region fallthrough
CT: control target
= control target key end

     0   :  { %s5785_s30 = smov 0   ;;  %s8753_s0 = inlined_call_operand.vmem [shape: bf16[2,4,384], index: 0, kind: input, shape index: {}]   ;;  %s8754_s1 = inlined_call_operand.vmem [shape: f32[1,384], index: 1, kind: input, shape index: {}]   ;;  %s8755_s2 = inlined_call_operand.vmem [shape: bf16[9,64,4], index: 2, kind: input, shape index: {}]   ;;  %s8756_s3 = inlined_call_operand.vmem [shape: f32[64,1], index: 3, kind: input, shape index: {}]   ;;  %s8757_s4 = inlined_call_operand.vmem [shape: bf16[9,36,64], index: 4, kind: input, shape index: {}]   ;;  %s8758_s5 = inlined_call_operand.vmem [shape: f32[36,1], index: 5, kind: input, shape index: {}]   ;;  %s8759_s6 = inlined_call_operand.vmem [shape: bf16[54,36], index: 6, kind: input, shape index: {}]   ;;  %s8760_s7 = inlined_call_operand.vmem [shape: bf16[8,24], index: 7, kind: input, shape index: {}]   ;;  %s8761_s8 = inlined_call_operand.vmem [shape: f32[8,1], index: 8, kind: input, shape index: {}]   ;;  %s8762_s9 = inlined_call_operand.vmem [shape: f32[2,8,384], index: 9, kind: output, shape index: {}]  }
   0x1 LB: > { %s5015_s10 = sadd.s32 4294967295, %s5724_s30   ;;  %p5019_p0 = scmp.ge.s32.totalorder %s5724_s30, 1  ;;  %s5724_s30 = sphi %s5785_s30, %s19_s30  }
   0x2   : > { %p287_p1 = scmp.lt.s32.totalorder %s5724_s30, 3 }
   0x4   : > { %p288_p2 = pnand %p5019_p0, %p287_p1 }
   0x6   : > { %291 = sbr.rel (%p288_p2) target bundleno = 1846 (0x736), region = 56 }
   0xb   : > { %p323_p3 = scmp.lt.s32.totalorder %s5015_s10, 1  ;;  %s5726_s15 = smov 19   ;;  %vm363_vm0 = vcmask 154624   ;;  %vm443_vm1 = vcmask 1041408   ;;  %v5828_v20 = vld [vmem:[%s8755_s2 + $0x8] sm:$0xff]  ;;  %vm430_vm2 = vcmask 31744  }
   0xc   : > { %s5727_s16 = smov 18   ;;  %s5728_s17 = smov 17   ;;  %vm400_vm3 = vcmask 146432   ;;  %v5845_v28 = vld [vmem:[%s8755_s2 + $0x10] sm:$0xff]  ;;  %v5564_v35 = vld [vmem:[%s8755_s2 + $0x20] sm:$0xff]  ;;  %vm3797_vm4 = vcmask 1040384  }
   0xd   : > { %s9187_s10 = smov (!%p323_p3, %s5015_s10), 1  ;;  %s5729_s18 = smov 1   ;;  %vm3800_vm5 = vcmask 1041409   ;;  %vm3805_vm6 = vcmask 1042434   ;;  %vm3810_vm7 = vcmask 1043459   ;;  %vm3802_vm8 = vcmask 1042433  }
   0xe   : > { %s5618_s11 = smul.u32 6, %s9187_s10  ;;  %vm3807_vm9 = vcmask 1043458   ;;  %vm3812_vm10 = vcmask 1044483   ;;  %v5880_v52 = vld [vmem:[%s8755_s2 + $0x18] sm:$0xff]  ;;  %v5565_v55 = vld [vmem:[%s8755_s2 + $0x28] sm:$0xff]  ;;  %vm693_vm11 = vcmask 138240  }
   0xf   : > { %vm881_vm12 = vcmask 7168   ;;  %s5731_s27 = smov 111   ;;  %s5732_s24 = smov 110   ;;  %vm1226_vm13 = vcmask 1039360   ;;  %vm1414_vm14 = vcmask 908288   ;;  %vm8769_vm15 = vcmask 900096  }
  0x10   : > { %s327_s14 = scalar_lea.vmem %s8753_s0, %s5618_s11  ;;  %s5733_s25 = smov 109  }
  0x11   : > { %v5799_v0 = vld [vmem:[%s327_s14] sm:$0x3f]  ;;  %s5730_s14 = smov 127  }
  0x12   : > { %8838 = vst [vmem:[#allocation2_spill] sm:$0xff] %v5799_v0 }
  0x13   : > { %345 = vst [vmem:[#allocation1] ss:$4 sm:$0xff] %v5799_v0 }
  0x1a   : > { %v346_v1 = vld.sshfl [vmem:[#allocation1 + $0x10] sm:$0xff pattern:$0x73625140] }
  0x1b   : > { %350 = vst [vmem:[#allocation1] ss:$4 sm:$0xff] %v5799_v0  ;;  %348 = vrot.lane.b32.xlu2 %v346_v1, %s5726_s15 }
  0x22   : > { %v351_v2 = vld.sshfl [vmem:[#allocation1] sm:$0xff pattern:$0x73625140]  ;;  %v353_v3 = vld.sshfl [vmem:[#allocation1 + $0x8] sm:$0xff pattern:$0x73625140] }
  0x23   : > { %v355_v4 = vld.sshfl [vmem:[#allocation1 + $0x10] sm:$0xff pattern:$0x73625140]  ;;  %357 = vrot.lane.b32.xlu2 %v351_v2, %s5726_s15 }
  0x24   : > { %382 = vst [vmem:[#allocation1] ss:$4 sm:$0xff] %v5799_v0 }
  0x2b   : > { %v383_v5 = vld.sshfl [vmem:[#allocation1 + $0x10] sm:$0xff pattern:$0x73625140]  ;;  %359 = vrot.lane.b32.xlu2 %v353_v3, %s5726_s15 }
  0x2c   : > { %385 = vrot.lane.b32.xlu1 %v383_v5, %s5727_s16  ;;  %387 = vst [vmem:[#allocation1] ss:$4 sm:$0xff] %v5799_v0 }
  0x33   : > { %v390_v6 = vld.sshfl [vmem:[#allocation1 + $0x8] sm:$0xff pattern:$0x73625140]  ;;  %v388_v7 = vld.sshfl [vmem:[#allocation1] sm:$0xff pattern:$0x73625140] }
  0x34   : > { %396 = vrot.lane.b32.xlu0 %v390_v6, %s5727_s16  ;;  %394 = vrot.lane.b32.xlu1 %v388_v7, %s5727_s16  ;;  %v392_v8 = vld.sshfl [vmem:[#allocation1 + $0x10] sm:$0xff pattern:$0x73625140] }
  0x35   : > { %675 = vst [vmem:[#allocation1] ss:$4 sm:$0xff] %v5799_v0 }
  0x3c   : > { %398 = vrot.lane.b32.xlu0 %v392_v8, %s5727_s16  ;;  %v676_v9 = vld.sshfl [vmem:[#allocation1 + $0x10] sm:$0xff pattern:$0x73625140] }
  0x3d   : > { %680 = vst [vmem:[#allocation1] ss:$4 sm:$0xff] %v5799_v0 }
  0x44   : > { %678 = vrot.lane.b32.xlu0 %v676_v9, %s5728_s17  ;;  %v681_v10 = vld.sshfl [vmem:[#allocation1] sm:$0xff pattern:$0x73625140]  ;;  %v683_v11 = vld.sshfl [vmem:[#allocation1 + $0x8] sm:$0xff pattern:$0x73625140] }
  0x45   : > { %687 = vrot.lane.b32.xlu1 %v681_v10, %s5728_s17  ;;  %v685_v12 = vld.sshfl [vmem:[#allocation1 + $0x10] sm:$0xff pattern:$0x73625140] }
  0x46   : > { %863 = vst [vmem:[#allocation1] ss:$4 sm:$0xff] %v5799_v0 }
  0x4c   : > { %361 = vrot.lane.b32.xlu0 %v355_v4, %s5726_s15 }
  0x4d   : > { %689 = vrot.lane.b32.xlu1 %v683_v11, %s5728_s17  ;;  %v864_v13 = vld.sshfl [vmem:[#allocation1 + $0x10] sm:$0xff pattern:$0x73625140] }
  0x4e   : > { %868 = vst [vmem:[#allocation1] ss:$4 sm:$0xff] %v5799_v0 }
  0x55   : > { %691 = vrot.lane.b32.xlu1 %v685_v12, %s5728_s17  ;;  %v871_v14 = vld.sshfl [vmem:[#allocation1 + $0x8] sm:$0xff pattern:$0x73625140]  ;;  %v873_v15 = vld.sshfl [vmem:[#allocation1 + $0x10] sm:$0xff pattern:$0x73625140] }
  0x56   : > { %877 = vrot.lane.b32.xlu0 %v871_v14, %s5729_s18  ;;  %v869_v21 = vld.sshfl [vmem:[#allocation1] sm:$0xff pattern:$0x73625140] }
  0x57   : > { %875 = vrot.lane.b32.xlu2 %v869_v21, %s5729_s18  ;;  %1071 = vst [vmem:[#allocation1] ss:$4 sm:$0xff] %v5799_v0 }
  0x5e   : > { %879 = vrot.lane.b32.xlu0 %v873_v15, %s5729_s18  ;;  %v5834_v23 = vld.sshfl [vmem:[#allocation1] sm:$0xff pattern:$0x73625140]  ;;  %v5836_v24 = vld.sshfl [vmem:[#allocation1 + $0x8] sm:$0xff pattern:$0x73625140] }
  0x5f   : > { %v5838_v25 = vld.sshfl [vmem:[#allocation1 + $0x10] sm:$0xff pattern:$0x73625140]  ;;  %866 = vrot.lane.b32.xlu2 %v864_v13, %s5729_s18 }
  0x60   : > { %1213 = vst [vmem:[#allocation1] ss:$4 sm:$0xff] %v5799_v0  ;;  %v5566_v15 = vld [vmem:[%s8755_s2 + $0x30] sm:$0xff] }
  0x75   : > { %v349_v16 = vpop.permute.xlu2 %348 }
  0x7d   : > { %v358_v17 = vpop.permute.xlu2 %357 }
  0x7e   : > { %v371_v18 = vsel %vm363_vm0, %v349_v16, %v358_v17 }
  0x7f   : > { %v571_v19 = vsel %vm443_vm1, %v371_v18, 0  ;;  %v3789_v56 = vunpack.c.l.bf16 %v371_v18 }
  0x80   : > { %5617 = vmatpush.bf16.msra.mxu3 %v571_v19 }
  0x83   : > { %5075 = vmatmul.msk.bf16.vlgmr.msra.gmra.mxu3 %vm430_vm2, %v5828_v20 }
  0x85   : > { %v360_v46 = vpop.permute.xlu2 %359 }
  0x86   : > { %v364_v53 = vsel %vm363_vm0, %v358_v17, %v360_v46 }
  0x87   : > { %v574_v58 = vsel %vm443_vm1, %v364_v53, 0  ;;  %v3790_v59 = vunpack.c.l.bf16 %v364_v53 }
  0x89   : > { %v3795_v61 = vrot.slane %v3790_v59, 7 }
  0x8b   : > { %v3798_v62 = vsel %vm3797_vm4, %v3789_v56, %v3795_v61  ;;  %v3801_v63 = vsel %vm3800_vm5, %v3789_v56, %v3795_v61  ;;  %v3806_v1 = vsel %vm3805_vm6, %v3789_v56, %v3795_v61  ;;  %v3811_v2 = vsel %vm3810_vm7, %v3789_v56, %v3795_v61 }
  0x93   : > { %5076 = vmatmul.msk.bf16.gmra.mxu3 %vm430_vm2, %v5845_v28 }
  0x9e   : > { %v386_v22 = vpop.permute.xlu1 %385 }
  0xa3   : > { %5077 = vmatmul.msk.bf16.gmra.mxu3 %vm430_vm2, %v5880_v52 }
  0xa6   : > { %v397_v26 = vpop.permute.xlu0 %396  ;;  %v395_v27 = vpop.permute.xlu1 %394 }
  0xa7   : > { %v408_v29 = vsel %vm400_vm3, %v386_v22, %v395_v27  ;;  %v401_v30 = vsel %vm400_vm3, %v395_v27, %v397_v26 }
  0xa8   : > { %v444_v31 = vsel %vm443_vm1, %v408_v29, 0  ;;  %v3851_v32 = vunpack.c.l.bf16 %v408_v29  ;;  %v447_v33 = vsel %vm443_vm1, %v401_v30, 0  ;;  %v3852_v34 = vunpack.c.l.bf16 %v401_v30  ;;  %v1214_v30 = vld.sshfl [vmem:[#allocation1] sm:$0xff pattern:$0x73625140] }
  0xa9   : > { %459 = vmatpush.bf16.msra.mxu0 %v444_v31  ;;  %488 = vmatpush.bf16.msra.mxu1 %v447_v33 }
  0xaa   : > { %v3857_v36 = vrot.slane %v3852_v34, 7  ;;  %1220 = vrot.lane.b32.xlu1 %v1214_v30, %s5730_s14  ;;  %v6048_v30 = vld [vmem:[%s8755_s2 + $0x70] sm:$0xff] }
  0xac   : > { %v3859_v37 = vsel %vm3797_vm4, %v3851_v32, %v3857_v36  ;;  %v3861_v38 = vsel %vm3800_vm5, %v3851_v32, %v3857_v36  ;;  %v3864_v39 = vsel %vm3805_vm6, %v3851_v32, %v3857_v36  ;;  %v3867_v40 = vsel %vm3810_vm7, %v3851_v32, %v3857_v36  ;;  %5046 = vmatmul.msk.bf16.vlgmr.msra.gmra.mxu0 %vm430_vm2, %v5564_v35 }
  0xad   : > { %5050 = vmatmul.msk.bf16.vlgmr.msra.gmra.mxu1 %vm430_vm2, %v5564_v35  ;;  %615 = vmatpush.bf16.msrb.mxu0 %v574_v58 }
  0xae   : > { %v399_v41 = vpop.permute.xlu0 %398 }
  0xaf   : > { %v402_v42 = vsel %vm400_vm3, %v397_v26, %v399_v41  ;;  %v5922_v26 = vld [vmem:[%s8755_s2 + $0x40] sm:$0xff]  ;;  %v1218_v41 = vld.sshfl [vmem:[#allocation1 + $0x10] sm:$0xff pattern:$0x73625140] }
  0xb0   : > { %v450_v43 = vsel %vm443_vm1, %v402_v42, 0  ;;  %v3853_v44 = vunpack.c.l.bf16 %v402_v42  ;;  %v1216_v42 = vld.sshfl [vmem:[#allocation1 + $0x8] sm:$0xff pattern:$0x73625140] }
  0xb1   : > { %517 = vmatpush.bf16.msra.mxu2 %v450_v43  ;;  %1222 = vrot.lane.b32.xlu2 %v1216_v42, %s5730_s14  ;;  %1231 = vst [vmem:[#allocation1] ss:$4 sm:$0xff] %v5799_v0 }
  0xb2   : > { %v3858_v45 = vrot.slane %v3853_v44, 6  ;;  %v5560_v44 = vld [vmem:[%s8755_s2] sm:$0xff] }
  0xb4   : > { %v5865_v47 = vsel %vm443_vm1, %v3859_v37, %v3858_v45  ;;  %v5868_v48 = vsel %vm3802_vm8, %v3861_v38, %v3858_v45  ;;  %v5871_v49 = vsel %vm3807_vm9, %v3864_v39, %v3858_v45  ;;  %v5874_v50 = vsel %vm3812_vm10, %v3867_v40, %v3858_v45  ;;  %5054 = vmatmul.msk.bf16.vlgmr.msra.gmra.mxu2 %vm430_vm2, %v5564_v35  ;;  %v5567_v39 = vld [vmem:[%s8755_s2 + $0x38] sm:$0xff]  ;;  %v5952_v40 = vld [vmem:[%s8755_s2 + $0x48] sm:$0xff]  ;;  %v5967_v45 = vld [vmem:[%s8755_s2 + $0x50] sm:$0xff] }
  0xb5   : > { %586 = vmatpush.bf16.msrb.mxu2 %v571_v19  ;;  %8839 = vst [vmem:[#allocation3_spill] sm:$0xff] %v5865_v47 }
  0xb6   : > { %8840 = vst [vmem:[#allocation4_spill] sm:$0xff] %v5868_v48  ;;  %v679_v51 = vpop.permute.xlu0 %678 }
  0xb7   : > { %8841 = vst [vmem:[#allocation5_spill] sm:$0xff] %v5871_v49  ;;  %v688_v54 = vpop.permute.xlu1 %687 }
  0xb8   : > { %8842 = vst [vmem:[#allocation6_spill] sm:$0xff] %v5874_v50  ;;  %v701_v57 = vsel %vm693_vm11, %v679_v51, %v688_v54 }
  0xb9   : > { %v735_v60 = vsel %vm443_vm1, %v701_v57, 0  ;;  %v4002_v19 = vunpack.c.l.bf16 %v701_v57  ;;  %1224 = vrot.lane.b32.xlu2 %v1218_v41, %s5730_s14 }
  0xba   : > { %750 = vmatpush.bf16.msra.mxu2 %v735_v60 }
  0xbc   : > { %5047 = vmatmul.msk.bf16.gmra.mxu0 %vm430_vm2, %v5565_v55 }
  0xbd   : > { %5051 = vmatmul.msk.bf16.gmra.mxu1 %vm430_vm2, %v5565_v55 }
  0xbe   : > { %v362_v3 = vpop.permute.xlu0 %361 }
  0xbf   : > { %v690_v4 = vpop.permute.xlu1 %689  ;;  %v365_v5 = vsel %vm363_vm0, %v360_v46, %v362_v3  ;;  %v1232_v46 = vld.sshfl [vmem:[#allocation1] sm:$0xff pattern:$0x73625140] }
  0xc0   : > { %v577_v6 = vsel %vm443_vm1, %v365_v5, 0  ;;  %v3791_v7 = vunpack.c.l.bf16 %v365_v5  ;;  %v694_v14 = vsel %vm693_vm11, %v688_v54, %v690_v4  ;;  %1401 = vst [vmem:[#allocation1] ss:$4 sm:$0xff] %v5799_v0 }
  0xc1   : > { %644 = vmatpush.bf16.msrb.mxu1 %v577_v6  ;;  %v738_v21 = vsel %vm443_vm1, %v694_v14, 0  ;;  %v4003_v22 = vunpack.c.l.bf16 %v694_v14 }
  0xc2   : > { %v3796_v8 = vrot.slane %v3791_v7, 6  ;;  %779 = vmatpush.bf16.msrb.mxu3 %v738_v21  ;;  %v6031_v21 = vld [vmem:[%s8755_s2 + $0x68] sm:$0xff] }
  0xc3   : > { %v4008_v29 = vrot.slane %v4003_v22, 7 }
  0xc4   : > { %5055 = vmatmul.msk.bf16.gmra.mxu2 %vm430_vm2, %v5565_v55  ;;  %v5901_v9 = vsel %vm443_vm1, %v3798_v62, %v3796_v8  ;;  %v5904_v10 = vsel %vm3802_vm8, %v3801_v63, %v3796_v8  ;;  %v5907_v11 = vsel %vm3807_vm9, %v3806_v1, %v3796_v8  ;;  %v5910_v12 = vsel %vm3812_vm10, %v3811_v2, %v3796_v8  ;;  %v876_v55 = vpop.permute.xlu2 %875  ;;  %v5986_v63 = vld [vmem:[%s8755_s2 + $0x58] sm:$0xff] }
  0xc5   : > { %8843 = vst [vmem:[#allocation7_spill] sm:$0xff] %v5901_v9  ;;  %v4010_v31 = vsel %vm3797_vm4, %v4002_v19, %v4008_v29  ;;  %v4012_v32 = vsel %vm3800_vm5, %v4002_v19, %v4008_v29  ;;  %v4015_v33 = vsel %vm3805_vm6, %v4002_v19, %v4008_v29  ;;  %v4018_v34 = vsel %vm3810_vm7, %v4002_v19, %v4008_v29  ;;  %v5572_v19 = vld [vmem:[%s8755_s2 + $0x60] sm:$0xff] }
  0xc6   : > { %8844 = vst [vmem:[#allocation8_spill] sm:$0xff] %v5904_v10  ;;  %5114 = vmatmul.msk.bf16.vlgmr.msrb.gmra.mxu3 %vm430_vm2, %v5922_v26 }
  0xc7   : > { %8845 = vst [vmem:[#allocation9_spill] sm:$0xff] %v5907_v11  ;;  %v692_v13 = vpop.permute.xlu1 %691  ;;  %v1404_v57 = vld.sshfl [vmem:[#allocation1 + $0x8] sm:$0xff pattern:$0x73625140] }
  0xc8   : > { %8846 = vst [vmem:[#allocation10_spill] sm:$0xff] %v5910_v12  ;;  %v695_v16 = vsel %vm693_vm11, %v690_v4, %v692_v13  ;;  %v878_v43 = vpop.permute.xlu0 %877  ;;  %1410 = vrot.lane.b32.xlu1 %v1404_v57, %s5731_s27  ;;  %v1406_v59 = vld.sshfl [vmem:[#allocation1 + $0x10] sm:$0xff pattern:$0x73625140] }
  0xc9   : > { %v741_v17 = vsel %vm443_vm1, %v695_v16, 0  ;;  %v4004_v18 = vunpack.c.l.bf16 %v695_v16  ;;  %v882_v56 = vsel %vm881_vm12, %v876_v55, %v878_v43  ;;  %v1402_v60 = vld.sshfl [vmem:[#allocation1] sm:$0xff pattern:$0x73625140] }
  0xca   : > { %808 = vmatpush.bf16.msra.mxu0 %v741_v17  ;;  %v926_v58 = vsel %vm443_vm1, %v882_v56, 0  ;;  %v4155_v61 = vunpack.c.l.bf16 %v882_v56  ;;  %1408 = vrot.lane.b32.xlu0 %v1402_v60, %s5731_s27  ;;  %1419 = vst [vmem:[#allocation1] ss:$4 sm:$0xff] %v5799_v0 }
  0xcb   : > { %v4009_v27 = vrot.slane %v4004_v18, 6 }
  0xcc   : > { %5048 = vmatmul.msk.bf16.gmra.mxu0 %vm430_vm2, %v5566_v15  ;;  %v4160_v1 = vrot.slane %v4155_v61, 7  ;;  %v867_v2 = vpop.permute.xlu2 %866 }
  0xcd   : > { %5052 = vmatmul.msk.bf16.gmra.mxu1 %vm430_vm2, %v5566_v15  ;;  %v5933_v35 = vsel %vm443_vm1, %v4010_v31, %v4009_v27  ;;  %v5936_v36 = vsel %vm3802_vm8, %v4012_v32, %v4009_v27  ;;  %v5939_v37 = vsel %vm3807_vm9, %v4015_v33, %v4009_v27  ;;  %v5942_v38 = vsel %vm3812_vm10, %v4018_v34, %v4009_v27 }
  0xce   : > { %8847 = vst [vmem:[#allocation11_spill] sm:$0xff] %v5933_v35  ;;  %v889_v4 = vsel %vm881_vm12, %v867_v2, %v876_v55  ;;  %v1089_v55 = vsel %vm443_vm1, %v5836_v24, 0 }
  0xcf   : > { %8848 = vst [vmem:[#allocation12_spill] sm:$0xff] %v5936_v36  ;;  %v923_v5 = vsel %vm443_vm1, %v889_v4, 0  ;;  %v4154_v6 = vunpack.c.l.bf16 %v889_v4  ;;  %v6112_v4 = vld [vmem:[%s8755_s2 + $0xa0] sm:$0xff] }
  0xd0   : > { %8849 = vst [vmem:[#allocation13_spill] sm:$0xff] %v5939_v37  ;;  %v880_v51 = vpop.permute.xlu0 %879  ;;  %1412 = vrot.lane.b32.xlu1 %v1406_v59, %s5731_s27  ;;  %938 = vmatpush.bf16.msra.mxu1 %v923_v5  ;;  %v1091_v5 = vsel %vm443_vm1, %v5838_v25, 0 }
  0xd1   : > { %8850 = vst [vmem:[#allocation14_spill] sm:$0xff] %v5942_v38  ;;  %v883_v53 = vsel %vm881_vm12, %v878_v43, %v880_v51  ;;  %v4162_v7 = vsel %vm3797_vm4, %v4154_v6, %v4160_v1  ;;  %v4164_v8 = vsel %vm3800_vm5, %v4154_v6, %v4160_v1  ;;  %v4167_v13 = vsel %vm3805_vm6, %v4154_v6, %v4160_v1  ;;  %v1420_v14 = vld.sshfl [vmem:[#allocation1] sm:$0xff pattern:$0x73625140] }
  0xd2   : > { %v929_v54 = vsel %vm443_vm1, %v883_v53, 0  ;;  %v4156_v62 = vunpack.c.l.bf16 %v883_v53  ;;  %1234 = vrot.lane.b32.xlu0 %v1232_v46, %s5730_s14  ;;  %1589 = vst [vmem:[#allocation1] ss:$4 sm:$0xff] %v5799_v0 }
  0xd3   : > { %996 = vmatpush.bf16.msra.mxu3 %v929_v54  ;;  %v1087_v54 = vsel %vm443_vm1, %v5834_v23, 0 }
  0xd4   : > { %5056 = vmatmul.msk.bf16.gmra.mxu2 %vm430_vm2, %v5566_v15  ;;  %v4161_v3 = vrot.slane %v4156_v62, 6 }
  0xd6   : > { %5115 = vmatmul.msk.bf16.gmra.mxu3 %vm430_vm2, %v5952_v40  ;;  %v6003_v15 = vsel %vm443_vm1, %v4162_v7, %v4161_v3  ;;  %v6006_v16 = vsel %vm3802_vm8, %v4164_v8, %v4161_v3  ;;  %v6009_v17 = vsel %vm3807_vm9, %v4167_v13, %v4161_v3 }
  0xd7   : > { %8851 = vst [vmem:[#allocation15_spill] sm:$0xff] %v6003_v15 }
  0xd8   : > { %8852 = vst [vmem:[#allocation16_spill] sm:$0xff] %v6006_v16  ;;  %1422 = vrot.lane.b32.xlu1 %v1420_v14, %s5731_s27 }
  0xd9   : > { %8853 = vst [vmem:[#allocation17_spill] sm:$0xff] %v6009_v17  ;;  %v1594_v43 = vld.sshfl [vmem:[#allocation1 + $0x10] sm:$0xff pattern:$0x73625140] }
  0xda   : > { %1600 = vrot.lane.b32.xlu0 %v1594_v43, %s5732_s24  ;;  %v1592_v46 = vld.sshfl [vmem:[#allocation1 + $0x8] sm:$0xff pattern:$0x73625140] }
  0xdb   : > { %1598 = vrot.lane.b32.xlu2 %v1592_v46, %s5732_s24 }
  0xdc   : > { %5049 = vmatmul.msk.bf16.gmra.mxu0 %vm430_vm2, %v5567_v39 }
  0xdd   : > { %5053 = vmatmul.msk.bf16.gmra.mxu1 %vm430_vm2, %v5567_v39 }
  0xe4   : > { %5057 = vmatmul.msk.bf16.gmra.mxu2 %vm430_vm2, %v5567_v39 }
  0xe6   : > { %5116 = vmatmul.msk.bf16.gmra.mxu3 %vm430_vm2, %v5967_v45 }
  0xec   : > { %5078 = vmatmul.msk.bf16.vlgmr.msrb.gmra.mxu0 %vm430_vm2, %v5560_v44 }
  0xed   : > { %5082 = vmatmul.msk.bf16.vlgmr.msrb.gmra.mxu1 %vm430_vm2, %v5560_v44  ;;  %1100 = vmatpush.bf16.msrb.mxu0 %v1087_v54 }
  0xee   : > { %1129 = vmatpush.bf16.msrb.mxu1 %v1089_v55 }
  0xf4   : > { %5074 = vmatmul.msk.bf16.vlgmr.msrb.gmra.mxu2 %vm430_vm2, %v5560_v44  ;;  %v1590_v44 = vld.sshfl [vmem:[#allocation1] sm:$0xff pattern:$0x73625140] }
  0xf5   : > { %967 = vmatpush.bf16.msrb.mxu2 %v926_v58  ;;  %1607 = vst [vmem:[#allocation1] ss:$4 sm:$0xff] %v5799_v0  ;;  %1596 = vrot.lane.b32.xlu2 %v1590_v44, %s5732_s24 }
  0xf6   : > { %5117 = vmatmul.msk.bf16.gmra.mxu3 %vm430_vm2, %v5986_v63 }
  0xfc   : > { %5079 = vmatmul.msk.bf16.gmra.mxu0 %vm430_vm2, %v5828_v20  ;;  %v1608_v59 = vld.sshfl [vmem:[#allocation1] sm:$0xff pattern:$0x73625140] }
  0xfd   : > { %5083 = vmatmul.msk.bf16.gmra.mxu1 %vm430_vm2, %v5828_v20  ;;  %v4170_v20 = vsel %vm3810_vm7, %v4154_v6, %v4160_v1  ;;  %1610 = vrot.lane.b32.xlu0 %v1608_v59, %s5732_s24  ;;  %1777 = vst [vmem:[#allocation1] ss:$4 sm:$0xff] %v5799_v0  ;;  %v6170_v59 = vld [vmem:[%s8755_s2 + $0xb0] sm:$0xff] }
  0xfe   : > { %v6012_v18 = vsel %vm3812_vm10, %v4170_v20, %v4161_v3 }
  0xff   : > { %8854 = vst [vmem:[#allocation18_spill] sm:$0xff] %v6012_v18 }
 0x104   : > { %5110 = vmatmul.msk.bf16.vlgmr.msra.gmra.mxu2 %vm430_vm2, %v5922_v26  ;;  %v1782_v12 = vld.sshfl [vmem:[#allocation1 + $0x10] sm:$0xff pattern:$0x73625140] }
 0x105   : > { %1158 = vmatpush.bf16.msra.mxu2 %v1091_v5  ;;  %1788 = vrot.lane.b32.xlu1 %v1782_v12, %s5733_s25 }
 0x106   : > { %5154 = vmatmul.msk.bf16.vlgmr.msra.gmra.mxu3 %vm430_vm2, %v5572_v19  ;;  %v593_v22 = vpop.f32.mrf.mxu3 }
 0x10b   : > { %v6091_v58 = vpop.permute.xlu2 %1222 }
 0x10c   : > { %5080 = vmatmul.msk.bf16.gmra.mxu0 %vm430_vm2, %v5845_v28 }
 0x10d   : > { %5084 = vmatmul.msk.bf16.gmra.mxu1 %vm430_vm2, %v5845_v28 }
 0x10e   : > { %v595_v28 = vpop.f32.mrf.mxu3 }
 0x113   : > { %v1225_v15 = vpop.permute.xlu2 %1224 }
 0x114   : > { %5111 = vmatmul.msk.bf16.gmra.mxu2 %vm430_vm2, %v5952_v40 }
 0x116   : > { %5155 = vmatmul.msk.bf16.gmra.mxu3 %vm430_vm2, %v6031_v21 }
 0x11c   : > { %5081 = vmatmul.msk.bf16.gmra.mxu0 %vm430_vm2, %v5880_v52  ;;  %v1221_v60 = vpop.permute.xlu1 %1220 }
 0x11d   : > { %5085 = vmatmul.msk.bf16.gmra.mxu1 %vm430_vm2, %v5880_v52  ;;  %v598_v52 = vpop.f32.mrf.mxu3  ;;  %v6098_v23 = vsel %vm1226_vm13, %v1221_v60, %v6091_v58 }
 0x11e   : > { %v1274_v24 = vsel %vm443_vm1, %v6098_v23, 0 }
 0x11f   : > { %1288 = vmatpush.bf16.msrb.mxu3 %v1274_v24 }
 0x124   : > { %5112 = vmatmul.msk.bf16.gmra.mxu2 %vm430_vm2, %v5967_v45 }
 0x125   : > { %v600_v33 = vpop.f32.mrf.mxu3 }
 0x126   : > { %5156 = vmatmul.msk.bf16.gmra.mxu3 %vm430_vm2, %v6048_v30 }
 0x129   : > { %v6041_v27 = vpop.f32.mrf.mxu0 }
 0x12a   : > { %v6043_v29 = vpop.f32.mrf.mxu1 }
 0x12c   : > { %5118 = vmatmul.msk.bf16.vlgmr.msra.gmra.mxu0 %vm430_vm2, %v5922_v26  ;;  %v6066_v26 = vld [vmem:[%s8755_s2 + $0x78] sm:$0xff] }
 0x12d   : > { %5146 = vmatmul.msk.bf16.vlgmr.msra.gmra.mxu1 %vm430_vm2, %v5572_v19  ;;  %v603_v51 = vpop.f32.mrf.mxu3 }
 0x131   : > { %v6055_v31 = vpop.f32.mrf.mxu0 }
 0x132   : > { %v6057_v32 = vpop.f32.mrf.mxu1 }
 0x134   : > { %5113 = vmatmul.msk.bf16.gmra.mxu2 %vm430_vm2, %v5986_v63 }
 0x135   : > { %v605_v62 = vpop.f32.mrf.mxu3 }
 0x136   : > { %5157 = vmatmul.msk.bf16.gmra.mxu3 %vm430_vm2, %v6066_v26 }
 0x137   : > { %v6061_v34 = vpop.f32.mrf.mxu2 }
 0x139   : > { %v466_v39 = vpop.f32.mrf.mxu0 }
 0x13a   : > { %v6068_v41 = vpop.f32.mrf.mxu1  ;;  %v6070_v42 = vadd.f32 %v593_v22, %v466_v39  ;;  %v1411_v46 = vpop.permute.xlu1 %1410 }
 0x13c   : > { %5119 = vmatmul.msk.bf16.gmra.mxu0 %vm430_vm2, %v5952_v40  ;;  %v1409_v24 = vpop.permute.xlu0 %1408 }
 0x13d   : > { %5147 = vmatmul.msk.bf16.gmra.mxu1 %vm430_vm2, %v6031_v21 }
 0x13f   : > { %v6081_v53 = vpop.f32.mrf.mxu2 }
 0x141   : > { %v468_v40 = vpop.f32.mrf.mxu0 }
 0x142   : > { %v6087_v56 = vpop.f32.mrf.mxu1  ;;  %v6089_v57 = vadd.f32 %v595_v28, %v468_v40  ;;  %v6139_v28 = vld [vmem:[%s8755_s2 + $0xa8] sm:$0xff] }
 0x144   : > { %5150 = vmatmul.msk.bf16.vlgmr.msrb.gmra.mxu2 %vm430_vm2, %v5572_v19 }
 0x146   : > { %5218 = vmatmul.msk.bf16.vlgmr.msrb.gmra.mxu3 %vm430_vm2, %v6112_v4 }
 0x147   : > { %v6103_v61 = vpop.f32.mrf.mxu2 }
 0x149   : > { %v471_v1 = vpop.f32.mrf.mxu0  ;;  %v781_v8 = vpop.f32.mrf.mxu3 }
 0x14a   : > { %v6105_v2 = vpop.f32.mrf.mxu1  ;;  %v6107_v3 = vadd.f32 %v598_v52, %v471_v1 }
 0x14c   : > { %5120 = vmatmul.msk.bf16.gmra.mxu0 %vm430_vm2, %v5967_v45 }
 0x14d   : > { %5148 = vmatmul.msk.bf16.gmra.mxu1 %vm430_vm2, %v6048_v30 }
 0x14f   : > { %v6122_v6 = vpop.f32.mrf.mxu2 }
 0x151   : > { %v473_v7 = vpop.f32.mrf.mxu0  ;;  %v783_v19 = vpop.f32.mrf.mxu3 }
 0x152   : > { %v6124_v13 = vpop.f32.mrf.mxu1  ;;  %v6126_v20 = vadd.f32 %v600_v33, %v473_v7 }
 0x154   : > { %5151 = vmatmul.msk.bf16.gmra.mxu2 %vm430_vm2, %v6031_v21 }
 0x156   : > { %5219 = vmatmul.msk.bf16.gmra.mxu3 %vm430_vm2, %v6139_v28 }
 0x157   : > { %v6130_v45 = vpop.f32.mrf.mxu2 }
 0x159   : > { %v476_v14 = vpop.f32.mrf.mxu0  ;;  %v6149_v33 = vpop.f32.mrf.mxu3 }
 0x15a   : > { %v6132_v25 = vpop.f32.mrf.mxu1  ;;  %v6134_v22 = vadd.f32 %v603_v51, %v476_v14 }
 0x15c   : > { %5121 = vmatmul.msk.bf16.gmra.mxu0 %vm430_vm2, %v5986_v63  ;;  %v6162_v63 = vld [vmem:[%s8755_s2 + $0x80] sm:$0xff] }
 0x15d   : > { %5149 = vmatmul.msk.bf16.gmra.mxu1 %vm430_vm2, %v6066_v26 }
 0x15f   : > { %v6147_v21 = vpop.f32.mrf.mxu2 }
 0x161   : > { %v478_v52 = vpop.f32.mrf.mxu0  ;;  %v6164_v54 = vpop.f32.mrf.mxu3 }
 0x162   : > { %v6151_v39 = vpop.f32.mrf.mxu1  ;;  %v6153_v43 = vadd.f32 %v605_v62, %v478_v52 }
 0x164   : > { %5152 = vmatmul.msk.bf16.gmra.mxu2 %vm430_vm2, %v6048_v30 }
 0x166   : > { %5220 = vmatmul.msk.bf16.gmra.mxu3 %vm430_vm2, %v6170_v59 }
 0x167   : > { %v6157_v44 = vpop.f32.mrf.mxu2 }
 0x169   : > { %v617_v51 = vpop.f32.mrf.mxu0  ;;  %v6187_v7 = vpop.f32.mrf.mxu3 }
 0x16a   : > { %v618_v55 = vadd.f32 %v617_v51, %v6043_v29  ;;  %v646_v40 = vpop.f32.mrf.mxu1  ;;  %v1415_v29 = vsel %vm1414_vm14, %v1409_v24, %v1411_v46 }
 0x16b   : > { %v6173_v30 = vadd.f32 %v646_v40, %v6061_v34  ;;  %v1462_v62 = vsel %vm443_vm1, %v1415_v29, 0  ;;  %v1413_v34 = vpop.permute.xlu1 %1412  ;;  %v4480_v40 = vunpack.c.l.bf16 %v1415_v29 }
 0x16c   : > { %v6175_v60 = vadd.f32 %v781_v8, %v618_v55  ;;  %5182 = vmatmul.msk.bf16.vlgmr.msrb.gmra.mxu0 %vm430_vm2, %v6162_v63  ;;  %1476 = vmatpush.bf16.msrb.mxu2 %v1462_v62  ;;  %v1416_v8 = vsel %vm1414_vm14, %v1411_v46, %v1413_v34  ;;  %v1228_v46 = vsel %vm1226_vm13, %v6091_v58, %v1225_v15 }
 0x16d   : > { %5186 = vmatmul.msk.bf16.vlgmr.msrb.gmra.mxu1 %vm430_vm2, %v6162_v63  ;;  %v1465_v51 = vsel %vm443_vm1, %v1416_v8, 0  ;;  %v4481_v55 = vunpack.c.l.bf16 %v1416_v8  ;;  %v1277_v8 = vsel %vm443_vm1, %v1228_v46, 0  ;;  %v4330_v29 = vunpack.c.l.bf16 %v1228_v46 }
 0x16e   : > { %1505 = vmatpush.bf16.msra.mxu3 %v1465_v51  ;;  %1317 = vmatpush.bf16.msra.mxu0 %v1277_v8 }
 0x16f   : > { %v6185_v1 = vpop.f32.mrf.mxu2  ;;  %v4486_v62 = vrot.slane %v4481_v55, 7  ;;  %v4335_v55 = vrot.slane %v4330_v29, 7 }
 0x171   : > { %v619_v5 = vpop.f32.mrf.mxu0  ;;  %v793_v8 = vpop.f32.mrf.mxu3 }
 0x172   : > { %v620_v14 = vadd.f32 %v619_v5, %v6057_v32  ;;  %v648_v52 = vpop.f32.mrf.mxu1  ;;  %v1235_v32 = vpop.permute.xlu0 %1234  ;;  %v4329_v5 = vunpack.c.l.bf16 %v6098_v23  ;;  %v6212_v23 = vld [vmem:[%s8755_s2 + $0x88] sm:$0xff] }
 0x173   : > { %v6193_v24 = vadd.f32 %v648_v52, %v6081_v53  ;;  %v1239_v53 = vsel %vm1226_vm13, %v1225_v15, %v1235_v32  ;;  %v4488_v52 = vsel %vm3797_vm4, %v4480_v40, %v4486_v62  ;;  %v1423_v15 = vpop.permute.xlu1 %1422 }
 0x174   : > { %v6195_v18 = vadd.f32 %v783_v19, %v620_v14  ;;  %5153 = vmatmul.msk.bf16.gmra.mxu2 %vm430_vm2, %v6066_v26  ;;  %v4490_v19 = vsel %vm3800_vm5, %v4480_v40, %v4486_v62  ;;  %v4493_v14 = vsel %vm3805_vm6, %v4480_v40, %v4486_v62  ;;  %v4496_v26 = vsel %vm3810_vm7, %v4480_v40, %v4486_v62 }
 0x175   : > { %v1279_v58 = vsel %vm443_vm1, %v1239_v53, 0  ;;  %v4331_v17 = vunpack.c.l.bf16 %v1239_v53  ;;  %v4337_v32 = vsel %vm3797_vm4, %v4329_v5, %v4335_v55  ;;  %v4339_v16 = vsel %vm3800_vm5, %v4329_v5, %v4335_v55 }
 0x176   : > { %1346 = vmatpush.bf16.msra.mxu1 %v1279_v58  ;;  %v4342_v40 = vsel %vm3805_vm6, %v4329_v5, %v4335_v55  ;;  %v4345_v62 = vsel %vm3810_vm7, %v4329_v5, %v4335_v55  ;;  %v1427_v38 = vsel %vm1414_vm14, %v1413_v34, %v1423_v15  ;;  %v6223_v58 = vld [vmem:[%s8755_s2 + $0xb8] sm:$0xff] }
 0x177   : > { %v588_v51 = vpop.f32.mrf.mxu2  ;;  %v4336_v35 = vrot.slane %v4331_v17, 6  ;;  %v1467_v36 = vsel %vm443_vm1, %v1427_v38, 0  ;;  %v4482_v9 = vunpack.c.l.bf16 %v1427_v38  ;;  %5221 = vmatmul.msk.bf16.gmra.mxu3 %vm430_vm2, %v6223_v58 }
 0x178   : > { %1534 = vmatpush.bf16.msrb.mxu0 %v1467_v36  ;;  %v1780_v36 = vld.sshfl [vmem:[#allocation1 + $0x8] sm:$0xff pattern:$0x73625140] }
 0x179   : > { %v622_v46 = vpop.f32.mrf.mxu0  ;;  %v6235_v17 = vsel %vm443_vm1, %v4337_v32, %v4336_v35  ;;  %v6241_v34 = vsel %vm3807_vm9, %v4342_v40, %v4336_v35  ;;  %v6246_v38 = vsel %vm3812_vm10, %v4345_v62, %v4336_v35  ;;  %1786 = vrot.lane.b32.xlu1 %v1780_v36, %s5733_s25 }
 0x17a   : > { %v623_v29 = vadd.f32 %v622_v46, %v6068_v41  ;;  %v651_v53 = vpop.f32.mrf.mxu1  ;;  %8855 = vst [vmem:[#allocation19_spill] sm:$0xff] %v6235_v17  ;;  %v6238_v41 = vsel %vm3802_vm8, %v4339_v16, %v4336_v35  ;;  %v796_v46 = vpop.f32.mrf.mxu3 }
 0x17b   : > { %v6226_v37 = vadd.f32 %v651_v53, %v6103_v61  ;;  %8856 = vst [vmem:[#allocation20_spill] sm:$0xff] %v6238_v41  ;;  %v4487_v61 = vrot.slane %v4482_v9, 6  ;;  %v6283_v53 = vld [vmem:[%s8755_s2 + $0xc0] sm:$0xff] }
 0x17c   : > { %v6230_v5 = vadd.f32 %v6149_v33, %v623_v29  ;;  %5183 = vmatmul.msk.bf16.gmra.mxu0 %vm430_vm2, %v6212_v23  ;;  %8857 = vst [vmem:[#allocation21_spill] sm:$0xff] %v6241_v34 }
 0x17d   : > { %5187 = vmatmul.msk.bf16.gmra.mxu1 %vm430_vm2, %v6212_v23  ;;  %8858 = vst [vmem:[#allocation22_spill] sm:$0xff] %v6246_v38  ;;  %v6252_v55 = vsel %vm443_vm1, %v4488_v52, %v4487_v61  ;;  %v6255_v15 = vsel %vm3802_vm8, %v4490_v19, %v4487_v61  ;;  %v6259_v40 = vsel %vm3807_vm9, %v4493_v14, %v4487_v61  ;;  %v1778_v19 = vld.sshfl [vmem:[#allocation1] sm:$0xff pattern:$0x73625140] }
 0x17e   : > { %8859 = vst [vmem:[#allocation23_spill] sm:$0xff] %v6252_v55  ;;  %v6262_v9 = vsel %vm3812_vm10, %v4496_v26, %v4487_v61  ;;  %1784 = vrot.lane.b32.xlu0 %v1778_v19, %s5733_s25 }
 0x17f   : > { %v590_v33 = vpop.f32.mrf.mxu2  ;;  %8860 = vst [vmem:[#allocation24_spill] sm:$0xff] %v6255_v15 }
 0x180   : > { %8861 = vst [vmem:[#allocation25_spill] sm:$0xff] %v6259_v40 }
 0x181   : > { %v624_v16 = vpop.f32.mrf.mxu0  ;;  %8862 = vst [vmem:[#allocation26_spill] sm:$0xff] %v6262_v9 }
 0x182   : > { %v625_v35 = vadd.f32 %v624_v16, %v6087_v56  ;;  %v653_v32 = vpop.f32.mrf.mxu1  ;;  %1795 = vst [vmem:[#allocation1] ss:$4 sm:$0xff] %v5799_v0  ;;  %v589_v56 = vadd.f32 %v588_v51, %v6041_v27  ;;  %v798_v62 = vpop.f32.mrf.mxu3  ;;  %v591_v51 = vadd.f32 %v590_v33, %v6055_v31  ;;  %v5579_v33 = vld [vmem:[%s8755_s2 + $0x98] sm:$0xff] }
 0x183   : > { %v6265_v12 = vadd.f32 %v653_v32, %v6122_v6  ;;  %v5578_v6 = vld [vmem:[%s8755_s2 + $0x90] sm:$0xff] }
 0x184   : > { %v6268_v52 = vadd.f32 %v6164_v54, %v625_v35  ;;  %5190 = vmatmul.msk.bf16.vlgmr.msra.gmra.mxu2 %vm430_vm2, %v6162_v63 }
 0x187   : > { %v752_v14 = vpop.f32.mrf.mxu2  ;;  %5258 = vmatmul.msk.bf16.vlgmr.msra.gmra.mxu3 %vm430_vm2, %v6283_v53 }
 0x188   : > { %v830_v26 = vadd.f32 %v752_v14, %v589_v56 }
 0x189   : > { %v627_v54 = vpop.f32.mrf.mxu0 }
 0x18a   : > { %v628_v29 = vadd.f32 %v627_v54, %v6105_v2  ;;  %v656_v63 = vpop.f32.mrf.mxu1  ;;  %v998_v32 = vpop.f32.mrf.mxu3 }
 0x18b   : > { %v6286_v61 = vadd.f32 %v656_v63, %v6130_v45 }
 0x18c   : > { %v6289_v27 = vadd.f32 %v6187_v7, %v628_v29  ;;  %5184 = vmatmul.msk.bf16.gmra.mxu0 %vm430_vm2, %v5578_v6 }
 0x18d   : > { %5188 = vmatmul.msk.bf16.gmra.mxu1 %vm430_vm2, %v5578_v6 }
 0x18f   : > { %v754_v2 = vpop.f32.mrf.mxu2 }
 0x190   : > { %v833_v16 = vadd.f32 %v754_v2, %v591_v51 }
 0x191   : > { %v629_v35 = vpop.f32.mrf.mxu0 }
 0x192   : > { %v630_v36 = vadd.f32 %v629_v35, %v6124_v13  ;;  %v658_v45 = vpop.f32.mrf.mxu1  ;;  %v1000_v54 = vpop.f32.mrf.mxu3 }
 0x193   : > { %v6298_v19 = vadd.f32 %v658_v45, %v6147_v21  ;;  %v6314_v21 = vld [vmem:[%s8755_s2 + $0xc8] sm:$0xff] }
 0x194   : > { %v6300_v7 = vadd.f32 %v793_v8, %v630_v36  ;;  %5191 = vmatmul.msk.bf16.gmra.mxu2 %vm430_vm2, %v6212_v23  ;;  %v1796_v8 = vld.sshfl [vmem:[#allocation1] sm:$0xff pattern:$0x73625140] }
 0x195   : > { %1798 = vrot.lane.b32.xlu2 %v1796_v8, %s5733_s25 }
 0x197   : > { %v757_v56 = vpop.f32.mrf.mxu2  ;;  %5259 = vmatmul.msk.bf16.gmra.mxu3 %vm430_vm2, %v6314_v21 }
 0x198   : > { %v6305_v31 = vadd.f32 %v757_v56, %v6070_v42 }
 0x199   : > { %v632_v14 = vpop.f32.mrf.mxu0 }
 0x19a   : > { %v633_v13 = vadd.f32 %v632_v14, %v6132_v25  ;;  %v661_v29 = vpop.f32.mrf.mxu1  ;;  %v1003_v2 = vpop.f32.mrf.mxu3 }
 0x19b   : > { %v6317_v23 = vadd.f32 %v661_v29, %v6157_v44 }
 0x19c   : > { %v6319_v42 = vadd.f32 %v796_v46, %v633_v13  ;;  %5185 = vmatmul.msk.bf16.gmra.mxu0 %vm430_vm2, %v5579_v33 }
 0x19d   : > { %5189 = vmatmul.msk.bf16.gmra.mxu1 %vm430_vm2, %v5579_v33 }
 0x19f   : > { %v759_v25 = vpop.f32.mrf.mxu2 }
 0x1a0   : > { %v6327_v63 = vadd.f32 %v759_v25, %v6089_v57 }
 0x1a1   : > { %v634_v51 = vpop.f32.mrf.mxu0 }
 0x1a2   : > { %v635_v44 = vadd.f32 %v634_v51, %v6151_v39  ;;  %v663_v35 = vpop.f32.mrf.mxu1  ;;  %v6339_v13 = vpop.f32.mrf.mxu3  ;;  %v6345_v39 = vld [vmem:[%s8755_s2 + $0xd0] sm:$0xff] }
 0x1a3   : > { %v6331_v46 = vadd.f32 %v663_v35, %v6185_v1 }
 0x1a4   : > { %v6333_v36 = vadd.f32 %v798_v62, %v635_v44  ;;  %5192 = vmatmul.msk.bf16.gmra.mxu2 %vm430_vm2, %v5578_v6  ;;  %v1599_v6 = vpop.permute.xlu2 %1598 }
 0x1a7   : > { %v762_v45 = vpop.f32.mrf.mxu2  ;;  %5260 = vmatmul.msk.bf16.gmra.mxu3 %vm430_vm2, %v6345_v39 }
 0x1a8   : > { %v6337_v56 = vadd.f32 %v762_v45, %v6107_v3  ;;  %v1601_v3 = vpop.permute.xlu0 %1600 }
 0x1a9   : > { %v810_v14 = vpop.f32.mrf.mxu0 }
 0x1aa   : > { %v832_v57 = vadd.f32 %v810_v14, %v6173_v30  ;;  %v940_v29 = vpop.f32.mrf.mxu1  ;;  %v1604_v30 = vsel %vm8769_vm15, %v1599_v6, %v1601_v3  ;;  %v1008_v51 = vpop.f32.mrf.mxu3 }
 0x1ab   : > { %v6347_v1 = vadd.f32 %v940_v29, %v830_v26  ;;  %v1653_v26 = vsel %vm443_vm1, %v1604_v30, 0  ;;  %v4632_v44 = vunpack.c.l.bf16 %v1604_v30 }
 0x1ac   : > { %v6349_v62 = vadd.f32 %v998_v32, %v832_v57  ;;  %5222 = vmatmul.msk.bf16.vlgmr.msra.gmra.mxu0 %vm430_vm2, %v6112_v4  ;;  %1693 = vmatpush.bf16.msra.mxu2 %v1653_v26  ;;  %v1597_v29 = vpop.permute.xlu2 %1596 }
 0x1ad   : > { %5226 = vmatmul.msk.bf16.vlgmr.msra.gmra.mxu1 %vm430_vm2, %v6112_v4  ;;  %v4637_v57 = vrot.slane %v4632_v44, 7  ;;  %v1603_v55 = vsel %vm8769_vm15, %v1597_v29, %v1599_v6 }
 0x1ae   : > { %v1650_v26 = vsel %vm443_vm1, %v1603_v55, 0  ;;  %v4631_v30 = vunpack.c.l.bf16 %v1603_v55 }
 0x1af   : > { %v764_v8 = vpop.f32.mrf.mxu2  ;;  %1664 = vmatpush.bf16.msrb.mxu1 %v1650_v26 }
 0x1b0   : > { %v6360_v32 = vadd.f32 %v764_v8, %v6126_v20  ;;  %v1611_v0 = vpop.permute.xlu0 %1610  ;;  %v4641_v44 = vsel %vm3800_vm5, %v4631_v30, %v4637_v57  ;;  %v4644_v6 = vsel %vm3805_vm6, %v4631_v30, %v4637_v57 }
 0x1b1   : > { %v812_v25 = vpop.f32.mrf.mxu0  ;;  %v1615_v8 = vsel %vm8769_vm15, %v1601_v3, %v1611_v0  ;;  %vm1790_vm15 = vcmask 891904  }
 0x1b2   : > { %v835_v4 = vadd.f32 %v812_v25, %v6193_v24  ;;  %v942_v35 = vpop.f32.mrf.mxu1  ;;  %v4633_v25 = vunpack.c.l.bf16 %v1615_v8 }
 0x1b3   : > { %v6363_v45 = vadd.f32 %v942_v35, %v833_v16  ;;  %v1655_v16 = vsel %vm443_vm1, %v1615_v8, 0  ;;  %v4647_v35 = vsel %vm3810_vm7, %v4631_v30, %v4637_v57 }
 0x1b4   : > { %v6365_v14 = vadd.f32 %v1000_v54, %v835_v4  ;;  %5193 = vmatmul.msk.bf16.gmra.mxu2 %vm430_vm2, %v5579_v33  ;;  %v1010_v4 = vpop.f32.mrf.mxu3  ;;  %v4639_v33 = vsel %vm3797_vm4, %v4631_v30, %v4637_v57  ;;  %1722 = vmatpush.bf16.msrb.mxu3 %v1655_v16  ;;  %v4638_v3 = vrot.slane %v4633_v25, 6 }
 0x1b6   : > { %v6391_v57 = vsel %vm443_vm1, %v4639_v33, %v4638_v3  ;;  %v6397_v8 = vsel %vm3807_vm9, %v4644_v6, %v4638_v3 }
 0x1b7   : > { %v767_v20 = vpop.f32.mrf.mxu2  ;;  %8863 = vst [vmem:[#allocation27_spill] sm:$0xff] %v6391_v57 }
 0x1b8   : > { %v848_v24 = vadd.f32 %v767_v20, %v6134_v22  ;;  %v6381_v22 = vld [vmem:[%s8755_s2 + $0xd8] sm:$0xff]  ;;  %8865 = vst [vmem:[#allocation29_spill] sm:$0xff] %v6397_v8 }
 0x1b9   : > { %v815_v54 = vpop.f32.mrf.mxu0  ;;  %5261 = vmatmul.msk.bf16.gmra.mxu3 %vm430_vm2, %v6381_v22 }
 0x1ba   : > { %v838_v0 = vadd.f32 %v815_v54, %v6226_v37  ;;  %v945_v55 = vpop.f32.mrf.mxu1  ;;  %v6394_v37 = vsel %vm3802_vm8, %v4641_v44, %v4638_v3 }
 0x1bb   : > { %v6384_v29 = vadd.f32 %v945_v55, %v6305_v31  ;;  %8864 = vst [vmem:[#allocation28_spill] sm:$0xff] %v6394_v37  ;;  %v6402_v31 = vsel %vm3812_vm10, %v4647_v35, %v4638_v3 }
 0x1bc   : > { %v6386_v20 = vadd.f32 %v1003_v2, %v838_v0  ;;  %5223 = vmatmul.msk.bf16.gmra.mxu0 %vm430_vm2, %v6139_v28  ;;  %8866 = vst [vmem:[#allocation30_spill] sm:$0xff] %v6402_v31  ;;  %v1013_v16 = vpop.f32.mrf.mxu3 }
 0x1bd   : > { %5227 = vmatmul.msk.bf16.gmra.mxu1 %vm430_vm2, %v6139_v28 }
 0x1bf   : > { %v769_v2 = vpop.f32.mrf.mxu2 }
 0x1c0   : > { %v851_v26 = vadd.f32 %v769_v2, %v6153_v43 }
 0x1c1   : > { %v817_v30 = vpop.f32.mrf.mxu0 }
 0x1c2   : > { %v841_v25 = vadd.f32 %v817_v30, %v6265_v12  ;;  %v947_v54 = vpop.f32.mrf.mxu1  ;;  %v6421_v12 = vld [vmem:[%s8755_s2 + $0xe0] sm:$0xff] }
 0x1c3   : > { %v6409_v33 = vadd.f32 %v947_v54, %v6327_v63 }
 0x1c4   : > { %v6412_v44 = vadd.f32 %v6339_v13, %v841_v25  ;;  %5254 = vmatmul.msk.bf16.vlgmr.msrb.gmra.mxu2 %vm430_vm2, %v6283_v53  ;;  %v1015_v0 = vpop.f32.mrf.mxu3 }
 0x1c7   : > { %v969_v28 = vpop.f32.mrf.mxu2 }
 0x1c8   : > { %v1019_v6 = vadd.f32 %v969_v28, %v6175_v60 }
 0x1c9   : > { %v820_v35 = vpop.f32.mrf.mxu0  ;;  %5298 = vmatmul.msk.bf16.vlgmr.msrb.gmra.mxu3 %vm430_vm2, %v6421_v12 }
 0x1ca   : > { %v844_v43 = vadd.f32 %v820_v35, %v6286_v61  ;;  %v950_v55 = vpop.f32.mrf.mxu1 }
 0x1cb   : > { %v6424_v63 = vadd.f32 %v950_v55, %v6337_v56 }
 0x1cc   : > { %v6426_v13 = vadd.f32 %v1008_v51, %v844_v43  ;;  %5224 = vmatmul.msk.bf16.gmra.mxu0 %vm430_vm2, %v6170_v59  ;;  %v1290_v2 = vpop.f32.mrf.mxu3 }
 0x1cd   : > { %5228 = vmatmul.msk.bf16.gmra.mxu1 %vm430_vm2, %v6170_v59 }
 0x1cf   : > { %v971_v60 = vpop.f32.mrf.mxu2 }
 0x1d0   : > { %v1022_v61 = vadd.f32 %v971_v60, %v6195_v18 }
 0x1d1   : > { %v822_v3 = vpop.f32.mrf.mxu0 }
 0x1d2   : > { %v847_v30 = vadd.f32 %v822_v3, %v6298_v19  ;;  %v952_v56 = vpop.f32.mrf.mxu1  ;;  %v6450_v19 = vld [vmem:[%s8755_s2 + $0xe8] sm:$0xff] }
 0x1d3   : > { %v6437_v51 = vadd.f32 %v952_v56, %v6360_v32 }
 0x1d4   : > { %v6439_v25 = vadd.f32 %v1010_v4, %v847_v30  ;;  %5255 = vmatmul.msk.bf16.gmra.mxu2 %vm430_vm2, %v6314_v21  ;;  %v6444_v35 = vpop.f32.mrf.mxu3 }
 0x1d7   : > { %v974_v59 = vpop.f32.mrf.mxu2 }
 0x1d8   : > { %v1025_v54 = vadd.f32 %v974_v59, %v6230_v5 }
 0x1d9   : > { %v825_v28 = vpop.f32.mrf.mxu0  ;;  %5299 = vmatmul.msk.bf16.gmra.mxu3 %vm430_vm2, %v6450_v19 }
 0x1da   : > { %v850_v18 = vadd.f32 %v825_v28, %v6317_v23  ;;  %v955_v43 = vpop.f32.mrf.mxu1 }
 0x1db   : > { %v6452_v32 = vadd.f32 %v955_v43, %v848_v24 }
 0x1dc   : > { %v6454_v4 = vadd.f32 %v1013_v16, %v850_v18  ;;  %5225 = vmatmul.msk.bf16.gmra.mxu0 %vm430_vm2, %v6223_v58  ;;  %v1295_v60 = vpop.f32.mrf.mxu3 }
 0x1dd   : > { %5229 = vmatmul.msk.bf16.gmra.mxu1 %vm430_vm2, %v6223_v58 }
 0x1df   : > { %v976_v5 = vpop.f32.mrf.mxu2 }
 0x1e0   : > { %v6463_v23 = vadd.f32 %v976_v5, %v6268_v52 }
 0x1e1   : > { %v827_v55 = vpop.f32.mrf.mxu0 }
 0x1e2   : > { %v853_v24 = vadd.f32 %v827_v55, %v6331_v46  ;;  %v957_v3 = vpop.f32.mrf.mxu1  ;;  %v6481_v46 = vld [vmem:[%s8755_s2 + $0xf0] sm:$0xff] }
 0x1e3   : > { %v6466_v16 = vadd.f32 %v957_v3, %v851_v26 }
 0x1e4   : > { %v6468_v30 = vadd.f32 %v1015_v0, %v853_v24  ;;  %5256 = vmatmul.msk.bf16.gmra.mxu2 %vm430_vm2, %v6345_v39  ;;  %v6475_v28 = vpop.f32.mrf.mxu3 }
 0x1e7   : > { %v979_v58 = vpop.f32.mrf.mxu2 }
 0x1e8   : > { %v6473_v56 = vadd.f32 %v979_v58, %v6289_v27 }
 0x1e9   : > { %v1102_v59 = vpop.f32.mrf.mxu0  ;;  %5300 = vmatmul.msk.bf16.gmra.mxu3 %vm430_vm2, %v6481_v46 }
 0x1ea   : > { %v1180_v52 = vadd.f32 %v1102_v59, %v6347_v1  ;;  %v1131_v18 = vpop.f32.mrf.mxu1  ;;  %v1789_v1 = vpop.permute.xlu1 %1788 }
 0x1eb   : > { %v6483_v26 = vadd.f32 %v1131_v18, %v1019_v6 }
 0x1ec   : > { %v6485_v0 = vadd.f32 %v1290_v2, %v1180_v52  ;;  %5262 = vmatmul.msk.bf16.vlgmr.msrb.gmra.mxu0 %vm430_vm2, %v6283_v53  ;;  %v1300_v55 = vpop.f32.mrf.mxu3 }
 0x1ed   : > { %5290 = vmatmul.msk.bf16.vlgmr.msrb.gmra.mxu1 %vm430_vm2, %v6421_v12 }
 0x1ef   : > { %v981_v27 = vpop.f32.mrf.mxu2  ;;  %v1799_v53 = vpop.permute.xlu2 %1798 }
 0x1f0   : > { %v6494_v43 = vadd.f32 %v981_v27, %v6300_v7  ;;  %v1803_v59 = vsel %vm1790_vm15, %v1789_v1, %v1799_v53  ;;  %v1785_v18 = vpop.permute.xlu0 %1784 }
 0x1f1   : > { %v1104_v5 = vpop.f32.mrf.mxu0 }
 0x1f2   : > { %v6497_v6 = vadd.f32 %v1104_v5, %v6363_v45  ;;  %v1133_v2 = vpop.f32.mrf.mxu1  ;;  %v1787_v58 = vpop.permute.xlu1 %1786  ;;  %v1843_v45 = vsel %vm443_vm1, %v1803_v59, 0 }
 0x1f3   : > { %v6499_v24 = vadd.f32 %v1133_v2, %v1022_v61  ;;  %v1792_v52 = vsel %vm1790_vm15, %v1787_v58, %v1789_v1  ;;  %v1791_v2 = vsel %vm1790_vm15, %v1785_v18, %v1787_v58  ;;  %1910 = vmatpush.bf16.msrb.mxu2 %v1843_v45 }
 0x1f4   : > { %5257 = vmatmul.msk.bf16.gmra.mxu2 %vm430_vm2, %v6381_v22  ;;  %v1841_v61 = vsel %vm443_vm1, %v1792_v52, 0  ;;  %v4735_v5 = vunpack.c.l.bf16 %v1792_v52  ;;  %v1838_v53 = vsel %vm443_vm1, %v1791_v2, 0  ;;  %v4734_v8 = vunpack.c.l.bf16 %v1791_v2 }
 0x1f5   : > { %1881 = vmatpush.bf16.msra.mxu1 %v1841_v61  ;;  %1852 = vmatpush.bf16.msra.mxu0 %v1838_v53 }
 0x1f6   : > { %v4740_v52 = vrot.slane %v4735_v5, 7 }
 0x1f7   : > { %v984_v3 = vpop.f32.mrf.mxu2 }
 0x1f8   : > { %v6505_v7 = vadd.f32 %v984_v3, %v6319_v42  ;;  %v6516_v42 = vld [vmem:[%s8755_s2 + $0xf8] sm:$0xff]  ;;  %v6520_v3 = vpop.f32.mrf.mxu3  ;;  %v4744_v45 = vsel %vm3800_vm5, %v4734_v8, %v4740_v52  ;;  %v4747_v18 = vsel %vm3805_vm6, %v4734_v8, %v4740_v52 }
 0x1f9   : > { %v1107_v27 = vpop.f32.mrf.mxu0  ;;  %5301 = vmatmul.msk.bf16.gmra.mxu3 %vm430_vm2, %v6516_v42 }
 0x1fa   : > { %v1186_v57 = vadd.f32 %v1107_v27, %v6384_v29  ;;  %v1136_v31 = vpop.f32.mrf.mxu1  ;;  %v4742_v29 = vsel %vm3797_vm4, %v4734_v8, %v4740_v52 }
 0x1fb   : > { %v6518_v1 = vadd.f32 %v1136_v31, %v1025_v54  ;;  %v4750_v31 = vsel %vm3810_vm7, %v4734_v8, %v4740_v52 }
 0x1fc   : > { %v6522_v58 = vadd.f32 %v1295_v60, %v1186_v57  ;;  %5263 = vmatmul.msk.bf16.gmra.mxu0 %vm430_vm2, %v6314_v21 }
 0x1fd   : > { %5291 = vmatmul.msk.bf16.gmra.mxu1 %vm430_vm2, %v6450_v19 }
 0x1ff   : > { %v986_v54 = vpop.f32.mrf.mxu2 }
 0x200   : > { %v1040_v57 = vadd.f32 %v986_v54, %v6333_v36  ;;  %v1305_v5 = vpop.f32.mrf.mxu3 }
 0x201   : > { %v1109_v60 = vpop.f32.mrf.mxu0 }
 0x202   : > { %v6536_v21 = vadd.f32 %v1109_v60, %v6409_v33  ;;  %v1138_v27 = vpop.f32.mrf.mxu1  ;;  %v5734_v60 = vmov 0  }
 0x203   : > { %v6539_v61 = vadd.f32 %v1138_v27, %v6463_v23  ;;  %5639 = vset.pattern.permute.xlu1 %v5734_v60  ;;  %5638 = vset.pattern.permute.xlu0 %v5734_v60 }
 0x204   : > { %5294 = vmatmul.msk.bf16.vlgmr.msra.gmra.mxu2 %vm430_vm2, %v6421_v12  ;;  %5637 = vset.pattern.permute.xlu2 %v5734_v60 }
 0x207   : > { %v1160_v2 = vpop.f32.mrf.mxu2 }
 0x208   : > { %v1182_v8 = vadd.f32 %v1160_v2, %v6349_v62  ;;  %v6554_v23 = vpop.f32.mrf.mxu3 }
 0x209   : > { %v1112_v53 = vpop.f32.mrf.mxu0 }
 0x20a   : > { %v1192_v52 = vadd.f32 %v1112_v53, %v6424_v63  ;;  %v1141_v37 = vpop.f32.mrf.mxu1  ;;  %v4736_v63 = vunpack.c.l.bf16 %v1803_v59 }
 0x20b   : > { %v6546_v36 = vadd.f32 %v1141_v37, %v6473_v56 }
 0x20c   : > { %v6548_v33 = vadd.f32 %v1300_v55, %v1192_v52  ;;  %5264 = vmatmul.msk.bf16.gmra.mxu0 %vm430_vm2, %v6345_v39  ;;  %v1960_v39 = vld [vmem:[%s8756_s3 + $0x20] sm:$0xff]  ;;  %v1963_v55 = vld [vmem:[%s8756_s3 + $0x38] sm:$0xff] }
 0x20d   : > { %5292 = vmatmul.msk.bf16.gmra.mxu1 %vm430_vm2, %v6481_v46  ;;  %1986 = vperm.xlu1 %5639, %v1960_v39  }
 0x20e   : > { %2001 = vperm.xlu0 %5638, %v1963_v55  }
 0x20f   : > { %v1162_v12 = vpop.f32.mrf.mxu2 }
 0x210   : > { %v6557_v62 = vadd.f32 %v1162_v12, %v6365_v14  ;;  %v1507_v53 = vpop.f32.mrf.mxu3 }
 0x211   : > { %v1114_v54 = vpop.f32.mrf.mxu0 }
 0x212   : > { %v6560_v37 = vadd.f32 %v1114_v54, %v6437_v51  ;;  %v1143_v56 = vpop.f32.mrf.mxu1  ;;  %v4741_v51 = vrot.slane %v4736_v63, 6 }
 0x213   : > { %v6569_v14 = vadd.f32 %v1143_v56, %v6494_v43 }
 0x214   : > { %5295 = vmatmul.msk.bf16.gmra.mxu2 %vm430_vm2, %v6450_v19  ;;  %v6575_v52 = vsel %vm443_vm1, %v4742_v29, %v4741_v51  ;;  %v6578_v12 = vsel %vm3802_vm8, %v4744_v45, %v4741_v51  ;;  %v6581_v43 = vsel %vm3807_vm9, %v4747_v18, %v4741_v51  ;;  %v6584_v54 = vsel %vm3812_vm10, %v4750_v31, %v4741_v51  ;;  %v1956_v29 = vld [vmem:[%s8756_s3] sm:$0xff] }
 0x215   : > { %8867 = vst [vmem:[#allocation31_spill] sm:$0xff] %v6575_v52 }
 0x216   : > { %8868 = vst [vmem:[#allocation32_spill] sm:$0xff] %v6578_v12  ;;  %1966 = vperm.xlu0 %5638, %v1956_v29  }
 0x217   : > { %v1165_v59 = vpop.f32.mrf.mxu2  ;;  %8869 = vst [vmem:[#allocation33_spill] sm:$0xff] %v6581_v43 }
 0x218   : > { %v1188_v27 = vadd.f32 %v1165_v59, %v6386_v20  ;;  %8870 = vst [vmem:[#allocation34_spill] sm:$0xff] %v6584_v54  ;;  %v1958_v20 = vld [vmem:[%s8756_s3 + $0x10] sm:$0xff]  ;;  %v6613_v55 = vpop.f32.mrf.mxu3 }
 0x219   : > { %v1117_v2 = vpop.f32.mrf.mxu0  ;;  %1976 = vperm.xlu1 %5639, %v1958_v20  }
 0x21a   : > { %v1198_v19 = vadd.f32 %v1117_v2, %v6452_v32  ;;  %v1146_v63 = vpop.f32.mrf.mxu1 }
 0x21b   : > { %v6594_v45 = vadd.f32 %v1146_v63, %v6505_v7 }
 0x21c   : > { %v6596_v18 = vadd.f32 %v1305_v5, %v1198_v19  ;;  %5265 = vmatmul.msk.bf16.gmra.mxu0 %vm430_vm2, %v6381_v22  ;;  %v1957_v5 = vld [vmem:[%s8756_s3 + $0x8] sm:$0xff] }
 0x21d   : > { %5293 = vmatmul.msk.bf16.gmra.mxu1 %vm430_vm2, %v6516_v42 }
 0x21f   : > { %v1167_v32 = vpop.f32.mrf.mxu2 }
 0x220   : > { %v6603_v31 = vadd.f32 %v1167_v32, %v6412_v44  ;;  %v5593_v32 = vld [vmem:[%s8755_s2 + $0x108] sm:$0xff] }
 0x221   : > { %v1119_v60 = vpop.f32.mrf.mxu0  ;;  %1971 = vperm.xlu1 %5639, %v1957_v5   ;;  %v1962_v5 = vld [vmem:[%s8756_s3 + $0x30] sm:$0xff] }
 0x222   : > { %v6606_v56 = vadd.f32 %v1119_v60, %v6466_v16  ;;  %v1148_v7 = vpop.f32.mrf.mxu1  ;;  %v5592_v16 = vld [vmem:[%s8755_s2 + $0x100] sm:$0xff]  ;;  %1996 = vperm.xlu2 %5637, %v1962_v5  }
 0x223   : > { %v6611_v39 = vadd.f32 %v1148_v7, %v1040_v57 }
 0x224   : > { %5296 = vmatmul.msk.bf16.gmra.mxu2 %vm430_vm2, %v6481_v46  ;;  %v1512_v46 = vpop.f32.mrf.mxu3 }
 0x227   : > { %v1170_v22 = vpop.f32.mrf.mxu2 }
 0x228   : > { %v1194_v44 = vadd.f32 %v1170_v22, %v6426_v13 }
 0x229   : > { %v1319_v51 = vpop.f32.mrf.mxu0 }
 0x22a   : > { %v1369_v59 = vadd.f32 %v1319_v51, %v6483_v26  ;;  %v1348_v2 = vpop.f32.mrf.mxu1 }
 0x22b   : > { %v6622_v19 = vadd.f32 %v1348_v2, %v1182_v8 }
 0x22c   : > { %v6624_v57 = vadd.f32 %v1507_v53, %v1369_v59  ;;  %5326 = vmatmul.msk.bf16.vlgmr.msra.gmra.mxu0 %vm430_vm2, %v5592_v16  ;;  %v6637_v8 = vpop.f32.mrf.mxu3 }
 0x22d   : > { %5330 = vmatmul.msk.bf16.vlgmr.msra.gmra.mxu1 %vm430_vm2, %v5592_v16 }
 0x22f   : > { %v1172_v63 = vpop.f32.mrf.mxu2 }
 0x230   : > { %v6629_v13 = vadd.f32 %v1172_v63, %v6439_v25 }
 0x231   : > { %v6631_v20 = vpop.f32.mrf.mxu0 }
 0x232   : > { %8871 = vst [vmem:[#allocation35_spill] sm:$0xff] %v6629_v13  ;;  %v6633_v29 = vpop.f32.mrf.mxu1 }
 0x234   : > { %5297 = vmatmul.msk.bf16.gmra.mxu2 %vm430_vm2, %v6516_v42  ;;  %v1517_v2 = vpop.f32.mrf.mxu3 }
 0x237   : > { %v1175_v26 = vpop.f32.mrf.mxu2 }
 0x238   : > { %v1200_v53 = vadd.f32 %v1175_v26, %v6454_v4 }
 0x239   : > { %v1324_v60 = vpop.f32.mrf.mxu0 }
 0x23a   : > { %v1353_v7 = vpop.f32.mrf.mxu1  ;;  %v1375_v25 = vadd.f32 %v1324_v60, %v6518_v1 }
 0x23b   : > { %v1376_v22 = vadd.f32 %v1353_v7, %v1188_v27  ;;  %v1961_v27 = vld [vmem:[%s8756_s3 + $0x28] sm:$0xff] }
 0x23c   : > { %v6647_v42 = vadd.f32 %v1512_v46, %v1375_v25  ;;  %5327 = vmatmul.msk.bf16.gmra.mxu0 %vm430_vm2, %v5593_v32  ;;  %1991 = vperm.xlu2 %5637, %v1961_v27   ;;  %v1959_v25 = vld [vmem:[%s8756_s3 + $0x18] sm:$0xff] }
 0x23d   : > { %5331 = vmatmul.msk.bf16.gmra.mxu1 %vm430_vm2, %v5593_v32 }
 0x23f   : > { %v1177_v4 = vpop.f32.mrf.mxu2 }
 0x240   : > { %v6652_v51 = vadd.f32 %v1177_v4, %v6468_v30  ;;  %v5594_v30 = vld [vmem:[%s8755_s2 + $0x110] sm:$0xff]  ;;  %v6670_v4 = vpop.f32.mrf.mxu3 }
 0x241   : > { %v6654_v59 = vpop.f32.mrf.mxu0 }
 0x242   : > { %8872 = vst [vmem:[#allocation36_spill] sm:$0xff] %v6652_v51  ;;  %v6656_v1 = vpop.f32.mrf.mxu1 }
 0x244   : > { %5334 = vmatmul.msk.bf16.vlgmr.msrb.gmra.mxu2 %vm430_vm2, %v5592_v16  ;;  %1981 = vperm.xlu2 %5637, %v1959_v25  }
 0x247   : > { %v1478_v46 = vpop.f32.mrf.mxu2 }
 0x248   : > { %v1556_v63 = vadd.f32 %v1478_v46, %v6485_v0  ;;  %v6683_v46 = vpop.f32.mrf.mxu3 }
 0x249   : > { %v1329_v26 = vpop.f32.mrf.mxu0 }
 0x24a   : > { %v1381_v60 = vadd.f32 %v1329_v26, %v6546_v36  ;;  %v1358_v7 = vpop.f32.mrf.mxu1 }
 0x24b   : > { %v1382_v5 = vadd.f32 %v1358_v7, %v1194_v44 }
 0x24c   : > { %v6672_v16 = vadd.f32 %v1517_v2, %v1381_v60  ;;  %5328 = vmatmul.msk.bf16.gmra.mxu0 %vm430_vm2, %v5594_v30  ;;  %v5595_v2 = vld [vmem:[%s8755_s2 + $0x118] sm:$0xff] }
 0x24d   : > { %5332 = vmatmul.msk.bf16.gmra.mxu1 %vm430_vm2, %v5594_v30 }
 0x24f   : > { %v6676_v0 = vpop.f32.mrf.mxu2 }
 0x250   : > { %v6696_v54 = vpop.f32.mrf.mxu3 }
 0x251   : > { %v6678_v27 = vpop.f32.mrf.mxu0 }
 0x252   : > { %v6680_v36 = vpop.f32.mrf.mxu1 }
 0x253   : > { %8873 = vst [vmem:[#allocation37_spill] sm:$0xff] %v6680_v36 }
 0x254   : > { %5335 = vmatmul.msk.bf16.gmra.mxu2 %vm430_vm2, %v5593_v32 }
 0x257   : > { %v1483_v44 = vpop.f32.mrf.mxu2 }
 0x258   : > { %v1562_v26 = vadd.f32 %v1483_v44, %v6522_v58 }
 0x259   : > { %v1334_v60 = vpop.f32.mrf.mxu0 }
 0x25a   : > { %v1363_v7 = vpop.f32.mrf.mxu1  ;;  %v6690_v25 = vadd.f32 %v1334_v60, %v6594_v45  ;;  %v1724_v60 = vpop.f32.mrf.mxu3 }
 0x25b   : > { %v1388_v52 = vadd.f32 %v1363_v7, %v1200_v53 }
 0x25c   : > { %5329 = vmatmul.msk.bf16.gmra.mxu0 %vm430_vm2, %v5595_v2 }
 0x25d   : > { %5333 = vmatmul.msk.bf16.gmra.mxu1 %vm430_vm2, %v5595_v2 }
 0x25f   : > { %v6694_v32 = vpop.f32.mrf.mxu2 }
 0x261   : > { %v6698_v43 = vpop.f32.mrf.mxu0 }
 0x262   : > { %v6700_v58 = vpop.f32.mrf.mxu1 }
 0x263   : > { %8874 = vst [vmem:[#allocation38_spill] sm:$0xff] %v6700_v58 }
 0x264   : > { %5336 = vmatmul.msk.bf16.gmra.mxu2 %vm430_vm2, %v5594_v30 }
 0x267   : > { %v1488_v44 = vpop.f32.mrf.mxu2 }
 0x268   : > { %v1568_v12 = vadd.f32 %v1488_v44, %v6548_v33 }
 0x269   : > { %v1536_v45 = vpop.f32.mrf.mxu0 }
 0x26a   : > { %v1666_v53 = vpop.f32.mrf.mxu1  ;;  %v1558_v7 = vadd.f32 %v1536_v45, %v6622_v19 }
 0x26b   : > { %v1744_v9 = vadd.f32 %v1666_v53, %v1556_v63 }
 0x26c   : > { %v6705_v40 = vadd.f32 %v1724_v60, %v1558_v7 }
 0x26f   : > { %v6707_v15 = vpop.f32.mrf.mxu2 }
 0x271   : > { %v6709_v17 = vpop.f32.mrf.mxu0 }
 0x272   : > { %v1668_v38 = vpop.f32.mrf.mxu1 }
 0x274   : > { %5337 = vmatmul.msk.bf16.gmra.mxu2 %vm430_vm2, %v5595_v2  ;;  %vm2287_vm2 = vcmask 523264  }
 0x277   : > { %v1493_v34 = vpop.f32.mrf.mxu2 }
 0x278   : > { %v1574_v30 = vadd.f32 %v1493_v34, %v6596_v18 }
 0x279   : > { %v1541_v41 = vpop.f32.mrf.mxu0 }
 0x27a   : > { %v6713_v33 = vadd.f32 %v1541_v41, %v1376_v22  ;;  %v1671_v44 = vpop.f32.mrf.mxu1 }
 0x27b   : > { %v6715_v11 = vadd.f32 %v1671_v44, %v1562_v26 }
 0x27c   : > { %v6760_v36 = vpop.permute.xlu2 %1996 }
 0x27f   : > { %v6717_v19 = vpop.f32.mrf.mxu2 }
 0x281   : > { %v6719_v63 = vpop.f32.mrf.mxu0 }
 0x282   : > { %v6721_v45 = vpop.f32.mrf.mxu1 }
 0x287   : > { %v1695_v60 = vpop.f32.mrf.mxu2 }
 0x288   : > { %v1745_v53 = vadd.f32 %v1695_v60, %v6624_v57  ;;  %v6737_v57 = vpop.permute.xlu1 %1986 }
 0x289   : > { %v1546_v7 = vpop.f32.mrf.mxu0 }
 0x28a   : > { %v6724_v2 = vadd.f32 %v1546_v7, %v1382_v5  ;;  %v1676_v10 = vpop.f32.mrf.mxu1 }
 0x28b   : > { %v6726_v34 = vadd.f32 %v1676_v10, %v1568_v12  ;;  %v6741_v10 = vpop.permute.xlu0 %2001 }
 0x28f   : > { %v1697_v41 = vpop.f32.mrf.mxu2 }
 0x290   : > { %v6747_v58 = vpop.permute.xlu1 %1976 }
 0x291   : > { %v6728_v18 = vpop.f32.mrf.mxu0 }
 0x292   : > { %8875 = vst [vmem:[#allocation39_spill] sm:$0xff] %v6728_v18  ;;  %v6730_v22 = vpop.f32.mrf.mxu1 }
 0x297   : > { %v1700_v26 = vpop.f32.mrf.mxu2 }
 0x298   : > { %v1751_v44 = vadd.f32 %v1700_v26, %v6647_v42  ;;  %v1372_v26 = vadd.f32 %v6631_v20, %v6499_v24 }
 0x299   : > { %v1551_v47 = vpop.f32.mrf.mxu0 }
 0x29a   : > { %v6733_v50 = vadd.f32 %v1551_v47, %v1388_v52  ;;  %v1681_v49 = vpop.f32.mrf.mxu1  ;;  %v6752_v52 = vpop.permute.xlu0 %1966  ;;  %v1560_v24 = vadd.f32 %v6613_v55, %v1372_v26 }
 0x29b   : > { %v6735_v48 = vadd.f32 %v1681_v49, %v1574_v30 }
 0x29c   : > { %8876 = vst [vmem:[#allocation40_spill] sm:$0xff] %v6733_v50 }
 0x29f   : > { %v6739_v5 = vpop.f32.mrf.mxu2 }
 0x2a1   : > { %v6743_v12 = vpop.f32.mrf.mxu0 }
 0x2a2   : > { %8877 = vst [vmem:[#allocation41_spill] sm:$0xff] %v6743_v12  ;;  %v6745_v60 = vpop.f32.mrf.mxu1  ;;  %v1371_v12 = vadd.f32 %v6444_v35, %v6497_v6  ;;  %v1748_v6 = vadd.f32 %v1697_v41, %v1560_v24 }
 0x2a7   : > { %v1705_v7 = vpop.f32.mrf.mxu2 }
 0x2a8   : > { %v6750_v42 = vadd.f32 %v1705_v7, %v6672_v16  ;;  %v1559_v16 = vadd.f32 %v6676_v0, %v1371_v12  ;;  %v6774_v7 = vpop.permute.xlu1 %1971 }
 0x2a9   : > { %v1854_v47 = vpop.f32.mrf.mxu0 }
 0x2aa   : > { %v1932_v49 = vadd.f32 %v1854_v47, %v1744_v9  ;;  %v1883_v30 = vpop.f32.mrf.mxu1  ;;  %v6766_v9 = vld [vmem:[%s8754_s1] sm:$0x7]  ;;  %v1747_v35 = vadd.f32 %v1668_v38, %v1559_v16  ;;  %v6785_v16 = vpop.permute.xlu2 %1991 }
 0x2ab   : > { %v1933_v51 = vadd.f32 %v1883_v30, %v1745_v53  ;;  %v6772_v53 = vperm.slane %v6766_v9, 0  ;;  %v6777_v0 = vperm.slane %v6766_v9, 1 }
 0x2ac   : > { %v2004_v50 = vadd.f32 %v6752_v52, %v1932_v49 }
 0x2ad   : > { %v2005_v18 = vadd.f32 %v6752_v52, %v1933_v51 }
 0x2ae   : > { %5640 = vtanh.f32 %v2004_v50 }
 0x2af   : > { %5642 = vtanh.f32 %v2005_v18  ;;  %v6769_v20 = vpop.f32.mrf.mxu2 }
 0x2b1   : > { %v1856_v51 = vpop.f32.mrf.mxu0 }
 0x2b2   : > { %v1935_v12 = vadd.f32 %v1856_v51, %v1747_v35  ;;  %v1885_v47 = vpop.f32.mrf.mxu1 }
 0x2b3   : > { %v1936_v49 = vadd.f32 %v1885_v47, %v1748_v6 }
 0x2b4   : > { %v5641_v50 = vpop.eup %5640  ;;  %v2007_v55 = vadd.f32 %v6774_v7, %v1935_v12  ;;  %v1378_v12 = vadd.f32 %v6654_v59, %v6539_v61  ;;  %v1726_v61 = vpop.f32.mrf.mxu3 }
 0x2b5   : > { %v5643_v18 = vpop.eup %5642  ;;  %v2059_v30 = vmul.f32 %v5641_v50, %v6772_v53  ;;  %v2008_v38 = vadd.f32 %v6774_v7, %v1936_v49  ;;  %v1377_v49 = vadd.f32 %v6475_v28, %v6536_v21 }
 0x2b6   : > { %v2060_v41 = vmul.f32 %v5643_v18, %v6777_v0  ;;  %5644 = vtanh.f32 %v2007_v55 }
 0x2b7   : > { %5646 = vtanh.f32 %v2008_v38  ;;  %v6783_v26 = vpop.f32.mrf.mxu2 }
 0x2b8   : > { %v2083_v24 = vpack.c.bf16 %v2060_v41, %v2059_v30  ;;  %v1565_v30 = vadd.f32 %v6694_v32, %v1377_v49  ;;  %v1566_v41 = vadd.f32 %v6637_v8, %v1378_v12 }
 0x2b9   : > { %v1859_v35 = vpop.f32.mrf.mxu0 }
 0x2ba   : > { %v1938_v6 = vadd.f32 %v1859_v35, %v6715_v11  ;;  %v1888_v51 = vpop.f32.mrf.mxu1  ;;  %v1753_v28 = vadd.f32 %v6721_v45, %v1565_v30  ;;  %v2140_v35 = vunpack.c.l.b16 %v2083_v24 }
 0x2bb   : > { %v1939_v47 = vadd.f32 %v1888_v51, %v1751_v44  ;;  %v1754_v44 = vadd.f32 %v6739_v5, %v1566_v41  ;;  %v6802_v51 = vpop.permute.xlu2 %1981  ;;  %v1373_v41 = vadd.f32 %v6633_v29, %v6557_v62  ;;  %v1383_v62 = vadd.f32 %v6520_v3, %v6560_v37 }
 0x2bc   : > { %v5645_v50 = vpop.eup %5644  ;;  %v2010_v55 = vadd.f32 %v6747_v58, %v1938_v6 }
 0x2bd   : > { %v5647_v18 = vpop.eup %5646  ;;  %v2062_v38 = vmul.f32 %v5645_v50, %v6772_v53  ;;  %v2011_v13 = vadd.f32 %v6747_v58, %v1939_v47  ;;  %v2141_v47 = vunpack.c.h.b16 %v2083_v24 }
 0x2be   : > { %v2063_v11 = vmul.f32 %v5647_v18, %v6777_v0  ;;  %5648 = vtanh.f32 %v2010_v55 }
 0x2bf   : > { %5650 = vtanh.f32 %v2011_v13  ;;  %v6798_v59 = vpop.f32.mrf.mxu2 }
 0x2c0   : > { %v2085_v21 = vpack.c.bf16 %v2063_v11, %v2062_v38 }
 0x2c1   : > { %v1861_v6 = vpop.f32.mrf.mxu0 }
 0x2c2   : > { %v2142_v32 = vunpack.c.l.b16 %v2085_v21  ;;  %v2143_v50 = vunpack.c.h.b16 %v2085_v21  ;;  %v1941_v49 = vadd.f32 %v1861_v6, %v1753_v28  ;;  %v1890_v55 = vpop.f32.mrf.mxu1  ;;  %v1561_v6 = vadd.f32 %v6709_v17, %v1373_v41 }
 0x2c3   : > { %v1942_v18 = vadd.f32 %v1890_v55, %v1754_v44  ;;  %v1729_v44 = vpop.f32.mrf.mxu3 }
 0x2c4   : > { %v5649_v8 = vpop.eup %5648  ;;  %v6804_v12 = vpack.c.b16 %v2142_v32, %v2140_v35  ;;  %v6806_v13 = vpack.c.b16 %v2143_v50, %v2141_v47  ;;  %v2013_v45 = vadd.f32 %v6802_v51, %v1941_v49  ;;  %v1384_v49 = vadd.f32 %v6678_v27, %v6569_v14 }
 0x2c5   : > { %v5651_v38 = vpop.eup %5650  ;;  %v2065_v5 = vmul.f32 %v5649_v8, %v6772_v53  ;;  %v2014_v30 = vadd.f32 %v6802_v51, %v1942_v18 }
 0x2c6   : > { %v2066_v11 = vmul.f32 %v5651_v38, %v6777_v0  ;;  %5652 = vtanh.f32 %v2013_v45  ;;  %v1572_v14 = vadd.f32 %v6670_v4, %v1384_v49  ;;  %v6833_v4 = vperm.slane %v6766_v9, 2 }
 0x2c7   : > { %5654 = vtanh.f32 %v2014_v30  ;;  %v1912_v24 = vpop.f32.mrf.mxu2  ;;  %v1575_v9 = vadd.f32 %v6683_v46, %v6690_v25  ;;  %v1390_v25 = vadd.f32 %v6698_v43, %v6611_v39 }
 0x2c8   : > { %v2087_v28 = vpack.c.bf16 %v2066_v11, %v2065_v5  ;;  %v1934_v21 = vadd.f32 %v1912_v24, %v6705_v40  ;;  %v1760_v38 = vadd.f32 %v6769_v20, %v1572_v14 }
 0x2c9   : > { %v1864_v35 = vpop.f32.mrf.mxu0 }
 0x2ca   : > { %v2006_v47 = vadd.f32 %v6752_v52, %v1934_v21  ;;  %v1944_v32 = vadd.f32 %v1864_v35, %v6726_v34  ;;  %v1893_v50 = vpop.f32.mrf.mxu1  ;;  %v1571_v34 = vadd.f32 %v6707_v15, %v1383_v62  ;;  %v1749_v52 = vadd.f32 %v1726_v61, %v1561_v6 }
 0x2cb   : > { %v1945_v55 = vadd.f32 %v1893_v50, %v6750_v42  ;;  %v2144_v5 = vunpack.c.l.b16 %v2087_v28  ;;  %v2145_v30 = vunpack.c.h.b16 %v2087_v28  ;;  %v1731_v6 = vpop.f32.mrf.mxu3 }
 0x2cc   : > { %v5653_v18 = vpop.eup %5652  ;;  %v2016_v40 = vadd.f32 %v6737_v57, %v1944_v32  ;;  %5656 = vtanh.f32 %v2006_v47  ;;  %v1759_v3 = vadd.f32 %v6730_v22, %v1571_v34  ;;  %v1763_v34 = vadd.f32 %v6783_v26, %v1575_v9 }
 0x2cd   : > { %v5655_v29 = vpop.eup %5654  ;;  %v2068_v8 = vmul.f32 %v5653_v18, %v6772_v53  ;;  %v2017_v17 = vadd.f32 %v6737_v57, %v1945_v55  ;;  %v1752_v55 = vadd.f32 %v1729_v44, %v6713_v33  ;;  %v1389_v26 = vadd.f32 %v6554_v23, %v6606_v56 }
 0x2ce   : > { %v2069_v45 = vmul.f32 %v5655_v29, %v6777_v0  ;;  %5658 = vtanh.f32 %v2016_v40  ;;  %v1379_v29 = vadd.f32 %v6656_v1, %v6603_v31 }
 0x2cf   : > { %5660 = vtanh.f32 %v2017_v17  ;;  %v1914_v27 = vpop.f32.mrf.mxu2  ;;  %v1577_v43 = vadd.f32 %v6717_v19, %v1389_v26 }
 0x2d0   : > { %v2089_v37 = vpack.c.bf16 %v2069_v45, %v2068_v8  ;;  %v1937_v42 = vadd.f32 %v1914_v27, %v1749_v52  ;;  %v1567_v33 = vadd.f32 %v6719_v63, %v1379_v29 }
 0x2d1   : > { %v1866_v11 = vpop.f32.mrf.mxu0 }
 0x2d2   : > { %v2146_v24 = vunpack.c.l.b16 %v2089_v37  ;;  %v2147_v41 = vunpack.c.h.b16 %v2089_v37  ;;  %v2009_v15 = vadd.f32 %v6774_v7, %v1937_v42  ;;  %v1947_v61 = vadd.f32 %v1866_v11, %v1759_v3  ;;  %v1895_v21 = vpop.f32.mrf.mxu1  ;;  %v5657_v35 = vpop.eup %5656 }
 0x2d3   : > { %v1948_v47 = vadd.f32 %v1895_v21, %v1760_v38  ;;  %v2061_v62 = vmul.f32 %v5657_v35, %v6833_v4  ;;  %v1734_v63 = vpop.f32.mrf.mxu3  ;;  %v1755_v39 = vadd.f32 %v1731_v6, %v1567_v33 }
 0x2d4   : > { %v5659_v22 = vpop.eup %5658  ;;  %v6835_v32 = vpack.c.b16 %v2146_v24, %v2144_v5  ;;  %v6837_v50 = vpack.c.b16 %v2147_v41, %v2145_v30  ;;  %5662 = vtanh.f32 %v2009_v15  ;;  %v2019_v20 = vadd.f32 %v6785_v16, %v1947_v61 }
 0x2d5   : > { %v5661_v28 = vpop.eup %5660  ;;  %v2071_v49 = vmul.f32 %v5659_v22, %v6772_v53  ;;  %v2020_v7 = vadd.f32 %v6785_v16, %v1948_v47  ;;  %v2084_v27 = vpack.c.bf16 %v2061_v62, %v2061_v62  ;;  %v1578_v30 = vadd.f32 %v6696_v54, %v1390_v25  ;;  %v8880_v25 = vld [vmem:[#allocation39_spill] sm:$0xff] }
 0x2d6   : > { %v2072_v18 = vmul.f32 %v5661_v28, %v6777_v0  ;;  %5664 = vtanh.f32 %v2019_v20  ;;  %v1765_v24 = vadd.f32 %v6745_v60, %v1577_v43  ;;  %v1758_v29 = vadd.f32 %v1734_v63, %v6724_v2 }
 0x2d7   : > { %5666 = vtanh.f32 %v2020_v7  ;;  %v1917_v40 = vpop.f32.mrf.mxu2  ;;  %v2112_v11 = vunpack.c.l.b16 %v2084_v27  ;;  %v1766_v61 = vadd.f32 %v6798_v59, %v1578_v30 }
 0x2d8   : > { %v2091_v8 = vpack.c.bf16 %v2072_v18, %v2071_v49  ;;  %v1940_v17 = vadd.f32 %v1917_v40, %v1752_v55 }
 0x2d9   : > { %v1869_v52 = vpop.f32.mrf.mxu0 }
 0x2da   : > { %v5663_v45 = vpop.eup %5662  ;;  %v2012_v44 = vadd.f32 %v6747_v58, %v1940_v17  ;;  %v1950_v14 = vadd.f32 %v1869_v52, %v6735_v48  ;;  %v1898_v46 = vpop.f32.mrf.mxu1  ;;  %v2148_v21 = vunpack.c.l.b16 %v2091_v8  ;;  %v2149_v35 = vunpack.c.h.b16 %v2091_v8  ;;  %v8878_v52 = vld [vmem:[#allocation35_spill] sm:$0xff] }
 0x2db   : > { %v2064_v3 = vmul.f32 %v5663_v45, %v6833_v4  ;;  %v1951_v31 = vadd.f32 %v1898_v46, %v1763_v34  ;;  %v1736_v8 = vpop.f32.mrf.mxu3  ;;  %v8879_v45 = vld [vmem:[#allocation37_spill] sm:$0xff] }
 0x2dc   : > { %v5665_v1 = vpop.eup %5664  ;;  %v2022_v37 = vadd.f32 %v6760_v36, %v1950_v14  ;;  %5668 = vtanh.f32 %v2012_v44  ;;  %v1385_v33 = vadd.f32 %v8879_v45, %v8878_v52 }
 0x2dd   : > { %v5667_v42 = vpop.eup %5666  ;;  %v2086_v38 = vpack.c.bf16 %v2064_v3, %v2064_v3  ;;  %v2074_v58 = vmul.f32 %v5665_v1, %v6772_v53  ;;  %v2023_v48 = vadd.f32 %v6760_v36, %v1951_v31 }
 0x2de   : > { %v2075_v5 = vmul.f32 %v5667_v42, %v6777_v0  ;;  %5670 = vtanh.f32 %v2022_v37  ;;  %v1573_v27 = vadd.f32 %v8880_v25, %v1385_v33 }
 0x2df   : > { %v2113_v23 = vunpack.c.l.b16 %v2086_v38  ;;  %5672 = vtanh.f32 %v2023_v48  ;;  %v1919_v56 = vpop.f32.mrf.mxu2 }
 0x2e0   : > { %v2093_v41 = vpack.c.bf16 %v2075_v5, %v2074_v58  ;;  %v1943_v15 = vadd.f32 %v1919_v56, %v1755_v39  ;;  %v1761_v63 = vadd.f32 %v1736_v8, %v1573_v27 }
 0x2e1   : > { %v6866_v47 = vpack.c.b16 %v2113_v23, %v2112_v11  ;;  %v1871_v19 = vpop.f32.mrf.mxu0 }
 0x2e2   : > { %v2150_v6 = vunpack.c.l.b16 %v2093_v41  ;;  %v2151_v22 = vunpack.c.h.b16 %v2093_v41  ;;  %v2015_v20 = vadd.f32 %v6802_v51, %v1943_v15  ;;  %v1953_v54 = vadd.f32 %v1871_v19, %v1765_v24  ;;  %v1900_v28 = vpop.f32.mrf.mxu1  ;;  %v5669_v49 = vpop.eup %5668 }
 0x2e3   : > { %v1954_v7 = vadd.f32 %v1900_v28, %v1766_v61  ;;  %v2067_v17 = vmul.f32 %v5669_v49, %v6833_v4  ;;  %v1739_v30 = vpop.f32.mrf.mxu3 }
 0x2e4   : > { %v5671_v55 = vpop.eup %5670  ;;  %v6869_v18 = vpack.c.b16 %v2150_v6, %v2148_v21  ;;  %v6871_v60 = vpack.c.b16 %v2151_v22, %v2149_v35  ;;  %5674 = vtanh.f32 %v2015_v20  ;;  %v2025_v59 = vadd.f32 %v6741_v10, %v1953_v54  ;;  %v8882_v6 = vld [vmem:[#allocation36_spill] sm:$0xff]  ;;  %v8883_v22 = vld [vmem:[#allocation38_spill] sm:$0xff] }
 0x2e5   : > { %v5673_v9 = vpop.eup %5672  ;;  %v2077_v62 = vmul.f32 %v5671_v55, %v6772_v53  ;;  %v2026_v40 = vadd.f32 %v6741_v10, %v1954_v7  ;;  %v2088_v31 = vpack.c.bf16 %v2067_v17, %v2067_v17  ;;  %v1391_v20 = vadd.f32 %v8883_v22, %v8882_v6 }
 0x2e6   : > { %v2078_v51 = vmul.f32 %v5673_v9, %v6777_v0  ;;  %5676 = vtanh.f32 %v2025_v59 }
 0x2e7   : > { %5678 = vtanh.f32 %v2026_v40  ;;  %v1922_v34 = vpop.f32.mrf.mxu2  ;;  %v2114_v58 = vunpack.c.l.b16 %v2088_v31 }
 0x2e8   : > { %v2095_v44 = vpack.c.bf16 %v2078_v51, %v2077_v62  ;;  %v1946_v14 = vadd.f32 %v1922_v34, %v1758_v29 }
 0x2ea   : > { %v5675_v46 = vpop.eup %5674  ;;  %v2018_v3 = vadd.f32 %v6737_v57, %v1946_v14  ;;  %v2152_v11 = vunpack.c.l.b16 %v2095_v44  ;;  %v2153_v23 = vunpack.c.h.b16 %v2095_v44 }
 0x2eb   : > { %v2070_v2 = vmul.f32 %v5675_v46, %v6833_v4  ;;  %v1741_v55 = vpop.f32.mrf.mxu3 }
 0x2ec   : > { %v5677_v1 = vpop.eup %5676  ;;  %5680 = vtanh.f32 %v2018_v3 }
 0x2ed   : > { %v5679_v26 = vpop.eup %5678  ;;  %v2090_v37 = vpack.c.bf16 %v2070_v2, %v2070_v2  ;;  %v2080_v42 = vmul.f32 %v5677_v1, %v6772_v53 }
 0x2ee   : > { %v2081_v38 = vmul.f32 %v5679_v26, %v6777_v0  ;;  %v8881_v0 = vld [vmem:[#allocation40_spill] sm:$0xff] }
 0x2ef   : > { %v2115_v48 = vunpack.c.l.b16 %v2090_v37  ;;  %v1924_v43 = vpop.f32.mrf.mxu2  ;;  %v1764_v21 = vadd.f32 %v1739_v30, %v8881_v0 }
 0x2f0   : > { %v2097_v39 = vpack.c.bf16 %v2081_v38, %v2080_v42  ;;  %v1949_v5 = vadd.f32 %v1924_v43, %v1761_v63 }
 0x2f1   : > { %v6886_v57 = vpack.c.b16 %v2115_v48, %v2114_v58 }
 0x2f2   : > { %v2154_v56 = vunpack.c.l.b16 %v2097_v39  ;;  %v2155_v24 = vunpack.c.h.b16 %v2097_v39  ;;  %v2021_v41 = vadd.f32 %v6785_v16, %v1949_v5  ;;  %v5681_v15 = vpop.eup %5680  ;;  %v8884_v16 = vld [vmem:[#allocation41_spill] sm:$0xff]  ;;  %v7014_v39 = vld [vmem:[%s8757_s4 + $0x14] sm:$0xff] }
 0x2f3   : > { %v2073_v35 = vmul.f32 %v5681_v15, %v6833_v4  ;;  %v1579_v49 = vadd.f32 %v8884_v16, %v1391_v20 }
 0x2f4   : > { %v6889_v53 = vpack.c.b16 %v2154_v56, %v2152_v11  ;;  %v6891_v61 = vpack.c.b16 %v2155_v24, %v2153_v23  ;;  %5682 = vtanh.f32 %v2021_v41 }
 0x2f5   : > { %v2092_v59 = vpack.c.bf16 %v2073_v35, %v2073_v35  ;;  %v1767_v40 = vadd.f32 %v1741_v55, %v1579_v49 }
 0x2f6   : > { %2238 = vrot.lane.b32.xlu0 %v6889_v53, %s5727_s16 }
 0x2f7   : > { %v1927_v19 = vpop.f32.mrf.mxu2  ;;  %v2116_v29 = vunpack.c.l.b16 %v2092_v59 }
 0x2f8   : > { %v1952_v54 = vadd.f32 %v1927_v19, %v1764_v21 }
 0x2fa   : > { %v5683_v28 = vpop.eup %5682  ;;  %v2024_v7 = vadd.f32 %v6760_v36, %v1952_v54  ;;  %v7040_v54 = vld [vmem:[%s8757_s4 + $0x1c] sm:$0xff] }
 0x2fb   : > { %v2076_v9 = vmul.f32 %v5683_v28, %v6833_v4 }
 0x2fc   : > { %5684 = vtanh.f32 %v2024_v7  ;;  %v5342_v7 = vld [vmem:[%s8757_s4 + $0x24] sm:$0x3] }
 0x2fd   : > { %v2094_v62 = vpack.c.bf16 %v2076_v9, %v2076_v9 }
 0x2fe   : > { %2220 = vrot.lane.b32.xlu0 %v6886_v57, %s5727_s16 }
 0x2ff   : > { %v2117_v51 = vunpack.c.l.b16 %v2094_v62  ;;  %v1929_v8 = vpop.f32.mrf.mxu2  ;;  %v2283_v62 = vunpack.c.l.b16 %v5342_v7 }
 0x300   : > { %v1955_v17 = vadd.f32 %v1929_v8, %v1767_v40 }
 0x301   : > { %v6904_v34 = vpack.c.b16 %v2117_v51, %v2116_v29  ;;  %v7066_v29 = vpack.c.b16 %v2283_v62, %v2283_v62 }
 0x302   : > { %v2027_v52 = vadd.f32 %v6741_v10, %v1955_v17  ;;  %v5685_v36 = vpop.eup %5684 }
 0x303   : > { %2222 = vrot.lane.b32.xlu1 %v6904_v34, %s5727_s16  ;;  %v2079_v45 = vmul.f32 %v5685_v36, %v6833_v4 }
 0x304   : > { %5686 = vtanh.f32 %v2027_v52 }
 0x305   : > { %v2096_v44 = vpack.c.bf16 %v2079_v45, %v2079_v45 }
 0x306   : > { %2226 = vrot.lane.b32.xlu0 %v6804_v12, %s5727_s16 }
 0x307   : > { %v2118_v10 = vunpack.c.l.b16 %v2096_v44 }
 0x30a   : > { %v5687_v33 = vpop.eup %5686 }
 0x30b   : > { %v2082_v14 = vmul.f32 %v5687_v33, %v6833_v4  ;;  %2230 = vrot.lane.b32.xlu1 %v6835_v32, %s5727_s16 }
 0x30d   : > { %v2098_v46 = vpack.c.bf16 %v2082_v14, %v2082_v14 }
 0x30e   : > { %2232 = vrot.lane.b32.xlu0 %v6837_v50, %s5727_s16 }
 0x30f   : > { %v2119_v25 = vunpack.c.l.b16 %v2098_v46 }
 0x311   : > { %v6917_v27 = vpack.c.b16 %v2119_v25, %v2118_v10 }
 0x313   : > { %2224 = vrot.lane.b32.xlu2 %v6917_v27, %s5727_s16  ;;  %2240 = vrot.lane.b32.xlu1 %v6891_v61, %s5727_s16 }
 0x316   : > { %2178 = vrot.lane.b32.xlu0 %v6891_v61, %s5726_s15 }
 0x31b   : > { %2234 = vrot.lane.b32.xlu2 %v6869_v18, %s5727_s16  ;;  %2228 = vrot.lane.b32.xlu1 %v6806_v13, %s5727_s16 }
 0x31e   : > { %2176 = vrot.lane.b32.xlu0 %v6889_v53, %s5726_s15 }
 0x323   : > { %2218 = vrot.lane.b32.xlu2 %v6866_v47, %s5727_s16  ;;  %2128 = vrot.lane.b32.xlu1 %v6904_v34, %s5726_s15 }
 0x326   : > { %2126 = vrot.lane.b32.xlu0 %v6886_v57, %s5726_s15 }
 0x32b   : > { %2236 = vrot.lane.b32.xlu2 %v6871_v60, %s5727_s16  ;;  %2170 = vrot.lane.b32.xlu1 %v6837_v50, %s5726_s15 }
 0x32e   : > { %2467 = vrot.lane.b32.xlu0 %v6904_v34, %s5728_s17 }
 0x333   : > { %2174 = vrot.lane.b32.xlu2 %v6871_v60, %s5726_s15  ;;  %2479 = vrot.lane.b32.xlu1 %v6869_v18, %s5728_s17 }
 0x336   : > { %2166 = vrot.lane.b32.xlu0 %v6806_v13, %s5726_s15 }
 0x33b   : > { %2469 = vrot.lane.b32.xlu1 %v6917_v27, %s5728_s17  ;;  %2483 = vrot.lane.b32.xlu2 %v6889_v53, %s5728_s17 }
 0x33e   : > { %2475 = vrot.lane.b32.xlu0 %v6835_v32, %s5728_s17 }
 0x343   : > { %2168 = vrot.lane.b32.xlu1 %v6835_v32, %s5726_s15  ;;  %2172 = vrot.lane.b32.xlu2 %v6869_v18, %s5726_s15 }
 0x346   : > { %2471 = vrot.lane.b32.xlu0 %v6804_v12, %s5728_s17 }
 0x34b   : > { %2164 = vrot.lane.b32.xlu1 %v6804_v12, %s5726_s15  ;;  %2130 = vrot.lane.b32.xlu2 %v6917_v27, %s5726_s15 }
 0x34e   : > { %2635 = vrot.lane.b32.xlu0 %v6904_v34, %s5729_s18 }
 0x353   : > { %2647 = vrot.lane.b32.xlu1 %v6869_v18, %s5729_s18  ;;  %2124 = vrot.lane.b32.xlu2 %v6866_v47, %s5726_s15 }
 0x356   : > { %2653 = vrot.lane.b32.xlu0 %v6891_v61, %s5729_s18 }
 0x35b   : > { %2633 = vrot.lane.b32.xlu1 %v6886_v57, %s5729_s18  ;;  %2465 = vrot.lane.b32.xlu2 %v6886_v57, %s5728_s17 }
 0x35e   : > { %2481 = vrot.lane.b32.xlu0 %v6871_v60, %s5728_s17 }
 0x363   : > { %2637 = vrot.lane.b32.xlu1 %v6917_v27, %s5729_s18  ;;  %2463 = vrot.lane.b32.xlu2 %v6866_v47, %s5728_s17 }
 0x366   : > { %2639 = vrot.lane.b32.xlu0 %v6804_v12, %s5729_s18 }
 0x368   : > { %v2239_v4 = vpop.permute.xlu0 %2238 }
 0x36b   : > { %2649 = vrot.lane.b32.xlu1 %v6871_v60, %s5729_s18  ;;  %2651 = vrot.lane.b32.xlu2 %v6889_v53, %s5729_s18 }
 0x36d   : > { %v2225_v3 = vpop.permute.xlu2 %2224 }
 0x36e   : > { %v2272_v31 = vsel %vm400_vm3, %v2225_v3, %v2239_v4  ;;  %2473 = vrot.lane.b32.xlu0 %v6806_v13, %s5728_s17 }
 0x36f   : > { %2301 = vmatpush.bf16.msra.mxu3 %v2272_v31 }
 0x370   : > { %v2221_v2 = vpop.permute.xlu0 %2220 }
 0x373   : > { %2477 = vrot.lane.b32.xlu1 %v6837_v50, %s5728_s17  ;;  %2485 = vrot.lane.b32.xlu2 %v6891_v61, %s5728_s17 }
 0x375   : > { %v2223_v1 = vpop.permute.xlu1 %2222  ;;  %v2235_v26 = vpop.permute.xlu2 %2234 }
 0x376   : > { %2943 = vrot.lane.b32.xlu0 %v6891_v61, %s5730_s14  ;;  %v2268_v37 = vsel %vm400_vm3, %v2223_v1, %v2235_v26 }
 0x377   : > { %2302 = vmatpush.bf16.msra.mxu3 %v2268_v37 }
 0x378   : > { %v2227_v42 = vpop.permute.xlu0 %2226 }
 0x37b   : > { %2641 = vrot.lane.b32.xlu1 %v6806_v13, %s5729_s18  ;;  %2643 = vrot.lane.b32.xlu2 %v6835_v32, %s5729_s18 }
 0x37d   : > { %v2231_v63 = vpop.permute.xlu1 %2230  ;;  %v2219_v38 = vpop.permute.xlu2 %2218 }
 0x37e   : > { %2929 = vrot.lane.b32.xlu0 %v6835_v32, %s5730_s14  ;;  %v2264_v58 = vsel %vm400_vm3, %v2221_v2, %v2231_v63  ;;  %v2260_v43 = vsel %vm400_vm3, %v2219_v38, %v2227_v42 }
 0x37f   : > { %2303 = vmatpush.bf16.msra.mxu3 %v2264_v58 }
 0x380   : > { %v2233_v48 = vpop.permute.xlu0 %2232 }
 0x381   : > { %v2245_v21 = vsel %vm400_vm3, %v2233_v48, %v2221_v2  ;;  %v2244_v35 = vsel %vm400_vm3, %v2231_v63, %v2233_v48 }
 0x383   : > { %2935 = vrot.lane.b32.xlu1 %v6869_v18, %s5730_s14  ;;  %2631 = vrot.lane.b32.xlu2 %v6866_v47, %s5729_s18 }
 0x384   : > { %2304 = vmatpush.bf16.msra.mxu3 %v2260_v43 }
 0x385   : > { %v2237_v5 = vpop.permute.xlu2 %2236  ;;  %v2241_v30 = vpop.permute.xlu1 %2240 }
 0x386   : > { %v2248_v11 = vsel %vm400_vm3, %v2239_v4, %v2241_v30  ;;  %v2249_v23 = vsel %vm400_vm3, %v2241_v30, %v2225_v3  ;;  %3103 = vrot.lane.b32.xlu0 %v6869_v18, %s5731_s27  ;;  %v2247_v24 = vsel %vm400_vm3, %v2237_v5, %v2223_v1  ;;  %v2246_v41 = vsel %vm400_vm3, %v2235_v26, %v2237_v5  ;;  %v7143_v30 = vld [vmem:[%s8757_s4 + $0x28] sm:$0xff] }
 0x387   : > { %5351 = vmatmul.msk.bf16.vlgmr.msra.gmra.mxu3 %vm2287_vm2, %v7014_v39  ;;  %2347 = vmatpush.bf16.msrb.mxu0 %v2249_v23 }
 0x388   : > { %2324 = vmatpush.bf16.msrb.mxu3 %v2248_v11  ;;  %v2179_v56 = vpop.permute.xlu0 %2178 }
 0x38b   : > { %2348 = vmatpush.bf16.msrb.mxu0 %v2247_v24  ;;  %3109 = vrot.lane.b32.xlu1 %v6889_v53, %s5731_s27 }
 0x38c   : > { %2645 = vrot.lane.b32.xlu2 %v6837_v50, %s5729_s18  ;;  %2325 = vmatpush.bf16.msrb.mxu3 %v2246_v41 }
 0x38d   : > { %v2175_v15 = vpop.permute.xlu2 %2174  ;;  %v2229_v0 = vpop.permute.xlu1 %2228 }
 0x38e   : > { %2945 = vrot.lane.b32.xlu0 %v6917_v27, %s5730_s14  ;;  %v2243_v22 = vsel %vm400_vm3, %v2229_v0, %v2219_v38  ;;  %v2242_v20 = vsel %vm400_vm3, %v2227_v42, %v2229_v0 }
 0x38f   : > { %2349 = vmatpush.bf16.msrb.mxu0 %v2245_v21 }
 0x390   : > { %2326 = vmatpush.bf16.msrb.mxu3 %v2244_v35  ;;  %v2177_v19 = vpop.permute.xlu0 %2176  ;;  %v7173_v35 = vld [vmem:[%s8757_s4 + $0x8] sm:$0xff] }
 0x391   : > { %v2186_v6 = vsel %vm363_vm0, %v2177_v19, %v2179_v56 }
 0x392   : > { %2415 = vmatpush.bf16.msra.mxu2 %v2186_v6 }
 0x393   : > { %2933 = vrot.lane.b32.xlu1 %v6886_v57, %s5730_s14  ;;  %2350 = vmatpush.bf16.msrb.mxu0 %v2243_v22  ;;  %v7184_v22 = vld [vmem:[%s8757_s4 + $0x30] sm:$0xff] }
 0x394   : > { %2941 = vrot.lane.b32.xlu2 %v6889_v53, %s5730_s14  ;;  %2327 = vmatpush.bf16.msrb.mxu3 %v2242_v20 }
 0x395   : > { %v2129_v28 = vpop.permute.xlu1 %2128  ;;  %v7044_v16 = vpop.permute.xlu2 %2483 }
 0x396   : > { %2927 = vrot.lane.b32.xlu0 %v6866_v47, %s5730_s14  ;;  %5357 = vmatmul.msk.bf16.vlgmr.msrb.gmra.mxu0 %vm2287_vm2, %v7014_v39  ;;  %v2185_v33 = vsel %vm363_vm0, %v2175_v15, %v2129_v28 }
 0x397   : > { %5352 = vmatmul.msk.bf16.gmra.mxu3 %vm2287_vm2, %v7040_v54 }
 0x398   : > { %v2127_v49 = vpop.permute.xlu0 %2126 }
 0x39b   : > { %3105 = vrot.lane.b32.xlu1 %v6871_v60, %s5731_s27 }
 0x39c   : > { %2939 = vrot.lane.b32.xlu2 %v6904_v34, %s5730_s14 }
 0x39d   : > { %v2171_v55 = vpop.permute.xlu1 %2170  ;;  %v2173_v59 = vpop.permute.xlu2 %2172 }
 0x39e   : > { %3099 = vrot.lane.b32.xlu0 %v6837_v50, %s5731_s27  ;;  %v2184_v9 = vsel %vm363_vm0, %v2173_v59, %v2175_v15  ;;  %v2206_v45 = vsel %vm363_vm0, %v2129_v28, %v2173_v59  ;;  %v2183_v10 = vsel %vm363_vm0, %v2171_v55, %v2127_v49 }
 0x39f   : > { %2416 = vmatpush.bf16.msra.mxu2 %v2184_v9  ;;  %v5381_v9 = vld [vmem:[%s8757_s4 + $0x38] sm:$0x3] }
 0x3a0   : > { %v7062_v40 = vpop.permute.xlu0 %2467 }
 0x3a3   : > { %2931 = vrot.lane.b32.xlu1 %v6837_v50, %s5730_s14 }
 0x3a4   : > { %3111 = vrot.lane.b32.xlu2 %v6891_v61, %s5731_s27 }
 0x3a5   : > { %v7070_v51 = vpop.permute.xlu1 %2479  ;;  %v2131_v8 = vpop.permute.xlu2 %2130 }
 0x3a6   : > { %v2187_v17 = vsel %vm363_vm0, %v2179_v56, %v2131_v8  ;;  %v2210_v52 = vsel %vm363_vm0, %v2131_v8, %v2177_v19  ;;  %3093 = vrot.lane.b32.xlu0 %v6806_v13, %s5731_s27  ;;  %5358 = vmatmul.msk.bf16.gmra.mxu0 %vm2287_vm2, %v7040_v54  ;;  %v2513_v4 = vsel %vm693_vm11, %v7062_v40, %v7070_v51  ;;  %v2528_v8 = vunpack.c.l.b16 %v5381_v9  ;;  %v3589_v9 = vld [vmem:[%s8758_s5] sm:$0xff] }
 0x3a7   : > { %5353 = vmatmul.msk.bf16.gmra.mxu3 %vm2287_vm2, %v7066_v29  ;;  %2392 = vmatpush.bf16.msrb.mxu1 %v2210_v52 }
 0x3a8   : > { %2438 = vmatpush.bf16.msra.mxu3 %v2187_v17  ;;  %v2167_v36 = vpop.permute.xlu0 %2166 }
 0x3ab   : > { %2925 = vrot.lane.b32.xlu1 %v6806_v13, %s5730_s14  ;;  %2393 = vmatpush.bf16.msrb.mxu1 %v2206_v45 }
 0x3ac   : > { %2937 = vrot.lane.b32.xlu2 %v6871_v60, %s5730_s14  ;;  %2439 = vmatpush.bf16.msra.mxu3 %v2185_v33 }
 0x3ad   : > { %v2470_v44 = vpop.permute.xlu1 %2469  ;;  %v2125_v14 = vpop.permute.xlu2 %2124 }
 0x3ae   : > { %v2517_v46 = vsel %vm693_vm11, %v2470_v44, %v7044_v16  ;;  %3271 = vrot.lane.b32.xlu0 %v6869_v18, %s5732_s24  ;;  %v2181_v3 = vsel %vm363_vm0, %v2167_v36, %v2125_v14 }
 0x3af   : > { %2545 = vmatpush.bf16.msra.mxu0 %v2517_v46 }
 0x3b0   : > { %2440 = vmatpush.bf16.msra.mxu3 %v2183_v10  ;;  %v7091_v25 = vpop.permute.xlu0 %2475 }
 0x3b3   : > { %3277 = vrot.lane.b32.xlu1 %v6889_v53, %s5732_s24  ;;  %2546 = vmatpush.bf16.msra.mxu0 %v2513_v4 }
 0x3b4   : > { %2923 = vrot.lane.b32.xlu2 %v6804_v12, %s5730_s14  ;;  %2441 = vmatpush.bf16.msra.mxu3 %v2181_v3 }
 0x3b5   : > { %v2169_v31 = vpop.permute.xlu1 %2168  ;;  %v7101_v2 = vpop.permute.xlu2 %2465 }
 0x3b6   : > { %3107 = vrot.lane.b32.xlu0 %v6904_v34, %s5731_s27  ;;  %5359 = vmatmul.msk.bf16.gmra.mxu0 %vm2287_vm2, %v7066_v29  ;;  %v2202_v1 = vsel %vm363_vm0, %v2127_v49, %v2169_v31  ;;  %v2182_v26 = vsel %vm363_vm0, %v2169_v31, %v2171_v55  ;;  %v2509_v37 = vsel %vm693_vm11, %v7101_v2, %v7091_v25  ;;  %v2103_v49 = vld [vmem:[%s8757_s4 + $0x10] sm:$0x3] }
 0x3b7   : > { %5354 = vmatmul.msk.bf16.vlgmr.msrb.gmra.mxu3 %vm2287_vm2, %v7014_v39  ;;  %2394 = vmatpush.bf16.msrb.mxu1 %v2202_v1  ;;  %v7132_v39 = vld [vmem:[%s8757_s4] sm:$0xff]  ;;  %v2375_v55 = vunpack.c.l.b16 %v2103_v49 }
 0x3b8   : > { %2417 = vmatpush.bf16.msra.mxu2 %v2182_v26  ;;  %2547 = vmatpush.bf16.msra.mxu0 %v2509_v37  ;;  %v7114_v42 = vpop.permute.xlu0 %2471 }
 0x3bb   : > { %3273 = vrot.lane.b32.xlu1 %v6871_v60, %s5732_s24 }
 0x3bc   : > { %3097 = vrot.lane.b32.xlu2 %v6835_v32, %s5731_s27 }
 0x3bd   : > { %v2165_v63 = vpop.permute.xlu1 %2164  ;;  %v7120_v38 = vpop.permute.xlu2 %2463 }
 0x3be   : > { %3281 = vrot.lane.b32.xlu0 %v6917_v27, %s5732_s24  ;;  %v2198_v58 = vsel %vm363_vm0, %v2125_v14, %v2165_v63  ;;  %v2180_v48 = vsel %vm363_vm0, %v2165_v63, %v2167_v36  ;;  %v2505_v43 = vsel %vm693_vm11, %v7120_v38, %v7114_v42  ;;  %v7224_v36 = vpack.c.b16 %v2528_v8, %v2528_v8 }
 0x3bf   : > { %2395 = vmatpush.bf16.msrb.mxu1 %v2198_v58  ;;  %2418 = vmatpush.bf16.msra.mxu2 %v2180_v48  ;;  %vm8885_vm0 = vcmask 900096  }
 0x3c0   : > { %2548 = vmatpush.bf16.msra.mxu0 %v2505_v43  ;;  %v7134_v5 = vpop.permute.xlu0 %2635  ;;  %v3592_v43 = vld [vmem:[%s8758_s5 + $0x18] sm:$0xff]  ;;  %vm8886_vm3 = vmmov %vm8885_vm0 }
 0x3c2   : > { %5368 = vmatmul.msk.bf16.vlgmr.msrb.gmra.mxu1 %vm2287_vm2, %v7132_v39  ;;  %5371 = vmatmul.msk.bf16.vlgmr.msra.gmra.mxu2 %vm2287_vm2, %v7132_v39 }
 0x3c3   : > { %3265 = vrot.lane.b32.xlu1 %v6835_v32, %s5732_s24 }
 0x3c4   : > { %3091 = vrot.lane.b32.xlu2 %v6804_v12, %s5731_s27 }
 0x3c5   : > { %v2648_v11 = vpop.permute.xlu1 %2647  ;;  %v2652_v23 = vpop.permute.xlu2 %2651 }
 0x3c6   : > { %3261 = vrot.lane.b32.xlu0 %v6806_v13, %s5732_s24  ;;  %5390 = vmatmul.msk.bf16.vlgmr.msra.gmra.mxu0 %vm2287_vm2, %v7143_v30  ;;  %v2681_v59 = vsel %vm881_vm12, %v7134_v5, %v2648_v11 }
 0x3c7   : > { %5355 = vmatmul.msk.bf16.gmra.mxu3 %vm2287_vm2, %v7040_v54 }
 0x3c8   : > { %v7155_v56 = vpop.permute.xlu0 %2653 }
 0x3c9   : > { %v2661_v24 = vsel %vm881_vm12, %v2652_v23, %v7155_v56 }
 0x3ca   : > { %2736 = vmatpush.bf16.msrb.mxu0 %v2661_v24 }
 0x3cb   : > { %3275 = vrot.lane.b32.xlu1 %v6904_v34, %s5732_s24 }
 0x3cc   : > { %3279 = vrot.lane.b32.xlu2 %v6891_v61, %s5732_s24 }
 0x3cd   : > { %v7163_v41 = vpop.permute.xlu1 %2633  ;;  %v2486_v15 = vpop.permute.xlu2 %2485 }
 0x3ce   : > { %v2493_v0 = vsel %vm693_vm11, %v7044_v16, %v2486_v15  ;;  %v2494_v21 = vsel %vm693_vm11, %v2486_v15, %v2470_v44  ;;  %3095 = vrot.lane.b32.xlu0 %v6866_v47, %s5731_s27 }
 0x3cf   : > { %2568 = vmatpush.bf16.msra.mxu1 %v2493_v0  ;;  %2591 = vmatpush.bf16.msrb.mxu2 %v2494_v21 }
 0x3d0   : > { %v2482_v19 = vpop.permute.xlu0 %2481 }
 0x3d1   : > { %v2491_v6 = vsel %vm693_vm11, %v7070_v51, %v2482_v19  ;;  %v2492_v20 = vsel %vm693_vm11, %v2482_v19, %v7062_v40  ;;  %v7216_v51 = vpack.c.b16 %v2375_v55, %v2375_v55 }
 0x3d2   : > { %5369 = vmatmul.msk.bf16.gmra.mxu1 %vm2287_vm2, %v7173_v35  ;;  %5372 = vmatmul.msk.bf16.gmra.mxu2 %vm2287_vm2, %v7173_v35 }
 0x3d3   : > { %3101 = vrot.lane.b32.xlu1 %v6886_v57, %s5731_s27  ;;  %2569 = vmatpush.bf16.msra.mxu1 %v2491_v6  ;;  %v3593_v6 = vld [vmem:[%s8758_s5 + $0x20] sm:$0xf] }
 0x3d4   : > { %3267 = vrot.lane.b32.xlu2 %v6837_v50, %s5732_s24  ;;  %2592 = vmatpush.bf16.msrb.mxu2 %v2492_v20 }
 0x3d5   : > { %v2638_v54 = vpop.permute.xlu1 %2637  ;;  %v2644_v28 = vpop.permute.xlu2 %2643 }
 0x3d6   : > { %v2685_v16 = vsel %vm881_vm12, %v2638_v54, %v2652_v23  ;;  %3445 = vrot.lane.b32.xlu0 %v6889_v53, %s5733_s25  ;;  %5391 = vmatmul.msk.bf16.gmra.mxu0 %vm2287_vm2, %v7184_v22  ;;  %v2677_v17 = vsel %vm881_vm12, %v7163_v41, %v2644_v28 }
 0x3d7   : > { %5356 = vmatmul.msk.bf16.gmra.mxu3 %vm2287_vm2, %v7066_v29 }
 0x3d8   : > { %2713 = vmatpush.bf16.msrb.mxu3 %v2685_v16  ;;  %v2640_v7 = vpop.permute.xlu0 %2639 }
 0x3db   : > { %3263 = vrot.lane.b32.xlu1 %v6866_v47, %s5732_s24 }
 0x3dc   : > { %3113 = vrot.lane.b32.xlu2 %v6917_v27, %s5731_s27  ;;  %2714 = vmatpush.bf16.msrb.mxu3 %v2681_v59 }
 0x3dd   : > { %v2650_v62 = vpop.permute.xlu1 %2649  ;;  %v7211_v40 = vpop.permute.xlu2 %2631 }
 0x3de   : > { %3449 = vrot.lane.b32.xlu0 %v6917_v27, %s5733_s25  ;;  %v2659_v29 = vsel %vm881_vm12, %v2648_v11, %v2650_v62  ;;  %v2673_v45 = vsel %vm881_vm12, %v7211_v40, %v2640_v7  ;;  %v2660_v37 = vsel %vm881_vm12, %v2650_v62, %v7134_v5 }
 0x3df   : > { %2737 = vmatpush.bf16.msrb.mxu0 %v2659_v29 }
 0x3e0   : > { %2715 = vmatpush.bf16.msrb.mxu3 %v2677_v17  ;;  %v2474_v52 = vpop.permute.xlu0 %2473 }
 0x3e1   : > { %v2487_v3 = vsel %vm693_vm11, %v7114_v42, %v2474_v52  ;;  %v2488_v31 = vsel %vm693_vm11, %v2474_v52, %v7120_v38 }
 0x3e2   : > { %5370 = vmatmul.msk.bf16.gmra.mxu1 %vm2287_vm2, %v7216_v51  ;;  %5373 = vmatmul.msk.bf16.gmra.mxu2 %vm2287_vm2, %v7216_v51 }
 0x3e3   : > { %3441 = vrot.lane.b32.xlu1 %v6871_v60, %s5733_s25 }
 0x3e4   : > { %3259 = vrot.lane.b32.xlu2 %v6804_v12, %s5732_s24  ;;  %2716 = vmatpush.bf16.msrb.mxu3 %v2673_v45 }
 0x3e5   : > { %v2478_v33 = vpop.permute.xlu1 %2477 }
 0x3e6   : > { %v2646_v44 = vpop.permute.xlu2 %2645  ;;  %3439 = vrot.lane.b32.xlu0 %v6869_v18, %s5733_s25  ;;  %5392 = vmatmul.msk.bf16.gmra.mxu0 %vm2287_vm2, %v7224_v36  ;;  %v2489_v14 = vsel %vm693_vm11, %v7091_v25, %v2478_v33  ;;  %v2490_v46 = vsel %vm693_vm11, %v2478_v33, %v7101_v2  ;;  %v2662_v25 = vsel %vm881_vm12, %v7155_v56, %v2638_v54  ;;  %v7411_v33 = vld [vmem:[%s8757_s4 + $0x50] sm:$0xff]  ;;  %vm8887_vm11 = vmmov %vm8885_vm0 }
 0x3e7   : > { %5374 = vmatmul.msk.bf16.vlgmr.msra.gmra.mxu3 %vm2287_vm2, %v7132_v39  ;;  %2570 = vmatpush.bf16.msra.mxu1 %v2489_v14  ;;  %v2657_v10 = vsel %vm881_vm12, %v2644_v28, %v2646_v44 }
 0x3e8   : > { %2860 = vmatpush.bf16.msra.mxu3 %v6891_v61  ;;  %2593 = vmatpush.bf16.msrb.mxu2 %v2490_v46  ;;  %v2944_v4 = vpop.permute.xlu0 %2943 }
 0x3e9   : > { %2738 = vmatpush.bf16.msrb.mxu0 %v2657_v10 }
 0x3eb   : > { %3435 = vrot.lane.b32.xlu1 %v6837_v50, %s5733_s25  ;;  %2571 = vmatpush.bf16.msra.mxu1 %v2487_v3 }
 0x3ec   : > { %2861 = vmatpush.bf16.msra.mxu3 %v6871_v60  ;;  %3269 = vrot.lane.b32.xlu2 %v6886_v57, %s5732_s24  ;;  %s5619_s24 = smul.u32 24, %s9187_s10 }
 0x3ed   : > { %2594 = vmatpush.bf16.msrb.mxu2 %v2488_v31  ;;  %v2642_v2 = vpop.permute.xlu1 %2641 }
 0x3ee   : > { %v7256_v1 = vpop.permute.xlu2 %2941  ;;  %3433 = vrot.lane.b32.xlu0 %v6835_v32, %s5733_s25  ;;  %v2655_v26 = vsel %vm881_vm12, %v2640_v7, %v2642_v2  ;;  %s332_s29 = scalar_lea.vmem %s8762_s9, %s5619_s24 }
 0x3ef   : > { %2759 = vmatpush.bf16.msrb.mxu1 %v2662_v25  ;;  %2739 = vmatpush.bf16.msrb.mxu0 %v2655_v26  ;;  %v2953_v63 = vsel %vm1226_vm13, %v7256_v1, %v2944_v4 }
 0x3f0   : > { %2862 = vmatpush.bf16.msra.mxu3 %v6837_v50  ;;  %v7262_v60 = vpop.permute.xlu0 %2929  ;;  %v3591_v50 = vld [vmem:[%s8758_s5 + $0x10] sm:$0xff] }
 0x3f1   : > { %2837 = vmatpush.bf16.msra.mxu2 %v6889_v53  ;;  %v7280_v53 = vld [vmem:[%s8757_s4 + $0x3c] sm:$0xff] }
 0x3f2   : > { %5393 = vmatmul.msk.bf16.vlgmr.msra.gmra.mxu1 %vm2287_vm2, %v7143_v30  ;;  %5396 = vmatmul.msk.bf16.vlgmr.msrb.gmra.mxu2 %vm2287_vm2, %v7143_v30 }
 0x3f3   : > { %2883 = vmatpush.bf16.msra.mxu0 %v6917_v27  ;;  %2760 = vmatpush.bf16.msrb.mxu1 %v2660_v37 }
 0x3f4   : > { %3429 = vrot.lane.b32.xlu1 %v6806_v13, %s5733_s25  ;;  %2863 = vmatpush.bf16.msra.mxu3 %v6806_v13 }
 0x3f5   : > { %2838 = vmatpush.bf16.msra.mxu2 %v6869_v18  ;;  %3447 = vrot.lane.b32.xlu2 %v6891_v61, %s5733_s25  ;;  %v2658_v18 = vsel %vm881_vm12, %v2646_v44, %v7163_v41  ;;  %v7288_v27 = vpop.permute.xlu1 %2935  ;;  %v2656_v61 = vsel %vm881_vm12, %v2642_v2, %v7211_v40  ;;  %v5403_v41 = vld [vmem:[%s8757_s4 + $0x4c] sm:$0x3]  ;;  %vm8888_vm12 = vmmov %vm8885_vm0 }
 0x3f6   : > { %v7291_v42 = vpop.permute.xlu2 %2939  ;;  %3606 = vperm.xlu0 %5638, %v3591_v50   ;;  %5415 = vmatmul.msk.bf16.vlgmr.msrb.gmra.mxu0 %vm2287_vm2, %v7280_v53 }
 0x3f7   : > { %2761 = vmatpush.bf16.msrb.mxu1 %v2658_v18  ;;  %2884 = vmatpush.bf16.msra.mxu0 %v6904_v34  ;;  %v2973_v40 = vsel %vm1226_vm13, %v7291_v42, %v7288_v27 }
 0x3f8   : > { %5375 = vmatmul.msk.bf16.gmra.mxu3 %vm2287_vm2, %v7173_v35  ;;  %v7297_v13 = vpop.permute.xlu0 %3103  ;;  %v2696_v35 = vunpack.c.l.b16 %v5403_v41 }
 0x3f9   : > { %2839 = vmatpush.bf16.msra.mxu2 %v6835_v32  ;;  %v3590_v32 = vld [vmem:[%s8758_s5 + $0x8] sm:$0xff] }
 0x3fa   : > { %v7371_v20 = vpack.c.b16 %v2696_v35, %v2696_v35 }
 0x3fb   : > { %2762 = vmatpush.bf16.msrb.mxu1 %v2656_v61  ;;  %2885 = vmatpush.bf16.msra.mxu0 %v6886_v57 }
 0x3fc   : > { %3427 = vrot.lane.b32.xlu1 %v6804_v12, %s5733_s25 }
 0x3fd   : > { %2840 = vmatpush.bf16.msra.mxu2 %v6804_v12  ;;  %3443 = vrot.lane.b32.xlu2 %v6904_v34, %s5733_s25  ;;  %v7313_v38 = vpop.permute.xlu1 %3109  ;;  %v7331_v34 = vld [vmem:[%s8757_s4 + $0x44] sm:$0xff] }
 0x3fe   : > { %v7315_v58 = vpop.permute.xlu2 %3111  ;;  %3601 = vperm.xlu0 %5638, %v3590_v32  }
 0x3ff   : > { %3005 = vmatpush.bf16.msra.mxu1 %v2953_v63  ;;  %2886 = vmatpush.bf16.msra.mxu0 %v6866_v47  ;;  %v3121_v48 = vsel %vm1414_vm14, %v7313_v38, %v7315_v58 }
 0x400   : > { %v2946_v12 = vpop.permute.xlu0 %2945 }
 0x401   : > { %v2954_v39 = vsel %vm1226_vm13, %v2944_v4, %v2946_v12  ;;  %v2977_v7 = vsel %vm1226_vm13, %v2946_v12, %v7256_v1 }
 0x402   : > { %3028 = vmatpush.bf16.msrb.mxu2 %v2954_v39  ;;  %5394 = vmatmul.msk.bf16.gmra.mxu1 %vm2287_vm2, %v7184_v22 }
 0x403   : > { %3173 = vmatpush.bf16.msrb.mxu0 %v3121_v48  ;;  %5397 = vmatmul.msk.bf16.gmra.mxu2 %vm2287_vm2, %v7184_v22  ;;  %v5425_v48 = vld [vmem:[%s8757_s4 + $0x60] sm:$0x3] }
 0x404   : > { %3611 = vperm.xlu1 %5639, %v3592_v43   ;;  %v2808_v39 = vunpack.c.l.b16 %v5425_v48 }
 0x405   : > { %3437 = vrot.lane.b32.xlu2 %v6886_v57, %s5733_s25  ;;  %v2934_v5 = vpop.permute.xlu1 %2933  ;;  %v4899_v57 = vld [vmem:[%s8761_s8] sm:$0xff] }
 0x406   : > { %v2938_v30 = vpop.permute.xlu2 %2937  ;;  %5416 = vmatmul.msk.bf16.gmra.mxu0 %vm2287_vm2, %v7331_v34 }
 0x407   : > { %v2951_v11 = vsel %vm1226_vm13, %v7288_v27, %v2938_v30  ;;  %v2952_v23 = vsel %vm1226_vm13, %v2938_v30, %v7291_v42 }
 0x408   : > { %5376 = vmatmul.msk.bf16.gmra.mxu3 %vm2287_vm2, %v7216_v51  ;;  %3006 = vmatpush.bf16.msra.mxu1 %v2951_v11  ;;  %v2928_v56 = vpop.permute.xlu0 %2927 }
 0x409   : > { %3029 = vmatpush.bf16.msrb.mxu2 %v2952_v23  ;;  %v7476_v23 = vpack.c.b16 %v2808_v39, %v2808_v39 }
 0x40a   : > { %v7346_v24 = vpop.f32.mrf.mxu3 }
 0x40c   : > { %4902 = vperm.xlu1 %5639, %v4899_v57  }
 0x40d   : > { %3431 = vrot.lane.b32.xlu2 %v6866_v47, %s5733_s25  ;;  %v7353_v15 = vpop.permute.xlu1 %3105 }
 0x40e   : > { %v2924_v0 = vpop.permute.xlu2 %2923  ;;  %v3119_v21 = vsel %vm1414_vm14, %v7297_v13, %v7353_v15 }
 0x40f   : > { %3174 = vmatpush.bf16.msrb.mxu0 %v3119_v21  ;;  %v2965_v46 = vsel %vm1226_vm13, %v2928_v56, %v2924_v0 }
 0x410   : > { %v7358_v19 = vpop.permute.xlu0 %3099 }
 0x412   : > { %v7363_v47 = vpop.f32.mrf.mxu3  ;;  %5395 = vmatmul.msk.bf16.gmra.mxu1 %vm2287_vm2, %v7224_v36 }
 0x413   : > { %5398 = vmatmul.msk.bf16.gmra.mxu2 %vm2287_vm2, %v7224_v36  ;;  %v7369_v22 = vpop.f32.mrf.mxu0  ;;  %v2969_v36 = vsel %vm1226_vm13, %v2934_v5, %v7262_v60 }
 0x415   : > { %3616 = vperm.xlu2 %5637, %v3593_v6   ;;  %v2932_v54 = vpop.permute.xlu1 %2931 }
 0x416   : > { %v7373_v28 = vpop.permute.xlu2 %3097  ;;  %v2949_v16 = vsel %vm1226_vm13, %v7262_v60, %v2932_v54  ;;  %v2950_v49 = vsel %vm1226_vm13, %v2932_v54, %v2934_v5  ;;  %5417 = vmatmul.msk.bf16.gmra.mxu0 %vm2287_vm2, %v7371_v20  ;;  %v7439_v60 = vld [vmem:[%s8757_s4 + $0x58] sm:$0xff] }
 0x417   : > { %v3117_v55 = vsel %vm1414_vm14, %v7373_v28, %v7358_v19  ;;  %3007 = vmatpush.bf16.msra.mxu1 %v2949_v16  ;;  %3030 = vmatpush.bf16.msrb.mxu2 %v2950_v49 }
 0x418   : > { %5412 = vmatmul.msk.bf16.vlgmr.msrb.gmra.mxu3 %vm2287_vm2, %v7280_v53  ;;  %v7387_v59 = vpop.permute.xlu0 %3093  ;;  %3175 = vmatpush.bf16.msrb.mxu0 %v3117_v55 }
 0x419   : > { %3051 = vmatpush.bf16.msrb.mxu3 %v2977_v7 }
 0x41a   : > { %v7392_v62 = vpop.f32.mrf.mxu3 }
 0x41b   : > { %v7397_v29 = vpop.f32.mrf.mxu0 }
 0x41d   : > { %3052 = vmatpush.bf16.msrb.mxu3 %v2973_v40  ;;  %3596 = vperm.xlu2 %5637, %v3589_v9   ;;  %v2926_v51 = vpop.permute.xlu1 %2925 }
 0x41e   : > { %v7399_v8 = vpop.permute.xlu2 %3091  ;;  %v2947_v17 = vsel %vm1226_vm13, %v2924_v0, %v2926_v51  ;;  %v2948_v52 = vsel %vm1226_vm13, %v2926_v51, %v2928_v56  ;;  %vm8889_vm13 = vmmov %vm8885_vm0 }
 0x41f   : > { %3008 = vmatpush.bf16.msra.mxu1 %v2947_v17  ;;  %3031 = vmatpush.bf16.msrb.mxu2 %v2948_v52  ;;  %v3115_v45 = vsel %vm1414_vm14, %v7399_v8, %v7387_v59 }
 0x420   : > { %3176 = vmatpush.bf16.msrb.mxu0 %v3115_v45  ;;  %v7413_v44 = vpop.permute.xlu0 %3271 }
 0x421   : > { %3053 = vmatpush.bf16.msrb.mxu3 %v2969_v36 }
 0x422   : > { %v7415_v14 = vpop.f32.mrf.mxu3  ;;  %5418 = vmatmul.msk.bf16.vlgmr.msrb.gmra.mxu1 %vm2287_vm2, %v7280_v53 }
 0x423   : > { %5434 = vmatmul.msk.bf16.vlgmr.msra.gmra.mxu2 %vm2287_vm2, %v7411_v33  ;;  %v7422_v10 = vpop.f32.mrf.mxu0 }
 0x425   : > { %3054 = vmatpush.bf16.msrb.mxu3 %v2965_v46  ;;  %v7424_v4 = vpop.permute.xlu1 %3277 }
 0x426   : > { %v3280_v3 = vpop.permute.xlu2 %3279  ;;  %5440 = vmatmul.msk.bf16.vlgmr.msra.gmra.mxu0 %vm2287_vm2, %v7411_v33 }
 0x428   : > { %5413 = vmatmul.msk.bf16.gmra.mxu3 %vm2287_vm2, %v7331_v34  ;;  %v3108_v25 = vpop.permute.xlu0 %3107 }
 0x42a   : > { %v7430_v31 = vpop.f32.mrf.mxu3 }
 0x42b   : > { %v7432_v2 = vpop.f32.mrf.mxu0 }
 0x42d   : > { %v3274_v1 = vpop.permute.xlu1 %3273 }
 0x42e   : > { %v7434_v26 = vpop.permute.xlu2 %3267  ;;  %v3287_v55 = vsel %vm8889_vm13, %v7413_v44, %v3274_v1  ;;  %vm8894_vm13 = vmmov %vm8885_vm0 }
 0x430   : > { %v7441_v37 = vpop.permute.xlu0 %3281 }
 0x431   : > { %v3290_v50 = vsel %vm8885_vm0, %v3280_v3, %v7441_v37 }
 0x432   : > { %v2318_v53 = vpop.f32.mrf.mxu3  ;;  %3364 = vmatpush.bf16.msra.mxu0 %v3290_v50  ;;  %5419 = vmatmul.msk.bf16.gmra.mxu1 %vm2287_vm2, %v7331_v34 }
 0x433   : > { %5435 = vmatmul.msk.bf16.gmra.mxu2 %vm2287_vm2, %v7439_v60  ;;  %v7449_v18 = vpop.f32.mrf.mxu0 }
 0x435   : > { %v7451_v27 = vpop.permute.xlu1 %3265 }
 0x436   : > { %v3114_v42 = vpop.permute.xlu2 %3113  ;;  %5441 = vmatmul.msk.bf16.gmra.mxu0 %vm2287_vm2, %v7439_v60 }
 0x437   : > { %v3122_v61 = vsel %vm1414_vm14, %v7315_v58, %v3114_v42  ;;  %v3145_v63 = vsel %vm1414_vm14, %v3114_v42, %v7313_v38  ;;  %v3120_v58 = vsel %vm1414_vm14, %v7353_v15, %v3108_v25  ;;  %v3141_v38 = vsel %vm1414_vm14, %v3108_v25, %v7297_v13 }
 0x438   : > { %5414 = vmatmul.msk.bf16.gmra.mxu3 %vm2287_vm2, %v7371_v20  ;;  %3196 = vmatpush.bf16.msrb.mxu1 %v3122_v61  ;;  %v7461_v32 = vpop.permute.xlu0 %3261 }
 0x439   : > { %3219 = vmatpush.bf16.msra.mxu2 %v3145_v63 }
 0x43a   : > { %v2329_v12 = vpop.f32.mrf.mxu3 }
 0x43b   : > { %v2364_v43 = vpop.f32.mrf.mxu0 }
 0x43c   : > { %3197 = vmatpush.bf16.msrb.mxu1 %v3120_v58 }
 0x43d   : > { %3220 = vmatpush.bf16.msra.mxu2 %v3141_v38  ;;  %v7470_v34 = vpop.permute.xlu1 %3275 }
 0x43e   : > { %v7472_v5 = vpop.permute.xlu2 %3259  ;;  %v3288_v30 = vsel %vm8886_vm3, %v3274_v1, %v7470_v34  ;;  %vm8890_vm3 = vmmov %vm8885_vm0 }
 0x43f   : > { %v2397_v11 = vpop.f32.mrf.mxu1  ;;  %3365 = vmatpush.bf16.msra.mxu0 %v3288_v30  ;;  %v3285_v46 = vsel %vm8890_vm3, %v7451_v27, %v7434_v26  ;;  %vm4277_vm3 = vcmask 1045509  }
 0x440   : > { %v2398_v56 = vadd.f32 %v2397_v11, %v7346_v24  ;;  %v3096_v57 = vpop.permute.xlu0 %3095 }
 0x441   : > { %v3116_v40 = vsel %vm1414_vm14, %v7387_v59, %v3096_v57  ;;  %v3133_v17 = vsel %vm1414_vm14, %v3096_v57, %v7399_v8  ;;  %v7520_v59 = vld [vmem:[%s8757_s4 + $0x64] sm:$0xff] }
 0x442   : > { %v2331_v41 = vpop.f32.mrf.mxu3  ;;  %5420 = vmatmul.msk.bf16.gmra.mxu1 %vm2287_vm2, %v7371_v20  ;;  %v3289_v20 = vsel %vm8887_vm11, %v7424_v4, %v3280_v3  ;;  %vm8892_vm11 = vmmov %vm8885_vm0 }
 0x443   : > { %5436 = vmatmul.msk.bf16.gmra.mxu2 %vm2287_vm2, %v7476_v23  ;;  %v2550_v13 = vpop.f32.mrf.mxu0 }
 0x444   : > { %v7483_v15 = vadd.f32 %v2550_v13, %v2398_v56 }
 0x445   : > { %v3102_v0 = vpop.permute.xlu1 %3101  ;;  %v2420_v21 = vpop.f32.mrf.mxu2 }
 0x446   : > { %v7485_v35 = vpop.permute.xlu2 %3269  ;;  %v7487_v6 = vadd.f32 %v2420_v21, %v2329_v12  ;;  %v3118_v24 = vsel %vm1414_vm14, %v7358_v19, %v3102_v0  ;;  %v3137_v54 = vsel %vm1414_vm14, %v3102_v0, %v7373_v28  ;;  %5442 = vmatmul.msk.bf16.gmra.mxu0 %vm2287_vm2, %v7476_v23  ;;  %vm8891_vm14 = vmmov %vm8885_vm0  ;;  %v7581_v0 = vld [vmem:[%s8757_s4 + $0x6c] sm:$0xff] }
 0x447   : > { %v2399_v16 = vpop.f32.mrf.mxu1  ;;  %v3286_v49 = vsel %vm8888_vm12, %v7434_v26, %v7485_v35  ;;  %3198 = vmatpush.bf16.msrb.mxu1 %v3118_v24  ;;  %3221 = vmatpush.bf16.msra.mxu2 %v3137_v54  ;;  %v3313_v1 = vsel %vm8891_vm14, %v7441_v37, %v7424_v4  ;;  %v7543_v4 = vld [vmem:[%s8757_s4 + $0x78] sm:$0xff]  ;;  %vm8893_vm12 = vmmov %vm8885_vm0  ;;  %v3305_v11 = vsel %vm8894_vm13, %v7485_v35, %v7451_v27 }
 0x448   : > { %5437 = vmatmul.msk.bf16.vlgmr.msra.gmra.mxu3 %vm2287_vm2, %v7411_v33  ;;  %v2400_v19 = vadd.f32 %v2399_v16, %v7363_v47  ;;  %v3446_v7 = vpop.permute.xlu0 %3445  ;;  %3366 = vmatpush.bf16.msra.mxu0 %v3286_v49  ;;  %v3309_v12 = vsel %vm8893_vm12, %v7470_v34, %v7413_v44 }
 0x449   : > { %3341 = vmatpush.bf16.msra.mxu3 %v3289_v20 }
 0x44a   : > { %v2334_v28 = vpop.f32.mrf.mxu3 }
 0x44b   : > { %v2552_v9 = vpop.f32.mrf.mxu0  ;;  %3199 = vmatpush.bf16.msrb.mxu1 %v3116_v40  ;;  %3222 = vmatpush.bf16.msra.mxu2 %v3133_v17 }
 0x44c   : > { %v7507_v51 = vadd.f32 %v2552_v9, %v2400_v19 }
 0x44d   : > { %3342 = vmatpush.bf16.msra.mxu3 %v3287_v55  ;;  %v3264_v47 = vpop.permute.xlu1 %3263  ;;  %v2422_v52 = vpop.f32.mrf.mxu2  ;;  %v5447_v55 = vld [vmem:[%s8757_s4 + $0x74] sm:$0x3] }
 0x44e   : > { %v7513_v45 = vadd.f32 %v2422_v52, %v2331_v41  ;;  %v3284_v33 = vsel %vm8885_vm0, %v7461_v32, %v3264_v47  ;;  %v3301_v41 = vsel %vm8885_vm0, %v3264_v47, %v7472_v5  ;;  %v2988_v17 = vunpack.c.l.b16 %v5447_v55  ;;  %v5469_v52 = vld [vmem:[%s8757_s4 + $0x88] sm:$0x3] }
 0x44f   : > { %v7511_v36 = vpop.permute.xlu2 %3447  ;;  %v2402_v8 = vpop.f32.mrf.mxu1  ;;  %3367 = vmatpush.bf16.msra.mxu0 %v3284_v33 }
 0x450   : > { %v2403_v3 = vadd.f32 %v2402_v8, %v7392_v62  ;;  %v7526_v25 = vpop.permute.xlu0 %3449  ;;  %v3457_v53 = vsel %vm1790_vm15, %v3446_v7, %v7511_v36  ;;  %v3283_v62 = vsel %vm8892_vm11, %v7472_v5, %v7461_v32 }
 0x451   : > { %3343 = vmatpush.bf16.msra.mxu3 %v3285_v46  ;;  %v3481_v32 = vsel %vm1790_vm15, %v7526_v25, %v3446_v7 }
 0x452   : > { %v2336_v50 = vpop.f32.mrf.mxu3  ;;  %5456 = vmatmul.msk.bf16.vlgmr.msra.gmra.mxu1 %vm2287_vm2, %v7520_v59 }
 0x453   : > { %5459 = vmatmul.msk.bf16.vlgmr.msrb.gmra.mxu2 %vm2287_vm2, %v7520_v59  ;;  %3387 = vmatpush.bf16.msra.mxu1 %v3313_v1  ;;  %v2555_v26 = vpop.f32.mrf.mxu0  ;;  %v2991_v1 = vpack.c.b16 %v2988_v17, %v2988_v17 }
 0x454   : > { %3509 = vmatpush.bf16.msrb.mxu2 %v3457_v53  ;;  %v7545_v37 = vadd.f32 %v2555_v26, %v2403_v3 }
 0x455   : > { %3344 = vmatpush.bf16.msra.mxu3 %v3283_v62  ;;  %v7547_v42 = vpop.permute.xlu1 %3441  ;;  %v2425_v61 = vpop.f32.mrf.mxu2 }
 0x456   : > { %v7551_v48 = vadd.f32 %v2425_v61, %v2334_v28  ;;  %5478 = vmatmul.msk.bf16.vlgmr.msrb.gmra.mxu0 %vm2287_vm2, %v7543_v4 }
 0x457   : > { %v7549_v63 = vpop.permute.xlu2 %3443  ;;  %v2404_v43 = vpop.f32.mrf.mxu1  ;;  %3388 = vmatpush.bf16.msra.mxu1 %v3309_v12  ;;  %3555 = vmatpush.bf16.msrb.mxu0 %v3481_v32 }
 0x458   : > { %5438 = vmatmul.msk.bf16.gmra.mxu3 %vm2287_vm2, %v7439_v60  ;;  %v2405_v58 = vadd.f32 %v2404_v43, %v7415_v14  ;;  %v3440_v38 = vpop.permute.xlu0 %3439 }
 0x459   : > { %v3455_v39 = vsel %vm1790_vm15, %v3440_v38, %v7547_v42  ;;  %v3477_v30 = vsel %vm1790_vm15, %v7549_v63, %v3440_v38 }
 0x45a   : > { %v2339_v60 = vpop.f32.mrf.mxu3  ;;  %3510 = vmatpush.bf16.msrb.mxu2 %v3455_v39 }
 0x45b   : > { %v2557_v56 = vpop.f32.mrf.mxu0  ;;  %3389 = vmatpush.bf16.msra.mxu1 %v3305_v11  ;;  %3556 = vmatpush.bf16.msrb.mxu0 %v3477_v30 }
 0x45c   : > { %v7570_v44 = vadd.f32 %v2557_v56, %v2405_v58  ;;  %v3458_v58 = vsel %vm1790_vm15, %v7511_v36, %v7526_v25 }
 0x45d   : > { %v7572_v34 = vpop.permute.xlu1 %3435  ;;  %v2427_v14 = vpop.f32.mrf.mxu2 }
 0x45e   : > { %v7574_v57 = vadd.f32 %v2427_v14, %v2336_v50  ;;  %v3156_v50 = vunpack.c.l.b16 %v5469_v52  ;;  %v5491_v52 = vld [vmem:[%s8757_s4 + $0x9c] sm:$0x3] }
 0x45f   : > { %v2407_v13 = vpop.f32.mrf.mxu1  ;;  %v3438_v27 = vpop.permute.xlu2 %3437  ;;  %3390 = vmatpush.bf16.msra.mxu1 %v3301_v41 }
 0x460   : > { %v2408_v21 = vadd.f32 %v2407_v13, %v7430_v31  ;;  %v3434_v35 = vpop.permute.xlu0 %3433  ;;  %v7594_v31 = vld [vmem:[%s8757_s4 + $0x80] sm:$0xff]  ;;  %v7615_v26 = vpack.c.b16 %v3156_v50, %v3156_v50  ;;  %v3454_v56 = vsel %vm1790_vm15, %v7572_v34, %v3438_v27 }
 0x461   : > { %v3453_v24 = vsel %vm1790_vm15, %v3434_v35, %v7572_v34  ;;  %v3473_v54 = vsel %vm1790_vm15, %v3438_v27, %v3434_v35 }
 0x462   : > { %v2341_v20 = vpop.f32.mrf.mxu3  ;;  %3511 = vmatpush.bf16.msrb.mxu2 %v3453_v24  ;;  %3557 = vmatpush.bf16.msrb.mxu0 %v3473_v54 }
 0x463   : > { %5457 = vmatmul.msk.bf16.gmra.mxu1 %vm2287_vm2, %v7581_v0  ;;  %5460 = vmatmul.msk.bf16.gmra.mxu2 %vm2287_vm2, %v7581_v0  ;;  %v2560_v5 = vpop.f32.mrf.mxu0 }
 0x464   : > { %v7596_v16 = vadd.f32 %v2560_v5, %v2408_v21 }
 0x465   : > { %v2430_v19 = vpop.f32.mrf.mxu2 }
 0x466   : > { %v3430_v49 = vpop.permute.xlu1 %3429  ;;  %v7598_v7 = vadd.f32 %v2430_v19, %v2339_v60  ;;  %5479 = vmatmul.msk.bf16.gmra.mxu0 %vm2287_vm2, %v7594_v31 }
 0x467   : > { %v2409_v28 = vpop.f32.mrf.mxu1  ;;  %v3432_v47 = vpop.permute.xlu2 %3431 }
 0x468   : > { %5439 = vmatmul.msk.bf16.gmra.mxu3 %vm2287_vm2, %v7476_v23 }
 0x46a   : > { %v2443_v9 = vpop.f32.mrf.mxu3 }
 0x46b   : > { %v2562_v40 = vpop.f32.mrf.mxu0  ;;  %v2444_v32 = vadd.f32 %v2443_v9, %v7369_v22  ;;  %v3456_v22 = vsel %vm1790_vm15, %v7547_v42, %v7549_v63  ;;  %v5610_v42 = vld [vmem:[%s8757_s4 + $0x8c] sm:$0xff] }
 0x46d   : > { %v2432_v46 = vpop.f32.mrf.mxu2 }
 0x46e   : > { %v3428_v33 = vpop.permute.xlu1 %3427 }
 0x46f   : > { %v3451_v23 = vsel %vm1790_vm15, %v3428_v33, %v3430_v49  ;;  %v3469_v8 = vsel %vm1790_vm15, %v3432_v47, %v3428_v33  ;;  %v2573_v3 = vpop.f32.mrf.mxu1 }
 0x470   : > { %3512 = vmatpush.bf16.msrb.mxu2 %v3451_v23  ;;  %3558 = vmatpush.bf16.msrb.mxu0 %v3469_v8  ;;  %v2611_v53 = vadd.f32 %v2573_v3, %v7487_v6 }
 0x472   : > { %v2445_v62 = vpop.f32.mrf.mxu3 }
 0x473   : > { %5458 = vmatmul.msk.bf16.gmra.mxu1 %vm2287_vm2, %v2991_v1  ;;  %5461 = vmatmul.msk.bf16.gmra.mxu2 %vm2287_vm2, %v2991_v1  ;;  %v2741_v61 = vpop.f32.mrf.mxu0  ;;  %v2446_v36 = vadd.f32 %v2445_v62, %v7397_v29  ;;  %v3452_v29 = vsel %vm1790_vm15, %v3430_v49, %v3432_v47  ;;  %vm3683_vm15 = vcmask 293888  }
 0x474   : > { %v7618_v12 = vadd.f32 %v2741_v61, %v2611_v53 }
 0x475   : > { %v2596_v43 = vpop.f32.mrf.mxu2 }
 0x476   : > { %v2612_v38 = vadd.f32 %v2596_v43, %v2444_v32  ;;  %5480 = vmatmul.msk.bf16.gmra.mxu0 %vm2287_vm2, %v7615_v26 }
 0x477   : > { %v2575_v6 = vpop.f32.mrf.mxu1 }
 0x478   : > { %5462 = vmatmul.msk.bf16.vlgmr.msrb.gmra.mxu3 %vm2287_vm2, %v7520_v59  ;;  %v2614_v39 = vadd.f32 %v2575_v6, %v7513_v45 }
 0x479   : > { %3532 = vmatpush.bf16.msrb.mxu3 %v3458_v58 }
 0x47b   : > { %v2448_v30 = vpop.f32.mrf.mxu3  ;;  %v2743_v60 = vpop.f32.mrf.mxu0 }
 0x47c   : > { %v7632_v25 = vadd.f32 %v2743_v60, %v2614_v39  ;;  %v2449_v34 = vadd.f32 %v2448_v30, %v7422_v10 }
 0x47d   : > { %3533 = vmatpush.bf16.msrb.mxu3 %v3456_v22  ;;  %v2598_v11 = vpop.f32.mrf.mxu2 }
 0x47e   : > { %v7634_v59 = vadd.f32 %v2598_v11, %v2446_v36 }
 0x47f   : > { %v2578_v14 = vpop.f32.mrf.mxu1 }
 0x480   : > { %v2617_v45 = vadd.f32 %v2578_v14, %v7551_v48 }
 0x481   : > { %3534 = vmatpush.bf16.msrb.mxu3 %v3454_v56 }
 0x483   : > { %v2450_v41 = vpop.f32.mrf.mxu3  ;;  %5481 = vmatmul.msk.bf16.vlgmr.msrb.gmra.mxu1 %vm2287_vm2, %v7543_v4  ;;  %5484 = vmatmul.msk.bf16.vlgmr.msra.gmra.mxu2 %vm2287_vm2, %v7543_v4  ;;  %v2746_v63 = vpop.f32.mrf.mxu0 }
 0x484   : > { %v7648_v13 = vadd.f32 %v2746_v63, %v2617_v45  ;;  %v2451_v54 = vadd.f32 %v2450_v41, %v7432_v2 }
 0x485   : > { %3535 = vmatpush.bf16.msrb.mxu3 %v3452_v29  ;;  %v5613_v29 = vld [vmem:[%s8757_s4 + $0xa8] sm:$0xff] }
 0x486   : > { %v2601_v48 = vpop.f32.mrf.mxu2  ;;  %5503 = vmatmul.msk.bf16.vlgmr.msra.gmra.mxu0 %vm2287_vm2, %v5610_v42 }
 0x487   : > { %v2618_v27 = vadd.f32 %v2601_v48, %v2449_v34  ;;  %v2580_v4 = vpop.f32.mrf.mxu1 }
 0x488   : > { %5463 = vmatmul.msk.bf16.gmra.mxu3 %vm2287_vm2, %v7581_v0  ;;  %v2620_v21 = vadd.f32 %v2580_v4, %v7574_v57  ;;  %v5611_v57 = vld [vmem:[%s8757_s4 + $0x94] sm:$0xff] }
 0x48b   : > { %v2453_v35 = vpop.f32.mrf.mxu3  ;;  %v2748_v24 = vpop.f32.mrf.mxu0 }
 0x48c   : > { %v7655_v20 = vadd.f32 %v2748_v24, %v2620_v21  ;;  %v2454_v0 = vadd.f32 %v2453_v35, %v7449_v18  ;;  %v3324_v18 = vunpack.c.l.b16 %v5491_v52  ;;  %v5513_v21 = vld [vmem:[%s8757_s4 + $0xb0] sm:$0x3] }
 0x48e   : > { %v2603_v5 = vpop.f32.mrf.mxu2 }
 0x48f   : > { %v7657_v10 = vadd.f32 %v2603_v5, %v2451_v54  ;;  %v2583_v49 = vpop.f32.mrf.mxu1  ;;  %v3492_v54 = vunpack.c.l.b16 %v5513_v21 }
 0x490   : > { %v2623_v19 = vadd.f32 %v2583_v49, %v7598_v7 }
 0x493   : > { %v2455_v28 = vpop.f32.mrf.mxu3  ;;  %5482 = vmatmul.msk.bf16.gmra.mxu1 %vm2287_vm2, %v7594_v31  ;;  %5485 = vmatmul.msk.bf16.gmra.mxu2 %vm2287_vm2, %v7594_v31  ;;  %v2751_v2 = vpop.f32.mrf.mxu0 }
 0x494   : > { %v7668_v55 = vadd.f32 %v2751_v2, %v2623_v19  ;;  %v3495_v28 = vpack.c.b16 %v3492_v54, %v3492_v54 }
 0x496   : > { %v2606_v9 = vpop.f32.mrf.mxu2  ;;  %5504 = vmatmul.msk.bf16.gmra.mxu0 %vm2287_vm2, %v5611_v57 }
 0x497   : > { %v2624_v40 = vadd.f32 %v2606_v9, %v2454_v0  ;;  %v2585_v7 = vpop.f32.mrf.mxu1 }
 0x498   : > { %5464 = vmatmul.msk.bf16.gmra.mxu3 %vm2287_vm2, %v2991_v1 }
 0x49b   : > { %v2718_v17 = vpop.f32.mrf.mxu3  ;;  %v2753_v31 = vpop.f32.mrf.mxu0 }
 0x49c   : > { %v2778_v47 = vadd.f32 %v2718_v17, %v7483_v15  ;;  %v3327_v15 = vpack.c.b16 %v3324_v18, %v3324_v18 }
 0x49e   : > { %v2608_v33 = vpop.f32.mrf.mxu2 }
 0x49f   : > { %v2764_v46 = vpop.f32.mrf.mxu1 }
 0x4a0   : > { %v2780_v23 = vadd.f32 %v2764_v46, %v2612_v38 }
 0x4a3   : > { %v2720_v8 = vpop.f32.mrf.mxu3  ;;  %5483 = vmatmul.msk.bf16.gmra.mxu1 %vm2287_vm2, %v7615_v26  ;;  %5486 = vmatmul.msk.bf16.gmra.mxu2 %vm2287_vm2, %v7615_v26  ;;  %v2888_v1 = vpop.f32.mrf.mxu0  ;;  %v5612_v26 = vld [vmem:[%s8757_s4 + $0xa0] sm:$0xff] }
 0x4a4   : > { %v7677_v3 = vadd.f32 %v2720_v8, %v7507_v51  ;;  %v7683_v50 = vadd.f32 %v2888_v1, %v2780_v23 }
 0x4a6   : > { %v2842_v53 = vpop.f32.mrf.mxu2  ;;  %5505 = vmatmul.msk.bf16.gmra.mxu0 %vm2287_vm2, %v3327_v15 }
 0x4a7   : > { %v2902_v62 = vadd.f32 %v2842_v53, %v2778_v47  ;;  %v7687_v61 = vpop.f32.mrf.mxu1 }
 0x4a8   : > { %5500 = vmatmul.msk.bf16.vlgmr.msra.gmra.mxu3 %vm2287_vm2, %v5610_v42 }
 0x4ab   : > { %v2723_v51 = vpop.f32.mrf.mxu3  ;;  %v7690_v43 = vpop.f32.mrf.mxu0 }
 0x4ac   : > { %v2784_v32 = vadd.f32 %v2723_v51, %v7545_v37 }
 0x4ae   : > { %v2844_v58 = vpop.f32.mrf.mxu2 }
 0x4af   : > { %v2769_v38 = vpop.f32.mrf.mxu1  ;;  %v2905_v17 = vadd.f32 %v2844_v58, %v7677_v3 }
 0x4b0   : > { %v2786_v6 = vadd.f32 %v2769_v38, %v2618_v27 }
 0x4b3   : > { %v2725_v39 = vpop.f32.mrf.mxu3  ;;  %5506 = vmatmul.msk.bf16.vlgmr.msra.gmra.mxu1 %vm2287_vm2, %v5610_v42  ;;  %5522 = vmatmul.msk.bf16.vlgmr.msrb.gmra.mxu2 %vm2287_vm2, %v5612_v26  ;;  %v2893_v22 = vpop.f32.mrf.mxu0 }
 0x4b4   : > { %v2787_v30 = vadd.f32 %v2725_v39, %v7570_v44  ;;  %v7698_v60 = vadd.f32 %v2893_v22, %v2786_v6 }
 0x4b6   : > { %v2847_v37 = vpop.f32.mrf.mxu2  ;;  %5528 = vmatmul.msk.bf16.vlgmr.msrb.gmra.mxu0 %vm2287_vm2, %v5612_v26 }
 0x4b7   : > { %v2908_v36 = vadd.f32 %v2847_v37, %v2784_v32  ;;  %v7702_v11 = vpop.f32.mrf.mxu1 }
 0x4b8   : > { %5501 = vmatmul.msk.bf16.gmra.mxu3 %vm2287_vm2, %v5611_v57 }
 0x4bb   : > { %v2728_v56 = vpop.f32.mrf.mxu3  ;;  %v7705_v45 = vpop.f32.mrf.mxu0 }
 0x4bc   : > { %v2790_v14 = vadd.f32 %v2728_v56, %v7596_v16 }
 0x4be   : > { %v2849_v44 = vpop.f32.mrf.mxu2 }
 0x4bf   : > { %v2774_v41 = vpop.f32.mrf.mxu1  ;;  %v2911_v3 = vadd.f32 %v2849_v44, %v2787_v30 }
 0x4c0   : > { %v2792_v42 = vadd.f32 %v2774_v41, %v2624_v40 }
 0x4c3   : > { %v2730_v63 = vpop.f32.mrf.mxu3  ;;  %5507 = vmatmul.msk.bf16.gmra.mxu1 %vm2287_vm2, %v5611_v57  ;;  %5523 = vmatmul.msk.bf16.gmra.mxu2 %vm2287_vm2, %v5613_v29  ;;  %v2898_v34 = vpop.f32.mrf.mxu0 }
 0x4c4   : > { %v7712_v48 = vadd.f32 %v2898_v34, %v2792_v42 }
 0x4c6   : > { %v2852_v27 = vpop.f32.mrf.mxu2  ;;  %5529 = vmatmul.msk.bf16.gmra.mxu0 %vm2287_vm2, %v5613_v29 }
 0x4c7   : > { %v2914_v4 = vadd.f32 %v2852_v27, %v2790_v14  ;;  %v2776_v16 = vpop.f32.mrf.mxu1 }
 0x4c8   : > { %5502 = vmatmul.msk.bf16.gmra.mxu3 %vm2287_vm2, %v3327_v15 }
 0x4cb   : > { %v2865_v35 = vpop.f32.mrf.mxu3  ;;  %v2900_v5 = vpop.f32.mrf.mxu0 }
 0x4cc   : > { %v2903_v24 = vadd.f32 %v2865_v35, %v7618_v12 }
 0x4ce   : > { %v2854_v49 = vpop.f32.mrf.mxu2 }
 0x4cf   : > { %v3010_v19 = vpop.f32.mrf.mxu1 }
 0x4d0   : > { %v3070_v57 = vadd.f32 %v3010_v19, %v2902_v62 }
 0x4d3   : > { %v2867_v2 = vpop.f32.mrf.mxu3  ;;  %5508 = vmatmul.msk.bf16.gmra.mxu1 %vm2287_vm2, %v3327_v15  ;;  %5524 = vmatmul.msk.bf16.gmra.mxu2 %vm2287_vm2, %v3495_v28  ;;  %v3178_v0 = vpop.f32.mrf.mxu0 }
 0x4d4   : > { %v7722_v9 = vadd.f32 %v3178_v0, %v3070_v57 }
 0x4d6   : > { %v3033_v40 = vpop.f32.mrf.mxu2  ;;  %5530 = vmatmul.msk.bf16.gmra.mxu0 %vm2287_vm2, %v3495_v28 }
 0x4d7   : > { %v3071_v7 = vadd.f32 %v3033_v40, %v2903_v24  ;;  %v3012_v12 = vpop.f32.mrf.mxu1 }
 0x4d8   : > { %5525 = vmatmul.msk.bf16.vlgmr.msrb.gmra.mxu3 %vm2287_vm2, %v5612_v26  ;;  %v3073_v31 = vadd.f32 %v3012_v12, %v2905_v17 }
 0x4db   : > { %v2870_v47 = vpop.f32.mrf.mxu3  ;;  %v3180_v33 = vpop.f32.mrf.mxu0 }
 0x4dc   : > { %v2909_v52 = vadd.f32 %v2870_v47, %v7648_v13  ;;  %v7728_v46 = vadd.f32 %v3180_v33, %v3073_v31 }
 0x4de   : > { %v3035_v18 = vpop.f32.mrf.mxu2 }
 0x4e0   : > { %v3015_v23 = vpop.f32.mrf.mxu1 }
 0x4e1   : > { %v3076_v8 = vadd.f32 %v3015_v23, %v2908_v36 }
 0x4e3   : > { %v2872_v15 = vpop.f32.mrf.mxu3  ;;  %v3183_v1 = vpop.f32.mrf.mxu0 }
 0x4e4   : > { %v7730_v53 = vadd.f32 %v3183_v1, %v3076_v8  ;;  %v2912_v6 = vadd.f32 %v2872_v15, %v7655_v20 }
 0x4e6   : > { %v3038_v62 = vpop.f32.mrf.mxu2 }
 0x4e7   : > { %v3077_v51 = vadd.f32 %v3038_v62, %v2909_v52 }
 0x4e8   : > { %5526 = vmatmul.msk.bf16.gmra.mxu3 %vm2287_vm2, %v5613_v29  ;;  %v3017_v32 = vpop.f32.mrf.mxu1 }
 0x4e9   : > { %v3079_v38 = vadd.f32 %v3017_v32, %v2911_v3 }
 0x4eb   : > { %v2875_v58 = vpop.f32.mrf.mxu3  ;;  %v3185_v26 = vpop.f32.mrf.mxu0 }
 0x4ec   : > { %v2915_v13 = vadd.f32 %v2875_v58, %v7668_v55  ;;  %v7735_v39 = vadd.f32 %v3185_v26, %v3079_v38 }
 0x4ee   : > { %v3040_v22 = vpop.f32.mrf.mxu2 }
 0x4ef   : > { %v3080_v37 = vadd.f32 %v3040_v22, %v2912_v6 }
 0x4f0   : > { %v3020_v36 = vpop.f32.mrf.mxu1 }
 0x4f1   : > { %v3082_v56 = vadd.f32 %v3020_v36, %v2914_v4  ;;  %v2906_v4 = vadd.f32 %v2867_v2, %v7632_v25  ;;  %v2789_v2 = vadd.f32 %v7702_v11, %v7657_v10 }
 0x4f3   : > { %v2877_v14 = vpop.f32.mrf.mxu3  ;;  %v3188_v41 = vpop.f32.mrf.mxu0  ;;  %v3074_v5 = vadd.f32 %v3035_v18, %v2906_v4  ;;  %v2913_v52 = vadd.f32 %v7705_v45, %v2789_v2 }
 0x4f4   : > { %v7737_v42 = vadd.f32 %v3188_v41, %v3082_v56  ;;  %v7765_v56 = vpop.permute.xlu0 %3606 }
 0x4f6   : > { %v3043_v29 = vpop.f32.mrf.mxu2 }
 0x4f7   : > { %v3083_v63 = vadd.f32 %v3043_v29, %v2915_v13 }
 0x4f8   : > { %5527 = vmatmul.msk.bf16.gmra.mxu3 %vm2287_vm2, %v3495_v28  ;;  %v3022_v30 = vpop.f32.mrf.mxu1  ;;  %v2783_v28 = vadd.f32 %v7687_v61, %v7634_v59  ;;  %vm4272_vm2 = vcmask 1044484  }
 0x4fb   : > { %v3056_v44 = vpop.f32.mrf.mxu3  ;;  %v3190_v34 = vpop.f32.mrf.mxu0 }
 0x4fc   : > { %v3072_v55 = vadd.f32 %v3056_v44, %v7683_v50  ;;  %v2907_v50 = vadd.f32 %v7690_v43, %v2783_v28 }
 0x4fe   : > { %v3045_v20 = vpop.f32.mrf.mxu2 }
 0x500   : > { %v3201_v27 = vpop.f32.mrf.mxu1 }
 0x501   : > { %v3239_v16 = vadd.f32 %v3201_v27, %v3071_v7 }
 0x503   : > { %v3058_v21 = vpop.f32.mrf.mxu3  ;;  %v3369_v35 = vpop.f32.mrf.mxu0 }
 0x504   : > { %v7742_v24 = vadd.f32 %v3369_v35, %v3239_v16  ;;  %v3075_v12 = vadd.f32 %v3058_v21, %v2907_v50 }
 0x506   : > { %v3224_v54 = vpop.f32.mrf.mxu2 }
 0x507   : > { %v3240_v49 = vadd.f32 %v3224_v54, %v3072_v55  ;;  %v7772_v54 = vpop.permute.xlu0 %3601 }
 0x508   : > { %v3203_v19 = vpop.f32.mrf.mxu1 }
 0x509   : > { %v3242_v57 = vadd.f32 %v3203_v19, %v3074_v5 }
 0x50b   : > { %v3061_v0 = vpop.f32.mrf.mxu3  ;;  %v3371_v7 = vpop.f32.mrf.mxu0 }
 0x50c   : > { %v3078_v40 = vadd.f32 %v3061_v0, %v7698_v60  ;;  %v7748_v17 = vadd.f32 %v3371_v7, %v3242_v57 }
 0x50e   : > { %v3226_v25 = vpop.f32.mrf.mxu2 }
 0x50f   : > { %v3243_v47 = vadd.f32 %v3226_v25, %v3075_v12 }
 0x510   : > { %v3206_v31 = vpop.f32.mrf.mxu1 }
 0x511   : > { %v3245_v33 = vadd.f32 %v3206_v31, %v3077_v51 }
 0x513   : > { %v3063_v59 = vpop.f32.mrf.mxu3  ;;  %v3374_v18 = vpop.f32.mrf.mxu0 }
 0x514   : > { %v3081_v61 = vadd.f32 %v3063_v59, %v2913_v52  ;;  %v7753_v23 = vadd.f32 %v3374_v18, %v3245_v33 }
 0x516   : > { %v3229_v43 = vpop.f32.mrf.mxu2 }
 0x517   : > { %v3246_v50 = vadd.f32 %v3229_v43, %v3078_v40 }
 0x518   : > { %v3208_v60 = vpop.f32.mrf.mxu1 }
 0x519   : > { %v3248_v8 = vadd.f32 %v3208_v60, %v3080_v37  ;;  %v7763_v37 = vpop.permute.xlu2 %3616 }
 0x51b   : > { %v7755_v15 = vpop.f32.mrf.mxu3  ;;  %v3376_v1 = vpop.f32.mrf.mxu0 }
 0x51c   : > { %v7757_v62 = vadd.f32 %v3376_v1, %v3248_v8 }
 0x51e   : > { %v3231_v32 = vpop.f32.mrf.mxu2 }
 0x51f   : > { %v3249_v60 = vadd.f32 %v3231_v32, %v3081_v61  ;;  %v3084_v61 = vadd.f32 %v7755_v15, %v7712_v48 }
 0x520   : > { %v3211_v10 = vpop.f32.mrf.mxu1 }
 0x521   : > { %v3251_v11 = vadd.f32 %v3211_v10, %v3083_v63  ;;  %v7768_v20 = vpop.permute.xlu2 %3596 }
 0x523   : > { %v3068_v3 = vpop.f32.mrf.mxu3  ;;  %v3379_v58 = vpop.f32.mrf.mxu0 }
 0x524   : > { %v7759_v45 = vadd.f32 %v3379_v58, %v3251_v11  ;;  %v7792_v58 = vpop.permute.xlu1 %3611 }
 0x526   : > { %v7761_v51 = vpop.f32.mrf.mxu2 }
 0x528   : > { %v3213_v38 = vpop.f32.mrf.mxu1 }
 0x52b   : > { %v3346_v13 = vpop.f32.mrf.mxu3  ;;  %v3381_v26 = vpop.f32.mrf.mxu0 }
 0x52c   : > { %v3406_v63 = vadd.f32 %v3346_v13, %v7722_v9 }
 0x52e   : > { %v3236_v6 = vpop.f32.mrf.mxu2 }
 0x530   : > { %v3392_v22 = vpop.f32.mrf.mxu1 }
 0x531   : > { %v3408_v41 = vadd.f32 %v3392_v22, %v3240_v49  ;;  %v3252_v22 = vadd.f32 %v7761_v51, %v3084_v61 }
 0x533   : > { %v3348_v36 = vpop.f32.mrf.mxu3  ;;  %v3560_v14 = vpop.f32.mrf.mxu0 }
 0x534   : > { %v3576_v30 = vadd.f32 %v3560_v14, %v3408_v41  ;;  %v3409_v35 = vadd.f32 %v3348_v36, %v7728_v46 }
 0x536   : > { %v3514_v29 = vpop.f32.mrf.mxu2  ;;  %v3621_v16 = vadd.f32 %v7768_v20, %v3576_v30 }
 0x537   : > { %v3574_v55 = vadd.f32 %v3514_v29, %v3406_v63 }
 0x538   : > { %v3394_v44 = vpop.f32.mrf.mxu1  ;;  %5688 = vtanh.f32 %v3621_v16 }
 0x539   : > { %v3411_v27 = vadd.f32 %v3394_v44, %v3243_v47  ;;  %v3619_v5 = vadd.f32 %v7768_v20, %v3574_v55 }
 0x53b   : > { %v3351_v34 = vpop.f32.mrf.mxu3  ;;  %v3562_v21 = vpop.f32.mrf.mxu0 }
 0x53c   : > { %v3579_v4 = vadd.f32 %v3562_v21, %v3411_v27  ;;  %v3412_v31 = vadd.f32 %v3351_v34, %v7730_v53 }
 0x53e   : > { %v3516_v49 = vpop.f32.mrf.mxu2  ;;  %v3624_v9 = vadd.f32 %v7772_v54, %v3579_v4  ;;  %v7777_v46 = vpop.eup %5688 }
 0x53f   : > { %v3577_v19 = vadd.f32 %v3516_v49, %v3409_v35 }
 0x540   : > { %v3397_v28 = vpop.f32.mrf.mxu1  ;;  %5690 = vtanh.f32 %v3624_v9 }
 0x541   : > { %v3622_v57 = vadd.f32 %v7772_v54, %v3577_v19  ;;  %5692 = vtanh.f32 %v3619_v5  ;;  %v3414_v12 = vadd.f32 %v3397_v28, %v3246_v50 }
 0x543   : > { %v3353_v0 = vpop.f32.mrf.mxu3  ;;  %5694 = vtanh.f32 %v3622_v57  ;;  %v3565_v7 = vpop.f32.mrf.mxu0 }
 0x544   : > { %v3582_v52 = vadd.f32 %v3565_v7, %v3414_v12  ;;  %v3415_v3 = vadd.f32 %v3353_v0, %v7735_v39 }
 0x546   : > { %v3519_v25 = vpop.f32.mrf.mxu2  ;;  %v7779_v2 = vpop.eup %5690  ;;  %v3627_v10 = vadd.f32 %v7765_v56, %v3582_v52 }
 0x547   : > { %v7781_v47 = vpop.eup %5692  ;;  %v3651_v59 = vpack.c.bf16 %v7779_v2, %v7777_v46  ;;  %v3580_v40 = vadd.f32 %v3519_v25, %v3412_v31  ;;  %v5615_v2 = vld [vmem:[%s8759_s6 + $0x8] sm:$0xff] }
 0x548   : > { %v3399_v33 = vpop.f32.mrf.mxu1  ;;  %5696 = vtanh.f32 %v3627_v10 }
 0x549   : > { %v7786_v18 = vpop.eup %5694  ;;  %v3417_v1 = vadd.f32 %v3399_v33, %v3249_v60  ;;  %v3625_v38 = vadd.f32 %v7765_v56, %v3580_v40 }
 0x54a   : > { %v3649_v8 = vpack.c.bf16 %v7786_v18, %v7781_v47 }
 0x54b   : > { %v3356_v43 = vpop.f32.mrf.mxu3  ;;  %v3567_v11 = vpop.f32.mrf.mxu0 }
 0x54c   : > { %v3585_v53 = vadd.f32 %v3567_v11, %v3417_v1  ;;  %v3418_v29 = vadd.f32 %v3356_v43, %v7737_v42 }
 0x54e   : > { %v3521_v13 = vpop.f32.mrf.mxu2  ;;  %v3630_v32 = vadd.f32 %v7792_v58, %v3585_v53  ;;  %v5697_v30 = vpop.eup %5696 }
 0x54f   : > { %v3583_v26 = vadd.f32 %v3521_v13, %v3415_v3  ;;  %v8897_v13 = vld [vmem:[#allocation5_spill] sm:$0xff] }
 0x550   : > { %v3402_v6 = vpop.f32.mrf.mxu1  ;;  %5698 = vtanh.f32 %v3630_v32  ;;  %v7847_v61 = vrot.slane %v8897_v13, 2  ;;  %v8899_v32 = vld [vmem:[#allocation6_spill] sm:$0xff] }
 0x551   : > { %v3628_v36 = vadd.f32 %v7792_v58, %v3583_v26  ;;  %5700 = vtanh.f32 %v3625_v38  ;;  %v3420_v14 = vadd.f32 %v3402_v6, %v3252_v22  ;;  %v7850_v26 = vrot.slane %v8899_v32, 3  ;;  %v8901_v6 = vld [vmem:[#allocation3_spill] sm:$0xff]  ;;  %v8944_v32 = vld [vmem:[#allocation33_spill] sm:$0xff] }
 0x552   : > { %8898 = vst [vmem:[#allocation37_spill] sm:$0xff] %v7847_v61  ;;  %v3870_v22 = vperm.slane %v8901_v6, 0 }
 0x553   : > { %v3358_v39 = vpop.f32.mrf.mxu3  ;;  %5702 = vtanh.f32 %v3628_v36  ;;  %v3570_v41 = vpop.f32.mrf.mxu0  ;;  %8900 = vst [vmem:[#allocation39_spill] sm:$0xff] %v7850_v26  ;;  %v8927_v36 = vld [vmem:[#allocation24_spill] sm:$0xff] }
 0x554   : > { %v3588_v63 = vadd.f32 %v3570_v41, %v3420_v14  ;;  %v8775_v39 = vperm.slane %v8901_v6, 2 }
 0x556   : > { %v3524_v48 = vpop.f32.mrf.mxu2  ;;  %v5699_v15 = vpop.eup %5698  ;;  %v3633_v44 = vadd.f32 %v7763_v37, %v3588_v63 }
 0x557   : > { %v3586_v55 = vadd.f32 %v3524_v48, %v3418_v29  ;;  %v5701_v34 = vpop.eup %5700  ;;  %v3654_v27 = vpack.c.bf16 %v5699_v15, %v5697_v30  ;;  %v8902_v29 = vld [vmem:[#allocation8_spill] sm:$0xff]  ;;  %v8774_v48 = vperm.slane %v7847_v61, 0  ;;  %v8943_v15 = vld [vmem:[#allocation2_spill] sm:$0xff] }
 0x558   : > { %v3404_v51 = vpop.f32.mrf.mxu1  ;;  %5704 = vtanh.f32 %v3633_v44  ;;  %v7858_v63 = vrot.slane %v8902_v29, 1  ;;  %v8904_v44 = vld [vmem:[#allocation9_spill] sm:$0xff]  ;;  %v8941_v29 = vld [vmem:[#allocation32_spill] sm:$0xff] }
 0x559   : > { %v5703_v16 = vpop.eup %5702  ;;  %v3631_v21 = vadd.f32 %v7763_v37, %v3586_v55  ;;  %v7864_v55 = vrot.slane %v8904_v44, 2  ;;  %v8920_v44 = vld [vmem:[#allocation20_spill] sm:$0xff]  ;;  %v8931_v51 = vld [vmem:[#allocation26_spill] sm:$0xff] }
 0x55a   : > { %v3652_v4 = vpack.c.bf16 %v5703_v16, %v5701_v34  ;;  %8903 = vst [vmem:[#allocation40_spill] sm:$0xff] %v7858_v63  ;;  %v8906_v16 = vld [vmem:[#allocation10_spill] sm:$0xff] }
 0x55b   : > { %v3537_v35 = vpop.f32.mrf.mxu3  ;;  %5706 = vtanh.f32 %v3631_v21  ;;  %v3572_v5 = vpop.f32.mrf.mxu0  ;;  %8905 = vst [vmem:[#allocation36_spill] sm:$0xff] %v7864_v55  ;;  %v7870_v21 = vrot.slane %v8906_v16, 3  ;;  %v7920_v16 = vrot.slane %v8920_v44, 1  ;;  %v8937_v44 = vld [vmem:[#allocation30_spill] sm:$0xff] }
 0x55c   : > { %v3575_v42 = vadd.f32 %v3537_v35, %v7742_v24 }
 0x55d   : > { %8907 = vst [vmem:[#allocation38_spill] sm:$0xff] %v7870_v21 }
 0x55e   : > { %v3526_v49 = vpop.f32.mrf.mxu2  ;;  %v5705_v9 = vpop.eup %5704  ;;  %v3620_v0 = vadd.f32 %v7768_v20, %v3575_v42  ;;  %v5614_v20 = vld [vmem:[%s8759_s6] sm:$0xff]  ;;  %8921 = vst [vmem:[#allocation6_spill] sm:$0xff] %v7920_v16 }
 0x55f   : > { %v3657_v19 = vpack.c.bf16 %v5705_v9, %v5705_v9  ;;  %v3818_v9 = vperm.slane %v7858_v63, 0  ;;  %v8929_v42 = vld [vmem:[#allocation25_spill] sm:$0xff] }
 0x560   : > { %5708 = vtanh.f32 %v3620_v0 }
 0x561   : > { %v5707_v28 = vpop.eup %5706  ;;  %v3703_v7 = vsel %vm443_vm1, %v3657_v19, 0  ;;  %v8935_v19 = vld [vmem:[#allocation29_spill] sm:$0xff] }
 0x562   : > { %v3655_v57 = vpack.c.bf16 %v5707_v28, %v5707_v28  ;;  %3766 = vmatpush.bf16.msra.mxu3 %v3703_v7  ;;  %v3820_v28 = vperm.slane %v7858_v63, 2  ;;  %v7942_v7 = vrot.slane %v8927_v36, 1  ;;  %v7961_v13 = vrot.slane %v8935_v19, 2  ;;  %v8946_v36 = vld [vmem:[#allocation34_spill] sm:$0xff] }
 0x563   : > { %v3539_v50 = vpop.f32.mrf.mxu3 }
 0x564   : > { %v3578_v12 = vadd.f32 %v3539_v50, %v7748_v17  ;;  %v3697_v25 = vsel %vm443_vm1, %v3655_v57, 0  ;;  %v8909_v57 = vld [vmem:[#allocation12_spill] sm:$0xff]  ;;  %v3821_v50 = vperm.slane %v7864_v55, 0  ;;  %8928 = vst [vmem:[#allocation10_spill] sm:$0xff] %v7942_v7 }
 0x565   : > { %3710 = vmatpush.bf16.msrb.mxu1 %v3697_v25  ;;  %v7880_v0 = vrot.slane %v8909_v57, 1  ;;  %v8910_v25 = vld [vmem:[#allocation13_spill] sm:$0xff]  ;;  %v8933_v57 = vld [vmem:[#allocation28_spill] sm:$0xff] }
 0x566   : > { %v3623_v47 = vadd.f32 %v7772_v54, %v3578_v12  ;;  %3767 = vmatpush.bf16.msra.mxu3 %v3654_v27  ;;  %v5709_v17 = vpop.eup %5708  ;;  %v8776_v27 = vperm.slane %v7850_v26, 0  ;;  %v3823_v12 = vperm.slane %v7864_v55, 2 }
 0x568   : > { %5710 = vtanh.f32 %v3623_v47  ;;  %v7886_v47 = vrot.slane %v8910_v25, 2  ;;  %v8939_v25 = vld [vmem:[#allocation23_spill] sm:$0xff] }
 0x569   : > { %3711 = vmatpush.bf16.msrb.mxu1 %v3652_v4  ;;  %v8908_v4 = vld [vmem:[#allocation7_spill] sm:$0xff] }
 0x56a   : > { %3768 = vmatpush.bf16.msra.mxu3 %v3651_v59  ;;  %v3815_v5 = vperm.slane %v8908_v4, 0  ;;  %v3817_v49 = vperm.slane %v8908_v4, 2 }
 0x56b   : > { %v3542_v24 = vpop.f32.mrf.mxu3 }
 0x56c   : > { %v3581_v54 = vadd.f32 %v3542_v24, %v7753_v23  ;;  %v3824_v24 = vperm.slane %v7870_v21, 0 }
 0x56d   : > { %3712 = vmatpush.bf16.msrb.mxu1 %v3649_v8  ;;  %5551 = vmatmul.msk.bf16.vlgmr.msra.gmra.mxu3 %vm3683_vm15, %v5614_v20 }
 0x56e   : > { %v5711_v31 = vpop.eup %5710  ;;  %v3626_v33 = vadd.f32 %v7765_v56, %v3581_v54 }
 0x56f   : > { %v3650_v52 = vpack.c.bf16 %v5711_v31, %v5709_v17  ;;  %v3826_v17 = vperm.slane %v7870_v21, 2  ;;  %v8911_v31 = vld [vmem:[#allocation14_spill] sm:$0xff] }
 0x570   : > { %5543 = vmatmul.msk.bf16.vlgmr.msrb.gmra.mxu1 %vm3683_vm15, %v5614_v20  ;;  %5712 = vtanh.f32 %v3626_v33  ;;  %v7892_v54 = vrot.slane %v8911_v31, 3 }
 0x573   : > { %v3544_v18 = vpop.f32.mrf.mxu3 }
 0x574   : > { %v3584_v60 = vadd.f32 %v3544_v18, %v7757_v62  ;;  %v8926_v18 = vld [vmem:[#allocation19_spill] sm:$0xff] }
 0x576   : > { %v3629_v40 = vadd.f32 %v7792_v58, %v3584_v60  ;;  %v5713_v59 = vpop.eup %5712  ;;  %v8895_v58 = vld [vmem:[#allocation4_spill] sm:$0xff] }
 0x577   : > { %v7844_v38 = vrot.slane %v8895_v58, 1  ;;  %v4257_v58 = vunpack.c.l.bf16 %v8943_v15 }
 0x578   : > { %5714 = vtanh.f32 %v3629_v40  ;;  %v8913_v40 = vld [vmem:[#allocation16_spill] sm:$0xff] }
 0x579   : > { %8896 = vst [vmem:[#allocation35_spill] sm:$0xff] %v7844_v38  ;;  %v8777_v14 = vperm.slane %v7844_v38, 0 }
 0x57b   : > { %v3547_v46 = vpop.f32.mrf.mxu3 }
 0x57c   : > { %v3587_v23 = vadd.f32 %v3547_v46, %v7759_v45  ;;  %v5616_v45 = vld [vmem:[%s8759_s6 + $0x10] sm:$0xff]  ;;  %v7898_v46 = vrot.slane %v8913_v40, 1  ;;  %v8922_v40 = vld [vmem:[#allocation21_spill] sm:$0xff] }
 0x57d   : > { %5552 = vmatmul.msk.bf16.gmra.mxu3 %vm3683_vm15, %v5615_v2 }
 0x57e   : > { %v5715_v43 = vpop.eup %5714  ;;  %v3632_v8 = vadd.f32 %v7763_v37, %v3587_v23  ;;  %v3664_v37 = vld [vmem:[%s8759_s6 + $0x18] sm:$0x7]  ;;  %8914 = vst [vmem:[#allocation41_spill] sm:$0xff] %v7898_v46 }
 0x57f   : > { %v3653_v56 = vpack.c.bf16 %v5715_v43, %v5713_v59  ;;  %v3678_v3 = vunpack.c.l.b16 %v3664_v37  ;;  %v8915_v43 = vld [vmem:[#allocation17_spill] sm:$0xff] }
 0x580   : > { %5716 = vtanh.f32 %v3632_v8  ;;  %5544 = vmatmul.msk.bf16.gmra.mxu1 %vm3683_vm15, %v5615_v2  ;;  %v7904_v8 = vrot.slane %v8915_v43, 2  ;;  %v7926_v43 = vrot.slane %v8922_v40, 2  ;;  %v4258_v40 = vunpack.c.h.bf16 %v8943_v15 }
 0x581   : > { %v3682_v53 = vpack.c.b16 %v3678_v3, %v3678_v3  ;;  %v7993_v3 = vrot.slane %v8944_v32, 2 }
 0x582   : > { %8916 = vst [vmem:[#allocation4_spill] sm:$0xff] %v7904_v8  ;;  %v4263_v59 = vrot.slane %v4258_v40, 1 }
 0x583   : > { %v3549_v62 = vpop.f32.mrf.mxu3  ;;  %8923 = vst [vmem:[#allocation8_spill] sm:$0xff] %v7926_v43 }
 0x584   : > { %v8924_v62 = vld [vmem:[#allocation22_spill] sm:$0xff] }
 0x585   : > { %v7932_v23 = vrot.slane %v8924_v62, 3  ;;  %v7958_v62 = vrot.slane %v8933_v57, 1  ;;  %v7983_v57 = vrot.slane %v8941_v29, 1  ;;  %v7996_v29 = vrot.slane %v8946_v36, 3 }
 0x586   : > { %v5717_v1 = vpop.eup %5716 }
 0x587   : > { %v3656_v10 = vpack.c.bf16 %v5717_v1, %v5717_v1  ;;  %8925 = vst [vmem:[#allocation9_spill] sm:$0xff] %v7932_v23  ;;  %v4261_v1 = vrot.slane %v4257_v58, 3 }
 0x588   : > { %8934 = vst [vmem:[#allocation14_spill] sm:$0xff] %v7958_v62 }
 0x589   : > { %v3700_v11 = vsel %vm443_vm1, %v3656_v10, 0  ;;  %v8917_v10 = vld [vmem:[#allocation18_spill] sm:$0xff]  ;;  %8942 = vst [vmem:[#allocation17_spill] sm:$0xff] %v7983_v57  ;;  %v4267_v32 = vsel %vm3800_vm5, %v4257_v58, %v4261_v1  ;;  %v4264_v34 = vsel %vm3797_vm4, %v4257_v58, %v4261_v1  ;;  %v4276_v37 = vsel %vm3810_vm7, %v4257_v58, %v4261_v1 }
 0x58a   : > { %3738 = vmatpush.bf16.msra.mxu2 %v3700_v11  ;;  %v7910_v11 = vrot.slane %v8917_v10, 3  ;;  %v7954_v10 = vrot.slane %v8931_v51, 3  ;;  %8945 = vst [vmem:[#allocation18_spill] sm:$0xff] %v7993_v3  ;;  %v8972_v57 = vperm.slane %v7850_v26, 2  ;;  %vm4093_vm4 = vcmask 1043456  }
 0x58b   : > { %8947 = vst [vmem:[#allocation20_spill] sm:$0xff] %v7996_v29  ;;  %v8965_v29 = vperm.slane %v7886_v47, 0  ;;  %vm4827_vm5 = vcmask 1045508  }
 0x58c   : > { %8918 = vst [vmem:[#allocation5_spill] sm:$0xff] %v7910_v11 }
 0x58d   : > { %5553 = vmatmul.msk.bf16.gmra.mxu3 %vm3683_vm15, %v5616_v45  ;;  %8932 = vst [vmem:[#allocation13_spill] sm:$0xff] %v7954_v10 }
 0x58e   : > { %3739 = vmatpush.bf16.msra.mxu2 %v3653_v56 }
 0x590   : > { %5545 = vmatmul.msk.bf16.gmra.mxu1 %vm3683_vm15, %v5616_v45 }
 0x592   : > { %3740 = vmatpush.bf16.msra.mxu2 %v3650_v52  ;;  %v8912_v52 = vld [vmem:[#allocation11_spill] sm:$0xff] }
 0x593   : > { %8936 = vst [vmem:[#allocation11_spill] sm:$0xff] %v7961_v13 }
 0x595   : > { %5547 = vmatmul.msk.bf16.vlgmr.msra.gmra.mxu2 %vm3683_vm15, %v5614_v20  ;;  %v7948_v20 = vrot.slane %v8929_v42, 2  ;;  %v7964_v42 = vrot.slane %v8937_v44, 3  ;;  %v4262_v44 = vrot.slane %v4258_v40, 6 }
 0x597   : > { %8930 = vst [vmem:[#allocation12_spill] sm:$0xff] %v7948_v20  ;;  %v4268_v36 = vsel %vm3810_vm7, %v4262_v44, %v4263_v59  ;;  %v4273_v19 = vsel %vm4272_vm2, %v4262_v44, %v4263_v59  ;;  %v4265_v30 = vsel %vm3805_vm6, %v4262_v44, %v4263_v59  ;;  %v4278_v56 = vsel %vm4277_vm3, %v4262_v44, %v4263_v59 }
 0x598   : > { %8938 = vst [vmem:[#allocation16_spill] sm:$0xff] %v7964_v42  ;;  %v8057_v33 = vsel %vm443_vm1, %v4264_v34, %v4265_v30  ;;  %v4279_v51 = vsel %vm3812_vm10, %v4276_v37, %v4278_v56  ;;  %v8953_v56 = vperm.slane %v7844_v38, 2  ;;  %v8955_v37 = vperm.slane %v7847_v61, 2 }
 0x599   : > { %v8984_v42 = vperm.slane %v7904_v8, 0 }
 0x59d   : > { %5554 = vmatmul.msk.bf16.gmra.mxu3 %vm3683_vm15, %v3682_v53 }
 0x5a0   : > { %5546 = vmatmul.msk.bf16.gmra.mxu1 %vm3683_vm15, %v3682_v53 }
 0x5a5   : > { %5548 = vmatmul.msk.bf16.gmra.mxu2 %vm3683_vm15, %v5615_v2  ;;  %v4269_v2 = vsel %vm3802_vm8, %v4267_v32, %v4268_v36 }
 0x5a6   : > { %v8050_v59 = vrot.slane %v4269_v2, 1 }
 0x5b5   : > { %5549 = vmatmul.msk.bf16.gmra.mxu2 %vm3683_vm15, %v5616_v45  ;;  %v4271_v45 = vsel %vm3805_vm6, %v4257_v58, %v4261_v1  ;;  %v8962_v58 = vperm.slane %v7850_v26, 0  ;;  %vm4824_vm6 = vcmask 1045506  }
 0x5b6   : > { %v4274_v41 = vsel %vm3807_vm9, %v4271_v45, %v4273_v19 }
 0x5c5   : > { %5550 = vmatmul.msk.bf16.gmra.mxu2 %vm3683_vm15, %v3682_v53  ;;  %v8919_v53 = vld [vmem:[#allocation15_spill] sm:$0xff] }
 0x5ed   : > { %v3714_v35 = vpop.f32.mrf.mxu1 }
 0x5ee   : > { %v8020_v60 = vmul.f32 %v3815_v5, %v3714_v35  ;;  %v8024_v45 = vmul.f32 %v3818_v9, %v3714_v35  ;;  %v8028_v19 = vmul.f32 %v3821_v50, %v3714_v35  ;;  %v8032_v32 = vmul.f32 %v3824_v24, %v3714_v35 }
 0x5ef   : > { %v8036_v1 = vmul.f32 %v3870_v22, %v3714_v35  ;;  %v8040_v5 = vmul.f32 %v8777_v14, %v3714_v35  ;;  %v8044_v9 = vmul.f32 %v8774_v48, %v3714_v35  ;;  %v8048_v50 = vmul.f32 %v8776_v27, %v3714_v35 }
 0x5f0   : > { %v8052_v24 = vrot.slane %v4274_v41, 2  ;;  %v3770_v36 = vpop.f32.mrf.mxu3  ;;  %v8957_v48 = vperm.slane %v7850_v26, 2  ;;  %v8101_v14 = vrot.slane %v4279_v51, 3 }
 0x5f1   : > { %v8064_v35 = vmul.f32 %v3817_v49, %v3770_v36  ;;  %v8068_v41 = vmul.f32 %v3820_v28, %v3770_v36  ;;  %v8072_v2 = vmul.f32 %v3823_v12, %v3770_v36  ;;  %v8076_v30 = vmul.f32 %v3826_v17, %v3770_v36 }
 0x5f2   : > { %v8080_v34 = vmul.f32 %v8775_v39, %v3770_v36  ;;  %v8084_v49 = vmul.f32 %v8953_v56, %v3770_v36  ;;  %v8088_v28 = vmul.f32 %v8955_v37, %v3770_v36  ;;  %v8092_v12 = vmul.f32 %v8957_v48, %v3770_v36  ;;  %8959 = vst [vmem:[#allocation30_spill] sm:$0xff] %v8101_v14 }
 0x5f3   : > { %8949 = vst [vmem:[#allocation21_spill] sm:$0xff] %v8064_v35  ;;  %v3942_v40 = vrot.slane %v8036_v1, 6  ;;  %v3951_v39 = vrot.slane %v8040_v5, 6  ;;  %v3960_v56 = vrot.slane %v8044_v9, 6  ;;  %v3969_v27 = vrot.slane %v8048_v50, 6 }
 0x5f4   : > { %8950 = vst [vmem:[#allocation22_spill] sm:$0xff] %v8068_v41  ;;  %v8960_v1 = vperm.slane %v7844_v38, 0  ;;  %v8961_v17 = vperm.slane %v7847_v61, 0  ;;  %v8963_v5 = vperm.slane %v8912_v52, 0  ;;  %v8964_v50 = vperm.slane %v7880_v0, 0 }
 0x5f5   : > { %8951 = vst [vmem:[#allocation24_spill] sm:$0xff] %v8072_v2  ;;  %v3716_v37 = vpop.f32.mrf.mxu1 }
 0x5f6   : > { %8952 = vst [vmem:[#allocation25_spill] sm:$0xff] %v8076_v30  ;;  %v3897_v48 = vmul.f32 %v3870_v22, %v3716_v37  ;;  %v3903_v36 = vmul.f32 %v8960_v1, %v3716_v37  ;;  %v3909_v44 = vmul.f32 %v8961_v17, %v3716_v37  ;;  %v3915_v30 = vmul.f32 %v8962_v58, %v3716_v37 }
 0x5f7   : > { %8954 = vst [vmem:[#allocation26_spill] sm:$0xff] %v8084_v49  ;;  %v8113_v9 = vmul.f32 %v8963_v5, %v3716_v37  ;;  %v8117_v51 = vmul.f32 %v8964_v50, %v3716_v37  ;;  %v8121_v22 = vmul.f32 %v8965_v29, %v3716_v37  ;;  %v8966_v1 = vperm.slane %v7892_v54, 0 }
 0x5f8   : > { %8956 = vst [vmem:[#allocation28_spill] sm:$0xff] %v8088_v28  ;;  %v3943_v15 = vrot.slane %v3897_v48, 6  ;;  %v3952_v55 = vrot.slane %v3903_v36, 6  ;;  %v3961_v50 = vrot.slane %v3909_v44, 6  ;;  %v3970_v63 = vrot.slane %v3915_v30, 6  ;;  %v3772_v4 = vpop.f32.mrf.mxu3 }
 0x5f9   : > { %8958 = vst [vmem:[#allocation29_spill] sm:$0xff] %v8092_v12  ;;  %v8125_v3 = vmul.f32 %v8966_v1, %v3716_v37  ;;  %v8967_v29 = vperm.slane %v8901_v6, 2  ;;  %v8968_v37 = vperm.slane %v7844_v38, 2  ;;  %v8970_v17 = vperm.slane %v7847_v61, 2 }
 0x5fa   : > { %v8145_v5 = vmul.f32 %v8972_v57, %v3772_v4  ;;  %v8974_v44 = vperm.slane %v8912_v52, 2  ;;  %v8975_v48 = vperm.slane %v7880_v0, 2  ;;  %v8977_v61 = vperm.slane %v7892_v54, 2 }
 0x5fb   : > { %v8133_v21 = vmul.f32 %v8967_v29, %v3772_v4  ;;  %v8137_v1 = vmul.f32 %v8968_v37, %v3772_v4  ;;  %v8141_v58 = vmul.f32 %v8970_v17, %v3772_v4  ;;  %v8976_v29 = vperm.slane %v7886_v47, 2 }
 0x5fc   : > { %8973 = vst [vmem:[#allocation33_spill] sm:$0xff] %v8145_v5  ;;  %v8149_v30 = vmul.f32 %v8974_v44, %v3772_v4  ;;  %v8153_v36 = vmul.f32 %v8975_v48, %v3772_v4  ;;  %v8161_v17 = vmul.f32 %v8977_v61, %v3772_v4  ;;  %v4094_v57 = vrot.slane %v8113_v9, 4 }
 0x5fd   : > { %8969 = vst [vmem:[#allocation32_spill] sm:$0xff] %v8137_v1  ;;  %v8157_v37 = vmul.f32 %v8976_v29, %v3772_v4  ;;  %v4103_v26 = vrot.slane %v8117_v51, 4  ;;  %v4112_v44 = vrot.slane %v8121_v22, 4  ;;  %v4121_v38 = vrot.slane %v8125_v3, 4  ;;  %v3719_v13 = vpop.f32.mrf.mxu1 }
 0x5fe   : > { %8971 = vst [vmem:[#allocation2_spill] sm:$0xff] %v8141_v58  ;;  %v8978_v61 = vperm.slane %v8912_v52, 0  ;;  %v8979_v9 = vperm.slane %v7880_v0, 0  ;;  %v8980_v51 = vperm.slane %v7886_v47, 0  ;;  %v8981_v3 = vperm.slane %v7892_v54, 0 }
 0x5ff   : > { %v8982_v48 = vperm.slane %v8919_v53, 0  ;;  %v8983_v29 = vperm.slane %v7898_v46, 0  ;;  %v4203_v41 = vmul.f32 %v8984_v42, %v3719_v13  ;;  %v3944_v58 = vsel %vm443_vm1, %v3942_v40, %v3943_v15 }
 0x600   : > { %v4048_v4 = vmul.f32 %v8978_v61, %v3719_v13  ;;  %v4054_v62 = vmul.f32 %v8979_v9, %v3719_v13  ;;  %v4060_v22 = vmul.f32 %v8980_v51, %v3719_v13  ;;  %v4066_v31 = vmul.f32 %v8981_v3, %v3719_v13  ;;  %v3775_v51 = vpop.f32.mrf.mxu3 }
 0x601   : > { %v4197_v6 = vmul.f32 %v8982_v48, %v3719_v13  ;;  %v4200_v2 = vmul.f32 %v8983_v29, %v3719_v13  ;;  %v8985_v61 = vperm.slane %v7910_v11, 0  ;;  %v3953_v3 = vsel %vm443_vm1, %v3951_v39, %v3952_v55 }
 0x602   : > { %v4095_v12 = vrot.slane %v4048_v4, 4  ;;  %v4104_v9 = vrot.slane %v4054_v62, 4  ;;  %v4113_v5 = vrot.slane %v4060_v22, 4  ;;  %v4122_v28 = vrot.slane %v4066_v31, 4 }
 0x603   : > { %v4206_v35 = vmul.f32 %v8985_v61, %v3719_v13  ;;  %v3962_v48 = vsel %vm443_vm1, %v3960_v56, %v3961_v50  ;;  %v3971_v49 = vsel %vm443_vm1, %v3969_v27, %v3970_v63  ;;  %v8986_v29 = vperm.slane %v8912_v52, 2 }
 0x604   : > { %v8987_v42 = vperm.slane %v7880_v0, 2  ;;  %v8988_v62 = vperm.slane %v7886_v47, 2  ;;  %v8989_v15 = vperm.slane %v7892_v54, 2  ;;  %v8990_v39 = vperm.slane %v8919_v53, 2 }
 0x605   : > { %v8193_v1 = vmul.f32 %v8986_v29, %v3775_v51  ;;  %v8991_v63 = vperm.slane %v7898_v46, 2  ;;  %v8992_v56 = vperm.slane %v7904_v8, 2  ;;  %v8993_v4 = vperm.slane %v7910_v11, 2 }
 0x606   : > { %v8197_v13 = vmul.f32 %v8987_v42, %v3775_v51  ;;  %v8201_v31 = vmul.f32 %v8988_v62, %v3775_v51  ;;  %v8205_v40 = vmul.f32 %v8989_v15, %v3775_v51  ;;  %v8209_v55 = vmul.f32 %v8990_v39, %v3775_v51  ;;  %v3721_v15 = vpop.f32.mrf.mxu1 }
 0x607   : > { %v8213_v27 = vmul.f32 %v8991_v63, %v3775_v51  ;;  %v8217_v50 = vmul.f32 %v8992_v56, %v3775_v51  ;;  %v8221_v22 = vmul.f32 %v8993_v4, %v3775_v51  ;;  %v3990_v39 = vadd.f32 %v3944_v58, %v8020_v60 }
 0x608   : > { %v3993_v63 = vadd.f32 %v3953_v3, %v8024_v45  ;;  %v3996_v56 = vadd.f32 %v3962_v48, %v8028_v19  ;;  %v3999_v8 = vadd.f32 %v3971_v49, %v8032_v32  ;;  %v4096_v51 = vsel %vm4093_vm4, %v4094_v57, %v4095_v12  ;;  %v8235_v3 = vpop.f32.mrf.mxu3 }
 0x609   : > { %v4105_v4 = vsel %vm4093_vm4, %v4103_v26, %v4104_v9  ;;  %v4114_v61 = vsel %vm4093_vm4, %v4112_v44, %v4113_v5  ;;  %v4123_v29 = vsel %vm4093_vm4, %v4121_v38, %v4122_v28  ;;  %v4142_v42 = vadd.f32 %v4096_v51, %v3990_v39  ;;  %8994 = vst [vmem:[#allocation34_spill] sm:$0xff] %v8235_v3  ;;  %v9061_v3 = vld [vmem:[#allocation31_spill] sm:$0xff] }
 0x60a   : > { %v4145_v11 = vadd.f32 %v4105_v4, %v3993_v63  ;;  %v4148_v62 = vadd.f32 %v4114_v61, %v3996_v56  ;;  %v4151_v46 = vadd.f32 %v4123_v29, %v3999_v8  ;;  %v4221_v53 = vrot.slane %v4197_v6, 2 }
 0x60b   : > { %v4224_v60 = vrot.slane %v4200_v2, 2  ;;  %v4227_v58 = vrot.slane %v4203_v41, 2  ;;  %v4230_v45 = vrot.slane %v4206_v35, 2  ;;  %v4290_v19 = vperm.slane %v8101_v14, 0  ;;  %v9063_v14 = vld [vmem:[#allocation17_spill] sm:$0xff] }
 0x60c   : > { %v8995_v32 = vperm.slane %v8057_v33, 0  ;;  %v8996_v26 = vperm.slane %v8050_v59, 0  ;;  %v8997_v38 = vperm.slane %v8052_v24, 0  ;;  %v4245_v5 = vadd.f32 %v4221_v53, %v4142_v42 }
 0x60d   : > { %v4248_v57 = vadd.f32 %v4224_v60, %v4145_v11  ;;  %v4251_v8 = vadd.f32 %v4227_v58, %v4148_v62  ;;  %v4254_v6 = vadd.f32 %v4230_v45, %v4151_v46  ;;  %v4314_v2 = vmul.f32 %v4290_v19, %v3721_v15 }
 0x60e   : > { %v4305_v49 = vmul.f32 %v8995_v32, %v3721_v15  ;;  %v4308_v12 = vmul.f32 %v8996_v26, %v3721_v15  ;;  %v4311_v28 = vmul.f32 %v8997_v38, %v3721_v15  ;;  %v8998_v35 = vperm.slane %v8926_v18, 0  ;;  %v3724_v53 = vpop.f32.mrf.mxu1 }
 0x60f   : > { %v8999_v44 = vperm.slane %v7920_v16, 0  ;;  %v9000_v48 = vperm.slane %v7926_v43, 0  ;;  %v9001_v56 = vperm.slane %v7932_v23, 0  ;;  %v4326_v11 = vadd.f32 %v4314_v2, %v4254_v6 }
 0x610   : > { %v4372_v41 = vmul.f32 %v8998_v35, %v3721_v15  ;;  %v4317_v29 = vadd.f32 %v4305_v49, %v4245_v5  ;;  %v4320_v39 = vadd.f32 %v4308_v12, %v4248_v57  ;;  %v4323_v63 = vadd.f32 %v4311_v28, %v4251_v8 }
 0x611   : > { %v4378_v9 = vmul.f32 %v8999_v44, %v3721_v15  ;;  %v4384_v61 = vmul.f32 %v9000_v48, %v3721_v15  ;;  %v4390_v51 = vmul.f32 %v9001_v56, %v3721_v15  ;;  %v9002_v4 = vmov %v8998_v35 }
 0x612   : > { %v4420_v42 = vrot.slane %v4372_v41, 6  ;;  %v4375_v60 = vmul.f32 %v9002_v4, %v3724_v53  ;;  %v9003_v58 = vmov %v8999_v44  ;;  %v9004_v19 = vmov %v9000_v48 }
 0x613   : > { %v4429_v46 = vrot.slane %v4378_v9, 6  ;;  %v4438_v62 = vrot.slane %v4384_v61, 6  ;;  %v4381_v45 = vmul.f32 %v9003_v58, %v3724_v53  ;;  %v4387_v32 = vmul.f32 %v9004_v19, %v3724_v53  ;;  %v8269_v61 = vpop.f32.mrf.mxu3 }
 0x614   : > { %v9005_v49 = vmov %v9001_v56  ;;  %v4447_v12 = vrot.slane %v4390_v51, 6  ;;  %v9006_v15 = vperm.slane %v8939_v25, 0  ;;  %v9007_v28 = vperm.slane %v7942_v7, 0  ;;  %9009 = vst [vmem:[#allocation42_spill] sm:$0xff] %v8269_v61 }
 0x615   : > { %v4393_v26 = vmul.f32 %v9005_v49, %v3724_v53  ;;  %v9008_v57 = vperm.slane %v7948_v20, 0  ;;  %v4421_v6 = vrot.slane %v4375_v60, 6  ;;  %v4430_v2 = vrot.slane %v4381_v45, 6 }
 0x616   : > { %v4523_v38 = vmul.f32 %v9006_v15, %v3724_v53  ;;  %v4529_v5 = vmul.f32 %v9007_v28, %v3724_v53  ;;  %v4439_v35 = vrot.slane %v4387_v32, 6  ;;  %v9010_v56 = vperm.slane %v7954_v10, 0 }
 0x617   : > { %v4535_v8 = vmul.f32 %v9008_v57, %v3724_v53  ;;  %v4448_v41 = vrot.slane %v4393_v26, 6  ;;  %v4422_v4 = vsel %vm443_vm1, %v4420_v42, %v4421_v6  ;;  %v4431_v58 = vsel %vm443_vm1, %v4429_v46, %v4430_v2  ;;  %v9015_v6 = vld [vmem:[#allocation26_spill] sm:$0xff] }
 0x618   : > { %v4541_v51 = vmul.f32 %v9010_v56, %v3724_v53  ;;  %v4440_v60 = vsel %vm443_vm1, %v4438_v62, %v4439_v35  ;;  %v4468_v19 = vadd.f32 %v4422_v4, %v4317_v29  ;;  %v4471_v32 = vadd.f32 %v4431_v58, %v4320_v39  ;;  %v9013_v56 = vld [vmem:[#allocation32_spill] sm:$0xff]  ;;  %v9017_v2 = vld [vmem:[#allocation2_spill] sm:$0xff]  ;;  %v9021_v35 = vld [vmem:[#allocation33_spill] sm:$0xff] }
 0x619   : > { %v4449_v45 = vsel %vm443_vm1, %v4447_v12, %v4448_v41  ;;  %v4474_v49 = vadd.f32 %v4440_v60, %v4323_v63  ;;  %v9011_v28 = vrot.slane %v8133_v21, 6  ;;  %v9012_v57 = vrot.slane %v8080_v34, 6  ;;  %v9019_v29 = vld [vmem:[#allocation28_spill] sm:$0xff]  ;;  %v9023_v21 = vld [vmem:[#allocation29_spill] sm:$0xff] }
 0x61a   : > { %v4477_v26 = vadd.f32 %v4449_v45, %v4326_v11  ;;  %v9014_v42 = vrot.slane %v9013_v56, 6  ;;  %v9016_v46 = vrot.slane %v9015_v6, 6  ;;  %v9018_v12 = vrot.slane %v9017_v2, 6  ;;  %v3726_v11 = vpop.f32.mrf.mxu1  ;;  %v9025_v58 = vld [vmem:[#allocation21_spill] sm:$0xff]  ;;  %v9026_v45 = vld [vmem:[#allocation22_spill] sm:$0xff] }
 0x61b   : > { %v3950_v53 = vsel %vm443_vm1, %v9012_v57, %v9011_v28  ;;  %v9020_v39 = vrot.slane %v9019_v29, 6  ;;  %v9022_v41 = vrot.slane %v9021_v35, 6  ;;  %v9024_v4 = vrot.slane %v9023_v21, 6  ;;  %v9027_v57 = vld [vmem:[#allocation24_spill] sm:$0xff] }
 0x61c   : > { %v3959_v62 = vsel %vm443_vm1, %v9016_v46, %v9014_v42  ;;  %v8301_v60 = vadd.f32 %v3950_v53, %v9025_v58  ;;  %v9028_v42 = vmov %v9006_v15  ;;  %v9029_v46 = vperm.slane %v7942_v7, 0  ;;  %v3742_v53 = vpop.f32.mrf.mxu2  ;;  %v9043_v7 = vld [vmem:[#allocation7_spill] sm:$0xff] }
 0x61d   : > { %v3968_v63 = vsel %vm443_vm1, %v9020_v39, %v9018_v12  ;;  %v8298_v34 = vsel %vm443_vm1, %v9024_v4, %v9022_v41  ;;  %v8304_v28 = vadd.f32 %v3959_v62, %v9026_v45  ;;  %v4526_v6 = vmul.f32 %v9028_v42, %v3726_v11  ;;  %v9032_v41 = vld [vmem:[#allocation27_spill] sm:$0xff]  ;;  %v9034_v4 = vld [vmem:[#allocation14_spill] sm:$0xff]  ;;  %v9038_v42 = vld [vmem:[#allocation16_spill] sm:$0xff] }
 0x61e   : > { %v8307_v56 = vadd.f32 %v3968_v63, %v9027_v57  ;;  %v4532_v2 = vmul.f32 %v9029_v46, %v3726_v11  ;;  %v9030_v12 = vperm.slane %v7948_v20, 0  ;;  %v9031_v39 = vperm.slane %v7954_v10, 0  ;;  %v9036_v45 = vld [vmem:[#allocation11_spill] sm:$0xff]  ;;  %v9040_v46 = vld [vmem:[#allocation38_spill] sm:$0xff] }
 0x61f   : > { %v9033_v21 = vperm.slane %v9032_v41, 0  ;;  %v9035_v58 = vperm.slane %v9034_v4, 0  ;;  %v9037_v57 = vperm.slane %v9036_v45, 0  ;;  %v9039_v48 = vperm.slane %v9038_v42, 0  ;;  %v9049_v45 = vld [vmem:[#allocation36_spill] sm:$0xff] }
 0x620   : > { %v4538_v29 = vmul.f32 %v9030_v12, %v3726_v11  ;;  %v4544_v35 = vmul.f32 %v9031_v39, %v3726_v11  ;;  %v9041_v44 = vperm.slane %v9040_v46, 1  ;;  %v4571_v12 = vrot.slane %v4523_v38, 4 }
 0x621   : > { %v4674_v62 = vmul.f32 %v9033_v21, %v3726_v11  ;;  %v4677_v63 = vmul.f32 %v9035_v58, %v3726_v11  ;;  %v4680_v15 = vmul.f32 %v9037_v57, %v3726_v11  ;;  %v4683_v9 = vmul.f32 %v9039_v48, %v3726_v11  ;;  %v9046_v21 = vld [vmem:[#allocation40_spill] sm:$0xff]  ;;  %v8341_v48 = vpop.f32.mrf.mxu3 }
 0x622   : > { %v8327_v20 = vmul.f32 %v9041_v44, %v3742_v53  ;;  %v4580_v10 = vrot.slane %v4529_v5, 4  ;;  %v4589_v39 = vrot.slane %v4535_v8, 4  ;;  %v9044_v25 = vperm.slane %v9043_v7, 1  ;;  %9052 = vst [vmem:[#allocation33_spill] sm:$0xff] %v8341_v48  ;;  %v9053_v8 = vld [vmem:[#allocation3_spill] sm:$0xff] }
 0x623   : > { %v9047_v4 = vperm.slane %v9046_v21, 1  ;;  %v9050_v57 = vperm.slane %v9049_v45, 1  ;;  %v4598_v11 = vrot.slane %v4541_v51, 4  ;;  %v4572_v44 = vrot.slane %v4526_v6, 4 }
 0x624   : > { %9042 = vst [vmem:[#allocation32_spill] sm:$0xff] %v8327_v20  ;;  %v8331_v41 = vmul.f32 %v9044_v25, %v3742_v53  ;;  %v4581_v46 = vrot.slane %v4532_v2, 4  ;;  %v4590_v38 = vrot.slane %v4538_v29, 4  ;;  %v4599_v5 = vrot.slane %v4544_v35, 4  ;;  %v9055_v25 = vld [vmem:[#allocation35_spill] sm:$0xff]  ;;  %v3729_v29 = vpop.f32.mrf.mxu1 }
 0x625   : > { %v8335_v58 = vmul.f32 %v9047_v4, %v3742_v53  ;;  %v8339_v23 = vmul.f32 %v9050_v57, %v3742_v53  ;;  %v9054_v20 = vperm.slane %v9053_v8, 1  ;;  %v9057_v4 = vld [vmem:[#allocation37_spill] sm:$0xff]  ;;  %v9059_v57 = vld [vmem:[#allocation39_spill] sm:$0xff]  ;;  %v4573_v51 = vsel %vm4093_vm4, %v4571_v12, %v4572_v44 }
 0x626   : > { %9045 = vst [vmem:[#allocation26_spill] sm:$0xff] %v8331_v41  ;;  %v9056_v41 = vperm.slane %v9055_v25, 1  ;;  %v4582_v6 = vsel %vm4093_vm4, %v4580_v10, %v4581_v46  ;;  %v4591_v2 = vsel %vm4093_vm4, %v4589_v39, %v4590_v38  ;;  %v4619_v35 = vadd.f32 %v4573_v51, %v4468_v19  ;;  %v9065_v10 = vld [vmem:[#allocation18_spill] sm:$0xff]  ;;  %v9067_v38 = vld [vmem:[#allocation20_spill] sm:$0xff]  ;;  %v3744_v19 = vpop.f32.mrf.mxu2 }
 0x627   : > { %9048 = vst [vmem:[#allocation2_spill] sm:$0xff] %v8335_v58  ;;  %v8345_v7 = vmul.f32 %v9054_v20, %v3742_v53  ;;  %v9058_v58 = vperm.slane %v9057_v4, 1  ;;  %v4600_v20 = vsel %vm4093_vm4, %v4598_v11, %v4599_v5  ;;  %v4625_v48 = vadd.f32 %v4591_v2, %v4474_v49 }
 0x628   : > { %9051 = vst [vmem:[#allocation28_spill] sm:$0xff] %v8339_v23  ;;  %v8349_v21 = vmul.f32 %v9056_v41, %v3742_v53  ;;  %v9060_v23 = vperm.slane %v9059_v57, 1  ;;  %v4622_v41 = vadd.f32 %v4582_v6, %v4471_v32  ;;  %v4628_v43 = vadd.f32 %v4600_v20, %v4477_v26 }
 0x629   : > { %v8353_v45 = vmul.f32 %v9058_v58, %v3742_v53  ;;  %v4698_v16 = vrot.slane %v4674_v62, 2  ;;  %v4701_v58 = vrot.slane %v4677_v63, 2  ;;  %v4704_v61 = vrot.slane %v4680_v15, 2 }
 0x62a   : > { %v8357_v42 = vmul.f32 %v9060_v23, %v3742_v53  ;;  %v4707_v18 = vrot.slane %v4683_v9, 2  ;;  %v9062_v23 = vperm.slane %v9061_v3, 0  ;;  %v9064_v12 = vperm.slane %v9063_v14, 0 }
 0x62b   : > { %v9066_v46 = vperm.slane %v9065_v10, 0  ;;  %v9068_v11 = vperm.slane %v9067_v38, 0  ;;  %v4722_v32 = vadd.f32 %v4698_v16, %v4619_v35  ;;  %v4725_v49 = vadd.f32 %v4701_v58, %v4622_v41  ;;  %v8387_v16 = vpop.f32.mrf.mxu3 }
 0x62c   : > { %v4777_v53 = vmul.f32 %v9062_v23, %v3729_v29  ;;  %v4780_v44 = vmul.f32 %v9064_v12, %v3729_v29  ;;  %v4728_v26 = vadd.f32 %v4704_v61, %v4625_v48  ;;  %v4731_v62 = vadd.f32 %v4707_v18, %v4628_v43  ;;  %v9102_v23 = vld [vmem:[#allocation9_spill] sm:$0xff] }
 0x62d   : > { %v4783_v39 = vmul.f32 %v9066_v46, %v3729_v29  ;;  %v4786_v5 = vmul.f32 %v9068_v11, %v3729_v29  ;;  %v9069_v15 = vperm.slane %v9053_v8, 1  ;;  %v9070_v63 = vperm.slane %v9055_v25, 1  ;;  %v9105_v25 = vld [vmem:[#allocation23_spill] sm:$0xff] }
 0x62e   : > { %v9071_v6 = vperm.slane %v9057_v4, 1  ;;  %v9072_v20 = vperm.slane %v9059_v57, 1  ;;  %v8389_v61 = vadd.f32 %v4777_v53, %v4722_v32  ;;  %v8391_v18 = vadd.f32 %v4780_v44, %v4725_v49  ;;  %v9077_v53 = vld [vmem:[#allocation25_spill] sm:$0xff] }
 0x62f   : > { %v8373_v9 = vmul.f32 %v9069_v15, %v3744_v19  ;;  %v8377_v51 = vmul.f32 %v9070_v63, %v3744_v19  ;;  %v8393_v43 = vadd.f32 %v4783_v39, %v4728_v26  ;;  %v8395_v48 = vadd.f32 %v4786_v5, %v4731_v62  ;;  %v3731_v15 = vpop.f32.mrf.mxu1 }
 0x630   : > { %v8381_v2 = vmul.f32 %v9071_v6, %v3744_v19  ;;  %v8385_v29 = vmul.f32 %v9072_v20, %v3744_v19  ;;  %9073 = vst [vmem:[#allocation29_spill] sm:$0xff] %v8389_v61  ;;  %v4001_v12 = vadd.f32 %v8298_v34, %v9077_v53  ;;  %v9078_v44 = vrot.slane %v8193_v1, 4 }
 0x631   : > { %9074 = vst [vmem:[#allocation21_spill] sm:$0xff] %v8391_v18  ;;  %v9079_v46 = vrot.slane %v8149_v30, 4  ;;  %v9080_v11 = vrot.slane %v8197_v13, 4  ;;  %v9081_v5 = vrot.slane %v8153_v36, 4  ;;  %v9082_v49 = vrot.slane %v8201_v31, 4 }
 0x632   : > { %9075 = vst [vmem:[#allocation22_spill] sm:$0xff] %v8393_v43  ;;  %v9083_v26 = vrot.slane %v8157_v37, 4  ;;  %v9084_v34 = vperm.slane %v8912_v52, 1  ;;  %v9085_v30 = vperm.slane %v7880_v0, 1  ;;  %v9086_v13 = vperm.slane %v7886_v47, 1 }
 0x633   : > { %9076 = vst [vmem:[#allocation24_spill] sm:$0xff] %v8395_v48  ;;  %v4102_v39 = vsel %vm4093_vm4, %v9079_v46, %v9078_v44  ;;  %v4111_v32 = vsel %vm4093_vm4, %v9081_v5, %v9080_v11  ;;  %v9087_v6 = vperm.slane %v7892_v54, 1  ;;  %v9088_v37 = vrot.slane %v8205_v40, 4  ;;  %v8446_v5 = vpop.f32.mrf.mxu2 }
 0x634   : > { %v4120_v62 = vsel %vm4093_vm4, %v9083_v26, %v9082_v49  ;;  %v8424_v1 = vmul.f32 %v9084_v34, %v3744_v19  ;;  %v8428_v63 = vmul.f32 %v9085_v30, %v3744_v19  ;;  %v8432_v36 = vmul.f32 %v9086_v13, %v3744_v19 }
 0x635   : > { %v8436_v31 = vmul.f32 %v9087_v6, %v3744_v19  ;;  %v9089_v20 = vrot.slane %v8161_v17, 4  ;;  %v4144_v44 = vadd.f32 %v4102_v39, %v8301_v60  ;;  %v4147_v46 = vadd.f32 %v4111_v32, %v8304_v28  ;;  %v3787_v28 = vpop.f32.mrf.mxu3  ;;  %v9092_v6 = vld [vmem:[#allocation19_spill] sm:$0xff] }
 0x636   : > { %v4150_v11 = vadd.f32 %v4120_v62, %v8307_v56  ;;  %v4223_v26 = vrot.slane %v8209_v55, 2  ;;  %v4226_v19 = vrot.slane %v8213_v27, 2  ;;  %v4229_v15 = vrot.slane %v8217_v50, 2  ;;  %v9090_v62 = vld [vmem:[#allocation30_spill] sm:$0xff]  ;;  %v9099_v28 = vld [vmem:[#allocation8_spill] sm:$0xff] }
 0x637   : > { %v4129_v53 = vsel %vm4093_vm4, %v9089_v20, %v9088_v37  ;;  %v4232_v40 = vrot.slane %v8221_v22, 2  ;;  %v4283_v17 = vperm.slane %v8057_v33, 2  ;;  %v4286_v34 = vperm.slane %v8050_v59, 2  ;;  %v9091_v55 = vld [vmem:[#allocation34_spill] sm:$0xff] }
 0x638   : > { %v4153_v49 = vadd.f32 %v4129_v53, %v4001_v12  ;;  %v4289_v60 = vperm.slane %v8052_v24, 2  ;;  %v4247_v39 = vadd.f32 %v4223_v26, %v4144_v44  ;;  %v4250_v56 = vadd.f32 %v4226_v19, %v4147_v46  ;;  %v9094_v53 = vld [vmem:[#allocation42_spill] sm:$0xff] }
 0x639   : > { %v4253_v32 = vadd.f32 %v4229_v15, %v4150_v11  ;;  %v4292_v12 = vperm.slane %v9090_v62, 2  ;;  %v4307_v13 = vmul.f32 %v4283_v17, %v9091_v55  ;;  %v4310_v27 = vmul.f32 %v4286_v34, %v9091_v55  ;;  %v9096_v11 = vld [vmem:[#allocation6_spill] sm:$0xff] }
 0x63a   : > { %v4256_v30 = vadd.f32 %v4232_v40, %v4153_v49  ;;  %v4313_v50 = vmul.f32 %v4289_v60, %v9091_v55  ;;  %v9093_v37 = vperm.slane %v9092_v6, 2  ;;  %v9097_v26 = vperm.slane %v9096_v11, 2 }
 0x63b   : > { %v4316_v22 = vmul.f32 %v4292_v12, %v9091_v55  ;;  %v4319_v19 = vadd.f32 %v4307_v13, %v4247_v39  ;;  %v4322_v15 = vadd.f32 %v4310_v27, %v4250_v56  ;;  %v9100_v12 = vperm.slane %v9099_v28, 2 }
 0x63c   : > { %v4374_v20 = vmul.f32 %v9093_v37, %v9091_v55  ;;  %v9095_v44 = vmov %v9093_v37  ;;  %v4380_v49 = vmul.f32 %v9097_v26, %v9091_v55  ;;  %v4325_v40 = vadd.f32 %v4313_v50, %v4253_v32 }
 0x63d   : > { %v4377_v46 = vmul.f32 %v9095_v44, %v9094_v53  ;;  %v9098_v17 = vmov %v9097_v26  ;;  %v4328_v60 = vadd.f32 %v4316_v22, %v4256_v30  ;;  %v4386_v37 = vmul.f32 %v9100_v12, %v9091_v55  ;;  %v8484_v30 = vpop.f32.mrf.mxu2 }
 0x63e   : > { %v4383_v34 = vmul.f32 %v9098_v17, %v9094_v53  ;;  %v9101_v57 = vmov %v9100_v12  ;;  %v9103_v4 = vperm.slane %v9102_v23, 2  ;;  %v4426_v32 = vrot.slane %v4374_v20, 6 }
 0x63f   : > { %v4389_v44 = vmul.f32 %v9101_v57, %v9094_v53  ;;  %v4427_v13 = vrot.slane %v4377_v46, 6  ;;  %v4435_v27 = vrot.slane %v4380_v49, 6  ;;  %v4444_v22 = vrot.slane %v4386_v37, 6 }
 0x640   : > { %v4392_v26 = vmul.f32 %v9103_v4, %v9091_v55  ;;  %v9104_v39 = vmov %v9103_v4  ;;  %v4436_v50 = vrot.slane %v4383_v34, 6  ;;  %v9106_v41 = vperm.slane %v9105_v25, 2  ;;  %v9107_v55 = vld [vmem:[#allocation33_spill] sm:$0xff]  ;;  %v9109_v34 = vld [vmem:[#allocation10_spill] sm:$0xff] }
 0x641   : > { %v4395_v56 = vmul.f32 %v9104_v39, %v9094_v53  ;;  %v4445_v17 = vrot.slane %v4389_v44, 6  ;;  %v4428_v58 = vsel %vm443_vm1, %v4426_v32, %v4427_v13  ;;  %v9110_v37 = vperm.slane %v9109_v34, 2 }
 0x642   : > { %v4453_v12 = vrot.slane %v4392_v26, 6  ;;  %v4525_v4 = vmul.f32 %v9106_v41, %v9094_v53  ;;  %v9108_v8 = vmov %v9106_v41  ;;  %v4437_v20 = vsel %vm443_vm1, %v4435_v27, %v4436_v50  ;;  %v9115_v50 = vld [vmem:[#allocation13_spill] sm:$0xff] }
 0x643   : > { %v4454_v57 = vrot.slane %v4395_v56, 6  ;;  %v4528_v39 = vmul.f32 %v9108_v8, %v9107_v55  ;;  %v4446_v46 = vsel %vm443_vm1, %v4444_v22, %v4445_v17  ;;  %v4470_v49 = vadd.f32 %v4428_v58, %v4319_v19  ;;  %v9112_v8 = vld [vmem:[#allocation12_spill] sm:$0xff] }
 0x644   : > { %v4531_v44 = vmul.f32 %v9110_v37, %v9094_v53  ;;  %v4473_v56 = vadd.f32 %v4437_v20, %v4322_v15  ;;  %v4476_v32 = vadd.f32 %v4446_v46, %v4325_v40  ;;  %v9111_v41 = vmov %v9110_v37 }
 0x645   : > { %v4455_v26 = vsel %vm443_vm1, %v4453_v12, %v4454_v57  ;;  %v4534_v13 = vmul.f32 %v9111_v41, %v9107_v55  ;;  %v9113_v48 = vperm.slane %v9112_v8, 2  ;;  %v9116_v22 = vperm.slane %v9115_v50, 2  ;;  %v8521_v50 = vpop.f32.mrf.mxu2 }
 0x646   : > { %v4479_v35 = vadd.f32 %v4455_v26, %v4328_v60  ;;  %v4577_v12 = vrot.slane %v4525_v4, 4  ;;  %v4578_v57 = vrot.slane %v4528_v39, 4  ;;  %v4586_v20 = vrot.slane %v4531_v44, 4 }
 0x647   : > { %v4537_v27 = vmul.f32 %v9113_v48, %v9094_v53  ;;  %v9114_v58 = vmov %v9113_v48  ;;  %v4543_v17 = vmul.f32 %v9116_v22, %v9094_v53  ;;  %v9117_v15 = vmov %v9116_v22  ;;  %v9120_v53 = vld [vmem:[#allocation14_spill] sm:$0xff] }
 0x648   : > { %v4540_v19 = vmul.f32 %v9114_v58, %v9107_v55  ;;  %v4546_v40 = vmul.f32 %v9117_v15, %v9107_v55  ;;  %v4587_v60 = vrot.slane %v4534_v13, 4  ;;  %v4579_v48 = vsel %vm4093_vm4, %v4577_v12, %v4578_v57  ;;  %v9118_v58 = vld [vmem:[#allocation27_spill] sm:$0xff] }
 0x649   : > { %v4595_v46 = vrot.slane %v4537_v27, 4  ;;  %v4604_v26 = vrot.slane %v4543_v17, 4  ;;  %v9119_v43 = vperm.slane %v9118_v58, 2  ;;  %v9121_v22 = vperm.slane %v9120_v53, 2  ;;  %v9122_v13 = vld [vmem:[#allocation11_spill] sm:$0xff] }
 0x64a   : > { %v4596_v37 = vrot.slane %v4540_v19, 4  ;;  %v4605_v41 = vrot.slane %v4546_v40, 4  ;;  %v4588_v4 = vsel %vm4093_vm4, %v4586_v20, %v4587_v60  ;;  %v4621_v44 = vadd.f32 %v4579_v48, %v4470_v49 }
 0x64b   : > { %v4676_v18 = vmul.f32 %v9119_v43, %v9107_v55  ;;  %v4679_v61 = vmul.f32 %v9121_v22, %v9107_v55  ;;  %v9123_v27 = vperm.slane %v9122_v13, 2  ;;  %v4624_v15 = vadd.f32 %v4588_v4, %v4473_v56  ;;  %v9124_v43 = vld [vmem:[#allocation16_spill] sm:$0xff] }
 0x64c   : > { %v4597_v39 = vsel %vm4093_vm4, %v4595_v46, %v4596_v37  ;;  %v4606_v17 = vsel %vm4093_vm4, %v4604_v26, %v4605_v41  ;;  %v9125_v12 = vperm.slane %v9124_v43, 2  ;;  %v9126_v49 = vperm.slane %v9061_v3, 2 }
 0x64d   : > { %v4682_v19 = vmul.f32 %v9123_v27, %v9107_v55  ;;  %v4627_v40 = vadd.f32 %v4597_v39, %v4476_v32  ;;  %v4630_v22 = vadd.f32 %v4606_v17, %v4479_v35  ;;  %v4700_v53 = vrot.slane %v4676_v18, 2 }
 0x64e   : > { %v4685_v57 = vmul.f32 %v9125_v12, %v9107_v55  ;;  %v4703_v58 = vrot.slane %v4679_v61, 2  ;;  %v4779_v60 = vmul.f32 %v9126_v49, %v8387_v16  ;;  %v9127_v46 = vperm.slane %v9063_v14, 2 }
 0x64f   : > { %v4706_v8 = vrot.slane %v4682_v19, 2  ;;  %v9128_v56 = vperm.slane %v9065_v10, 2  ;;  %v4724_v26 = vadd.f32 %v4700_v53, %v4621_v44  ;;  %v9129_v61 = vperm.slane %v9067_v38, 2 }
 0x650   : > { %v4709_v20 = vrot.slane %v4685_v57, 2  ;;  %v4782_v37 = vmul.f32 %v9127_v46, %v8387_v16  ;;  %v4727_v48 = vadd.f32 %v4703_v58, %v4624_v15  ;;  %v9130_v41 = vperm.slane %v8912_v52, 1 }
 0x651   : > { %v4785_v32 = vmul.f32 %v9128_v56, %v8387_v16  ;;  %v4730_v55 = vadd.f32 %v4706_v8, %v4627_v40  ;;  %v4788_v18 = vmul.f32 %v9129_v61, %v8387_v16  ;;  %v9131_v39 = vperm.slane %v7880_v0, 1 }
 0x652   : > { %v4733_v35 = vadd.f32 %v4709_v20, %v4630_v22  ;;  %v4049_v4 = vmul.f32 %v9130_v41, %v8446_v5  ;;  %v9132_v19 = vperm.slane %v7886_v47, 1  ;;  %v8553_v53 = vadd.f32 %v4779_v60, %v4724_v26  ;;  %v8567_v47 = vpop.f32.mrf.mxu2  ;;  %v9134_v60 = vld [vmem:[#allocation15_spill] sm:$0xff]  ;;  %v9140_v26 = vld [vmem:[#allocation5_spill] sm:$0xff] }
 0x653   : > { %v4055_v27 = vmul.f32 %v9131_v39, %v8446_v5  ;;  %v8555_v8 = vadd.f32 %v4782_v37, %v4727_v48  ;;  %v8557_v58 = vadd.f32 %v4785_v32, %v4730_v55  ;;  %v9133_v16 = vperm.slane %v7892_v54, 1 }
 0x654   : > { %v4061_v17 = vmul.f32 %v9132_v19, %v8446_v5  ;;  %v4097_v52 = vrot.slane %v8424_v1, 4  ;;  %v4106_v15 = vrot.slane %v8428_v63, 4  ;;  %v4115_v0 = vrot.slane %v8432_v36, 4  ;;  %v9136_v1 = vld [vmem:[#allocation41_spill] sm:$0xff]  ;;  %v9138_v36 = vld [vmem:[#allocation4_spill] sm:$0xff] }
 0x655   : > { %v4067_v44 = vmul.f32 %v9133_v16, %v8446_v5  ;;  %v8565_v40 = vadd.f32 %v4788_v18, %v4733_v35  ;;  %v4124_v12 = vrot.slane %v8436_v31, 4  ;;  %v4098_v57 = vrot.slane %v4049_v4, 4 }
 0x656   : > { %v4107_v22 = vrot.slane %v4055_v27, 4  ;;  %v4116_v20 = vrot.slane %v4061_v17, 4  ;;  %v9135_v54 = vperm.slane %v9134_v60, 1  ;;  %v9137_v37 = vperm.slane %v9136_v1, 1  ;;  %v9150_v17 = vld [vmem:[#allocation26_spill] sm:$0xff]  ;;  %v9152_v60 = vld [vmem:[#allocation28_spill] sm:$0xff] }
 0x657   : > { %v4125_v49 = vrot.slane %v4067_v44, 4  ;;  %v9139_v56 = vperm.slane %v9138_v36, 1  ;;  %v9141_v48 = vperm.slane %v9140_v26, 1  ;;  %v9142_v55 = vrot.slane %v8373_v9, 6  ;;  %v9151_v44 = vld [vmem:[#allocation2_spill] sm:$0xff] }
 0x658   : > { %v4198_v46 = vmul.f32 %v9135_v54, %v8446_v5  ;;  %v4201_v63 = vmul.f32 %v9137_v37, %v8446_v5  ;;  %v9143_v61 = vrot.slane %v8345_v7, 6  ;;  %v9144_v35 = vrot.slane %v8377_v51, 6  ;;  %v9153_v54 = vld [vmem:[#allocation32_spill] sm:$0xff] }
 0x659   : > { %v4204_v32 = vmul.f32 %v9139_v56, %v8446_v5  ;;  %v4207_v31 = vmul.f32 %v9141_v48, %v8446_v5  ;;  %v9145_v41 = vrot.slane %v8349_v21, 6  ;;  %v9146_v39 = vrot.slane %v8381_v2, 6 }
 0x65a   : > { %v3947_v18 = vsel %vm443_vm1, %v9143_v61, %v9142_v55  ;;  %v9147_v27 = vrot.slane %v8353_v45, 6  ;;  %v9148_v5 = vrot.slane %v8385_v29, 6  ;;  %v9149_v9 = vrot.slane %v8357_v42, 6 }
 0x65b   : > { %v3956_v4 = vsel %vm443_vm1, %v9145_v41, %v9144_v35  ;;  %v3991_v16 = vadd.f32 %v3947_v18, %v9150_v17  ;;  %v4099_v2 = vsel %vm4093_vm4, %v4097_v52, %v4098_v57  ;;  %v4108_v45 = vsel %vm4093_vm4, %v4106_v15, %v4107_v22  ;;  %v8610_v18 = vpop.f32.mrf.mxu2 }
 0x65c   : > { %v3965_v19 = vsel %vm443_vm1, %v9147_v27, %v9146_v39  ;;  %v3974_v7 = vsel %vm443_vm1, %v9149_v9, %v9148_v5  ;;  %v3994_v51 = vadd.f32 %v3956_v4, %v9151_v44  ;;  %v4117_v37 = vsel %vm4093_vm4, %v4115_v0, %v4116_v20 }
 0x65d   : > { %v3997_v21 = vadd.f32 %v3965_v19, %v9152_v60  ;;  %v4000_v1 = vadd.f32 %v3974_v7, %v9153_v54  ;;  %v4126_v29 = vsel %vm4093_vm4, %v4124_v12, %v4125_v49  ;;  %v4143_v36 = vadd.f32 %v4099_v2, %v3991_v16 }
 0x65e   : > { %v4146_v42 = vadd.f32 %v4108_v45, %v3994_v51  ;;  %v4222_v48 = vrot.slane %v4198_v46, 2  ;;  %v4225_v55 = vrot.slane %v4201_v63, 2  ;;  %v4228_v61 = vrot.slane %v4204_v32, 2 }
 0x65f   : > { %v4149_v56 = vadd.f32 %v4117_v37, %v3997_v21  ;;  %v4152_v26 = vadd.f32 %v4126_v29, %v4000_v1  ;;  %v4231_v35 = vrot.slane %v4207_v31, 2  ;;  %v4282_v41 = vperm.slane %v8057_v33, 1 }
 0x660   : > { %v4285_v52 = vperm.slane %v8050_v59, 1  ;;  %v4288_v15 = vperm.slane %v8052_v24, 1  ;;  %v4246_v57 = vadd.f32 %v4222_v48, %v4143_v36  ;;  %v4249_v0 = vadd.f32 %v4225_v55, %v4146_v42 }
 0x661   : > { %v4252_v22 = vadd.f32 %v4228_v61, %v4149_v56  ;;  %v4291_v12 = vperm.slane %v9090_v62, 1  ;;  %v4255_v20 = vadd.f32 %v4231_v35, %v4152_v26  ;;  %v4306_v49 = vmul.f32 %v4282_v41, %v8484_v30 }
 0x662   : > { %v4309_v46 = vmul.f32 %v4285_v52, %v8484_v30  ;;  %v4312_v63 = vmul.f32 %v4288_v15, %v8484_v30  ;;  %v9154_v33 = vperm.slane %v9092_v6, 1  ;;  %v9156_v62 = vperm.slane %v9096_v11, 1 }
 0x663   : > { %v4315_v32 = vmul.f32 %v4291_v12, %v8484_v30  ;;  %v4318_v39 = vadd.f32 %v4306_v49, %v4246_v57  ;;  %v9158_v17 = vperm.slane %v9099_v28, 1  ;;  %v9160_v51 = vperm.slane %v9102_v23, 1  ;;  %v3759_v23 = vpop.f32.mrf.mxu2 }
 0x664   : > { %v4373_v59 = vmul.f32 %v9154_v33, %v8484_v30  ;;  %v9155_v24 = vmov %v9154_v33  ;;  %v4379_v4 = vmul.f32 %v9156_v62, %v8484_v30  ;;  %v4321_v27 = vadd.f32 %v4309_v46, %v4249_v0  ;;  %v9169_v33 = vld [vmem:[#allocation13_spill] sm:$0xff] }
 0x665   : > { %v4376_v31 = vmul.f32 %v9155_v24, %v8521_v50  ;;  %v4324_v19 = vadd.f32 %v4312_v63, %v4252_v22  ;;  %v9157_v5 = vmov %v9156_v62  ;;  %v4327_v7 = vadd.f32 %v4315_v32, %v4255_v20  ;;  %v9166_v20 = vld [vmem:[#allocation12_spill] sm:$0xff] }
 0x666   : > { %v4382_v9 = vmul.f32 %v9157_v5, %v8521_v50  ;;  %v4385_v16 = vmul.f32 %v9158_v17, %v8484_v30  ;;  %v9159_v6 = vmov %v9158_v17  ;;  %v4391_v60 = vmul.f32 %v9160_v51, %v8484_v30 }
 0x667   : > { %v4388_v44 = vmul.f32 %v9159_v6, %v8521_v50  ;;  %v9161_v21 = vmov %v9160_v51  ;;  %v4423_v1 = vrot.slane %v4373_v59, 6  ;;  %v4424_v11 = vrot.slane %v4376_v31, 6 }
 0x668   : > { %v4394_v54 = vmul.f32 %v9161_v21, %v8521_v50  ;;  %v4432_v2 = vrot.slane %v4379_v4, 6  ;;  %v4433_v45 = vrot.slane %v4382_v9, 6  ;;  %v4441_v37 = vrot.slane %v4385_v16, 6  ;;  %v9172_v16 = vld [vmem:[#allocation27_spill] sm:$0xff] }
 0x669   : > { %v4442_v29 = vrot.slane %v4388_v44, 6  ;;  %v4450_v36 = vrot.slane %v4391_v60, 6  ;;  %v4425_v42 = vsel %vm443_vm1, %v4423_v1, %v4424_v11  ;;  %v9162_v28 = vperm.slane %v9105_v25, 1 }
 0x66a   : > { %v4451_v56 = vrot.slane %v4394_v54, 6  ;;  %v4434_v55 = vsel %vm443_vm1, %v4432_v2, %v4433_v45  ;;  %v4469_v35 = vadd.f32 %v4425_v42, %v4318_v39  ;;  %v9164_v41 = vperm.slane %v9109_v34, 1 }
 0x66b   : > { %v4524_v26 = vmul.f32 %v9162_v28, %v8521_v50  ;;  %v9163_v30 = vmov %v9162_v28  ;;  %v4443_v61 = vsel %vm443_vm1, %v4441_v37, %v4442_v29  ;;  %v4472_v57 = vadd.f32 %v4434_v55, %v4321_v27 }
 0x66c   : > { %v4527_v48 = vmul.f32 %v9163_v30, %v8567_v47  ;;  %v4530_v52 = vmul.f32 %v9164_v41, %v8521_v50  ;;  %v4452_v15 = vsel %vm443_vm1, %v4450_v36, %v4451_v56  ;;  %v4475_v0 = vadd.f32 %v4443_v61, %v4324_v19 }
 0x66d   : > { %v9165_v22 = vmov %v9164_v41  ;;  %v4478_v25 = vadd.f32 %v4452_v15, %v4327_v7  ;;  %v9167_v49 = vperm.slane %v9166_v20, 1  ;;  %v9170_v59 = vperm.slane %v9169_v33, 1 }
 0x66e   : > { %v4533_v12 = vmul.f32 %v9165_v22, %v8567_v47  ;;  %v4574_v4 = vrot.slane %v4524_v26, 4  ;;  %v4575_v34 = vrot.slane %v4527_v48, 4  ;;  %v4583_v39 = vrot.slane %v4530_v52, 4 }
 0x66f   : > { %v4536_v46 = vmul.f32 %v9167_v49, %v8521_v50  ;;  %v9168_v63 = vmov %v9167_v49  ;;  %v4542_v24 = vmul.f32 %v9170_v59, %v8521_v50  ;;  %v9171_v31 = vmov %v9170_v59  ;;  %v9174_v50 = vld [vmem:[#allocation14_spill] sm:$0xff] }
 0x670   : > { %v4539_v32 = vmul.f32 %v9168_v63, %v8567_v47  ;;  %v4545_v62 = vmul.f32 %v9171_v31, %v8567_v47  ;;  %v4584_v27 = vrot.slane %v4533_v12, 4  ;;  %v4576_v7 = vsel %vm4093_vm4, %v4574_v4, %v4575_v34 }
 0x671   : > { %v4592_v19 = vrot.slane %v4536_v46, 4  ;;  %v4601_v9 = vrot.slane %v4542_v24, 4  ;;  %v9173_v6 = vperm.slane %v9172_v16, 1  ;;  %v9175_v51 = vperm.slane %v9174_v50, 1  ;;  %v9183_v24 = vld [vmem:[#allocation21_spill] sm:$0xff] }
 0x672   : > { %v4593_v5 = vrot.slane %v4539_v32, 4  ;;  %v4602_v17 = vrot.slane %v4545_v62, 4  ;;  %v4585_v21 = vsel %vm4093_vm4, %v4583_v39, %v4584_v27  ;;  %v4620_v1 = vadd.f32 %v4576_v7, %v4469_v35 }
 0x673   : > { %v4675_v44 = vmul.f32 %v9173_v6, %v8567_v47  ;;  %v4678_v60 = vmul.f32 %v9175_v51, %v8567_v47  ;;  %v9176_v11 = vperm.slane %v9122_v13, 1  ;;  %v4623_v37 = vadd.f32 %v4585_v21, %v4472_v57  ;;  %v9185_v21 = vld [vmem:[#allocation24_spill] sm:$0xff] }
 0x674   : > { %v4594_v54 = vsel %vm4093_vm4, %v4592_v19, %v4593_v5  ;;  %v4603_v45 = vsel %vm4093_vm4, %v4601_v9, %v4602_v17  ;;  %v9177_v36 = vperm.slane %v9124_v43, 1  ;;  %v9178_v23 = vperm.slane %v9061_v3, 1  ;;  %v9184_v9 = vld [vmem:[#allocation22_spill] sm:$0xff] }
 0x675   : > { %v4681_v2 = vmul.f32 %v9176_v11, %v8567_v47  ;;  %v4626_v29 = vadd.f32 %v4594_v54, %v4475_v0  ;;  %v4629_v56 = vadd.f32 %v4603_v45, %v4478_v25  ;;  %v4699_v28 = vrot.slane %v4675_v44, 2 }
 0x676   : > { %v4684_v42 = vmul.f32 %v9177_v36, %v8567_v47  ;;  %v4702_v26 = vrot.slane %v4678_v60, 2  ;;  %v4778_v55 = vmul.f32 %v9178_v23, %v8610_v18  ;;  %v9179_v13 = vperm.slane %v9063_v14, 1 }
 0x677   : > { %v4705_v30 = vrot.slane %v4681_v2, 2  ;;  %v9180_v35 = vperm.slane %v9065_v10, 1  ;;  %v4723_v52 = vadd.f32 %v4699_v28, %v4620_v1  ;;  %v9181_v15 = vperm.slane %v9067_v38, 1 }
 0x678   : > { %v4708_v48 = vrot.slane %v4684_v42, 2  ;;  %v4781_v61 = vmul.f32 %v9179_v13, %v8610_v18  ;;  %v4726_v43 = vadd.f32 %v4702_v26, %v4623_v37  ;;  %v4814_v25 = vrot.slane %v8553_v53, 4 }
 0x679   : > { %v4784_v41 = vmul.f32 %v9180_v35, %v8610_v18  ;;  %v4729_v47 = vadd.f32 %v4705_v30, %v4626_v29  ;;  %v4787_v57 = vmul.f32 %v9181_v15, %v8610_v18  ;;  %v4790_v22 = vadd.f32 %v4778_v55, %v4723_v52  ;;  %v9182_v18 = vld [vmem:[#allocation29_spill] sm:$0xff] }
 0x67a   : > { %v4732_v0 = vadd.f32 %v4708_v48, %v4629_v56  ;;  %v4793_v12 = vadd.f32 %v4781_v61, %v4726_v43  ;;  %v4816_v14 = vrot.slane %v8555_v8, 4  ;;  %v4818_v46 = vrot.slane %v8557_v58, 4 }
 0x67b   : > { %v4796_v3 = vadd.f32 %v4784_v41, %v4729_v47  ;;  %v4813_v49 = vrot.slane %v4790_v22, 6  ;;  %v4820_v63 = vrot.slane %v8565_v40, 4 }
 0x67c   : > { %v4799_v20 = vadd.f32 %v4787_v57, %v4732_v0  ;;  %v4815_v10 = vrot.slane %v4793_v12, 6  ;;  %v4898_v0 = vld [vmem:[%s8760_s7] sm:$0xf] }
 0x67d   : > { %v4817_v32 = vrot.slane %v4796_v3, 6  ;;  %v4821_v33 = vsel %vm443_vm1, %v9182_v18, %v4813_v49  ;;  %v4823_v59 = vsel %vm3807_vm9, %v9182_v18, %v4813_v49  ;;  %v4828_v53 = vsel %vm4827_vm5, %v9182_v18, %v4813_v49 }
 0x67e   : > { %v4819_v38 = vrot.slane %v4799_v20, 6  ;;  %v4831_v8 = vsel %vm443_vm1, %v9183_v24, %v4815_v10  ;;  %v4822_v31 = vsel %vm4093_vm4, %v4821_v33, %v4814_v25  ;;  %v4825_v58 = vsel %vm4824_vm6, %v4823_v59, %v4814_v25 }
 0x67f   : > { %v4829_v40 = vsel %vm4093_vm4, %v4814_v25, %v4828_v53  ;;  %v4832_v62 = vsel %vm4093_vm4, %v4831_v8, %v4816_v14  ;;  %v4826_v4 = vrot.slane %v4825_v58, 2  ;;  %v4833_v39 = vsel %vm3807_vm9, %v9183_v24, %v4815_v10  ;;  %4855 = vst [vmem:[#allocation1] ss:$4 sm:$0xff] %v4822_v31  ;;  %v4903_v25 = vpop.permute.xlu1 %4902 }
 0x680   : > { %v4830_v34 = vrot.slane %v4829_v40, 4  ;;  %v4836_v27 = vsel %vm4827_vm5, %v9183_v24, %v4815_v10  ;;  %v4834_v19 = vsel %vm4824_vm6, %v4833_v39, %v4816_v14  ;;  %v4839_v7 = vsel %vm443_vm1, %v9184_v9, %v4817_v32  ;;  %4861 = vst [vmem:[#allocation1 + $0x3] ss:$4 sm:$0xff] %v4832_v62 }
 0x681   : > { %v4837_v5 = vsel %vm4093_vm4, %v4816_v14, %v4836_v27  ;;  %v4841_v17 = vsel %vm3807_vm9, %v9184_v9, %v4817_v32  ;;  %v4835_v16 = vrot.slane %v4834_v19, 2  ;;  %v4840_v44 = vsel %vm4093_vm4, %v4839_v7, %v4818_v46  ;;  %4857 = vst [vmem:[#allocation1 + $0x1] ss:$4 sm:$0xff] %v4826_v4 }
 0x682   : > { %v4838_v6 = vrot.slane %v4837_v5, 4  ;;  %v4842_v50 = vsel %vm4824_vm6, %v4841_v17, %v4818_v46  ;;  %v4844_v60 = vsel %vm4827_vm5, %v9184_v9, %v4817_v32  ;;  %v4847_v54 = vsel %vm443_vm1, %v9185_v21, %v4819_v38  ;;  %4859 = vst [vmem:[#allocation1 + $0x2] ss:$4 sm:$0xff] %v4830_v34 }
 0x683   : > { %v4843_v51 = vrot.slane %v4842_v50, 2  ;;  %v4849_v1 = vsel %vm3807_vm9, %v9185_v21, %v4819_v38  ;;  %v4845_v11 = vsel %vm4093_vm4, %v4818_v46, %v4844_v60  ;;  %v4848_v2 = vsel %vm4093_vm4, %v4847_v54, %v4820_v63  ;;  %4863 = vst [vmem:[#allocation1 + $0x20] ss:$4 sm:$0xff] %v4835_v16 }
 0x684   : > { %v4850_v45 = vsel %vm4824_vm6, %v4849_v1, %v4820_v63  ;;  %v4852_v37 = vsel %vm4827_vm5, %v9185_v21, %v4819_v38  ;;  %4865 = vst [vmem:[#allocation1 + $0x21] ss:$4 sm:$0xff] %v4838_v6  ;;  %v4846_v36 = vrot.slane %v4845_v11, 4  ;;  %vm4905_vm1 = vcmask 195584  }
 0x685   : > { %v4853_v29 = vsel %vm4093_vm4, %v4820_v63, %v4852_v37  ;;  %4867 = vst [vmem:[#allocation1 + $0x22] ss:$4 sm:$0xff] %v4840_v44  ;;  %v4851_v26 = vrot.slane %v4850_v45, 2 }
 0x686   : > { %4869 = vst [vmem:[#allocation1 + $0x23] ss:$4 sm:$0xff] %v4843_v51  ;;  %v4854_v30 = vrot.slane %v4853_v29, 4 }
 0x689   : > { %v4870_v42 = vld.sshfl [vmem:[#allocation1] sm:$0xff pattern:$0x73625140]  ;;  %v4871_v56 = vld.sshfl [vmem:[#allocation1 + $0x8] sm:$0xff pattern:$0x73625140] }
 0x68a   : > { %v4872_v28 = vld.sshfl [vmem:[#allocation1 + $0x10] sm:$0xff pattern:$0x73625140] }
 0x68b   : > { %4876 = vst [vmem:[#allocation1] ss:$4 sm:$0xff] %v4846_v36 }
 0x68c   : > { %4877 = vst [vmem:[#allocation1 + $0x1] ss:$4 sm:$0xff] %v4848_v2 }
 0x68d   : > { %4878 = vst [vmem:[#allocation1 + $0x2] ss:$4 sm:$0xff] %v4851_v26  ;;  %v4873_v35 = vld.sshfl [vmem:[#allocation1 + $0x20] sm:$0xff pattern:$0x73625140] }
 0x68e   : > { %4879 = vst [vmem:[#allocation1 + $0x3] ss:$4 sm:$0xff] %v4854_v30  ;;  %v4875_v43 = vld.sshfl [vmem:[#allocation1 + $0x30] sm:$0xff pattern:$0x73625140]  ;;  %v4892_v15 = vpack.c.bf16 %v4873_v35, %v4870_v42 }
 0x68f   : > { %v4894_v57 = vpack.c.bf16 %v4875_v43, %v4872_v28  ;;  %v4874_v12 = vld.sshfl [vmem:[#allocation1 + $0x28] sm:$0xff pattern:$0x73625140] }
 0x690   : > { %v4893_v3 = vpack.c.bf16 %v4874_v12, %v4871_v56 }
 0x695   : > { %v4880_v48 = vld.sshfl [vmem:[#allocation1] sm:$0xff pattern:$0x73625140]  ;;  %v4882_v23 = vld.sshfl [vmem:[#allocation1 + $0x10] sm:$0xff pattern:$0x73625140] }
 0x696   : > { %v4895_v55 = vpack.c.bf16 %v4880_v48, %v4880_v48  ;;  %v4897_v13 = vpack.c.bf16 %v4882_v23, %v4882_v23  ;;  %v4881_v61 = vld.sshfl [vmem:[#allocation1 + $0x8] sm:$0xff pattern:$0x73625140] }
 0x697   : > { %v4896_v47 = vpack.c.bf16 %v4881_v61, %v4881_v61 }
 0x698   : > { %v4910_v41 = vsel %vm4093_vm4, %v4895_v55, 0  ;;  %v4916_v52 = vsel %vm4093_vm4, %v4897_v13, 0 }
 0x699   : > { %4924 = vmatpush.bf16.msra.mxu0 %v4910_v41  ;;  %4950 = vmatpush.bf16.msra.mxu1 %v4916_v52  ;;  %v4913_v22 = vsel %vm4093_vm4, %v4896_v47, 0 }
 0x69d   : > { %4925 = vmatpush.bf16.msra.mxu0 %v4892_v15  ;;  %4951 = vmatpush.bf16.msra.mxu1 %v4894_v57 }
 0x6a0   : > { %5555 = vmatmul.msk.bf16.vlgmr.msra.gmra.mxu0 %vm4905_vm1, %v4898_v0  ;;  %5557 = vmatmul.msk.bf16.vlgmr.msra.gmra.mxu1 %vm4905_vm1, %v4898_v0 }
 0x6a1   : > { %4937 = vmatpush.bf16.msrb.mxu0 %v4913_v22 }
 0x6a5   : > { %4938 = vmatpush.bf16.msrb.mxu0 %v4893_v3 }
 0x6b0   : > { %5556 = vmatmul.msk.bf16.vlgmr.msrb.gmra.mxu0 %vm4905_vm1, %v4898_v0 }
 0x71d   : > { %v4927_v20 = vpop.f32.mrf.mxu0  ;;  %v4953_v14 = vpop.f32.mrf.mxu1 }
 0x71e   : > { %v4928_v49 = vadd.f32 %v4927_v20, %v4903_v25  ;;  %v4954_v10 = vadd.f32 %v4953_v14, %v4903_v25 }
 0x720   : > { %4957 = vst [vmem:[%s332_s29] sm:$0xff] %v4928_v49 }
 0x721   : > { %4959 = vst [vmem:[%s332_s29 + $0x10] sm:$0xff] %v4954_v10 }
 0x725   : > { %v4929_v46 = vpop.f32.mrf.mxu0  ;;  %v4955_v63 = vpop.f32.mrf.mxu1 }
 0x72d   : > { %v4940_v32 = vpop.f32.mrf.mxu0 }
 0x72e   : > { %v4941_v38 = vadd.f32 %v4940_v32, %v4903_v25 }
 0x730   : > { %4958 = vst [vmem:[%s332_s29 + $0x8] sm:$0xff] %v4941_v38 }
 0x735   : > { %v4942_v18 = vpop.f32.mrf.mxu0 }
 0x736 PF: > { %s19_s30 = sadd.s32 1, %s5724_s30  }
 0x737   : > { %p16_p4 = scmp.ge.s32.totalorder %s19_s30, 4  }
 0x739   :  { %18 = sbr.rel (!%p16_p4) target bundleno = 1 (0x1), region = 109 }

</bundles_post_ra>
